<compile_context>
chip_gen: v7x
topology: tpu7x:2x2x1
jax: 0.10.0
libtpu: 0.0.40
codegen_flags: <defaults>
</compile_context>

<pallas_src>
import functools

import jax
import jax.numpy as jnp
from jax import lax
from jax.experimental import pallas as pl
from jax.experimental.pallas import tpu as pltpu


def _layer_norm(z, gamma, beta, eps=1e-5):
    mu = jnp.mean(z, axis=-1, keepdims=True)
    var = jnp.mean((z - mu) ** 2, axis=-1, keepdims=True)
    return (z - mu) * lax.rsqrt(var + eps) * gamma + beta


def encoder_block_kernel(*refs, n_heads, same_dim, compute_dtype):
    it = iter(refs)
    x_ref = next(it)                                   # (1, S, Din)  compute dtype
    w_qres_ref = next(it)                              # (Din, q_width) [Wq*scale | Wres?]
    w_kv_ref = next(it)                                # (Din, 2*Dout)  [Wk | Wv]
    bres_ref = None if same_dim else next(it)          # (1, Dout) f32
    ln1_g_ref, ln1_b_ref = next(it), next(it)          # (1, Dout) f32
    w1_ref, b1_ref = next(it), next(it)                # (Dout, 4D) cd, (1, 4D) f32
    w2_ref, b2_ref = next(it), next(it)                # (4D, Dout) cd, (1, Dout) f32
    ln2_g_ref, ln2_b_ref = next(it), next(it)          # (1, Dout) f32
    o_ref = next(it)                                   # (1, tq, Dout)
    kv_ref = next(it)                                  # scratch (S, 2*Dout) compute dtype

    d_out = w1_ref.shape[0]
    hd = d_out // n_heads
    tq = o_ref.shape[1]
    qi = pl.program_id(1)

    # --- K/V projection over the full sequence, once per batch (qi == 0) ---
    @pl.when(qi == 0)
    def _():
        x_all = x_ref[0].astype(compute_dtype)                        # (S, Din)
        kv_ref[...] = jnp.dot(x_all, w_kv_ref[...],
                              preferred_element_type=jnp.float32
                              ).astype(compute_dtype)                 # (S, 2*Dout)

    # --- query tile sliced from the already-resident full-sequence block ---
    q_start = pl.multiple_of(qi * tq, tq)
    x_q = x_ref[0, pl.ds(q_start, tq), :]                             # (tq, Din)
    xq_c = x_q.astype(compute_dtype)

    proj_q = jnp.dot(xq_c, w_qres_ref[...],
                     preferred_element_type=jnp.float32)              # (tq, q_width) f32
    if same_dim:
        q = proj_q.astype(compute_dtype)                              # scale folded in Wq
        res = x_q.astype(jnp.float32)                                 # residual = input
    else:
        q = proj_q[:, :d_out].astype(compute_dtype)
        res = proj_q[:, d_out:] + bres_ref[...]                       # fused residual proj

    kv = kv_ref[...]                                                  # (S, 2*Dout) cd

    # --- per-head attention (q @ k^T via dot_general, no explicit transpose) ---
    head_outs = []
    for h in range(n_heads):
        qh = q[:, h * hd:(h + 1) * hd]                                # (tq, hd)
        kh = kv[:, h * hd:(h + 1) * hd]                               # (S, hd)
        vh = kv[:, d_out + h * hd:d_out + (h + 1) * hd]               # (S, hd)
        s = lax.dot_general(qh, kh, (((1,), (1,)), ((), ())),
                            preferred_element_type=jnp.float32)       # (tq, S)
        s = s - jnp.max(s, axis=-1, keepdims=True)
        p = jnp.exp(s)
        denom = jnp.sum(p, axis=-1, keepdims=True)                    # (tq, 1)
        oh = jnp.dot(p.astype(compute_dtype), vh,
                     preferred_element_type=jnp.float32)              # (tq, hd)
        head_outs.append(oh * pl.reciprocal(denom, approx=True))
    o = jnp.concatenate(head_outs, axis=-1) if n_heads > 1 else head_outs[0]

    # dropout1: identity (eval mode)
    out1 = _layer_norm(o + res, ln1_g_ref[...], ln1_b_ref[...])       # (tq, Dout) f32

    # --- feed-forward ---
    h1 = jnp.dot(out1.astype(compute_dtype), w1_ref[...],
                 preferred_element_type=jnp.float32) + b1_ref[...]
    h1 = jnp.maximum(h1, 0.0)
    ff = jnp.dot(h1.astype(compute_dtype), w2_ref[...],
                 preferred_element_type=jnp.float32) + b2_ref[...]
    # dropout2: identity (eval mode)
    y = _layer_norm(ff + out1, ln2_g_ref[...], ln2_b_ref[...])

    o_ref[0] = y.astype(o_ref.dtype)


def _pick_vmem_limit():
    """Generation-aware scoped-VMEM limit with headroom for Mosaic scratch."""
    cap = None
    try:
        cap = getattr(pltpu.get_tpu_info(), "vmem_capacity_bytes", None)
    except Exception:
        cap = None
    if not cap:
        return 64 * 1024 * 1024
    # v7x: 64 MiB physical -> ~48 MiB; v5e/v6e: 128 MiB -> ~110 MiB.
    return max(32 * 1024 * 1024, min(cap - 16 * 1024 * 1024, 110 * 1024 * 1024))


def encoder_block(x, params, *, n_heads, compute_dtype=jnp.bfloat16,
                  seq_tile=256, vmem_limit_bytes=None):
    B, S, Din = x.shape
    Dout = params["wq"].shape[1]
    if Dout % n_heads != 0:
        raise ValueError(f"n_heads={n_heads} must divide output_dim={Dout}")
    same_dim = (Din == Dout)
    hd = Dout // n_heads
    out_dtype = x.dtype

    # NOTE: for real workloads choose Din/Dout as multiples of 128, hd >= 128, and
    # S/seq_tile as multiples of 8 so vregs and the MXU stay lane-dense; the kernel is
    # still correct (just underfilled) for the toy shapes used below.

    # Fused weights. Softmax scale folded into Wq. [Wq*s | Wres?] and [Wk | Wv].
    scale = 1.0 / (hd ** 0.5)
    if same_dim:
        w_qres = (params["wq"] * scale).astype(compute_dtype)
    else:
        w_qres = jnp.concatenate([params["wq"] * scale, params["wres"]],
                                 axis=1).astype(compute_dtype)
    w_kv = jnp.concatenate([params["wk"], params["wv"]], axis=1).astype(compute_dtype)

    w1 = params["w1"].astype(compute_dtype)
    w2 = params["w2"].astype(compute_dtype)
    f32 = lambda a: a.astype(jnp.float32)
    ln1_g, ln1_b = f32(params["ln1_g"]), f32(params["ln1_b"])
    ln2_g, ln2_b = f32(params["ln2_g"]), f32(params["ln2_b"])
    b1, b2 = f32(params["b1"]), f32(params["b2"])
    bres = None if same_dim else f32(params["bres"])

    # Activations in compute dtype (halves the x DMA/VMEM for bf16).
    x_in = x.astype(compute_dtype)

    # Query-sequence tiling.
    if (seq_tile is not None and seq_tile < S and S % seq_tile == 0
            and seq_tile % 8 == 0):
        tq = seq_tile
    else:
        tq = S
    n_q = S // tq

    if vmem_limit_bytes is None:
        vmem_limit_bytes = _pick_vmem_limit()

    kernel = functools.partial(encoder_block_kernel, n_heads=n_heads,
                               same_dim=same_dim, compute_dtype=compute_dtype)

    def build_and_run(weight_pipeline_mode):
        def const_spec(shape):
            nd = len(shape)
            index_map = lambda b, qi: (0,) * nd
            if weight_pipeline_mode is None:
                return pl.BlockSpec(shape, index_map)
            # Block-invariant operand: fetched once, no double buffering needed.
            return pl.BlockSpec(shape, index_map, pipeline_mode=weight_pipeline_mode)

        # Single full-sequence view of x per batch (block index depends only on b).
        in_specs = [pl.BlockSpec((1, S, Din), lambda b, qi: (b, 0, 0))]
        args = [x_in]
        consts = [w_qres, w_kv]
        if not same_dim:
            consts.append(bres)
        consts += [ln1_g, ln1_b, w1, b1, w2, b2, ln2_g, ln2_b]
        for a in consts:
            in_specs.append(const_spec(a.shape))
            args.append(a)

        return pl.pallas_call(
            kernel,
            out_shape=jax.ShapeDtypeStruct((B, S, Dout), out_dtype),
            grid_spec=pltpu.PrefetchScalarGridSpec(
                num_scalar_prefetch=0,
                grid=(B, n_q),
                in_specs=in_specs,
                out_specs=pl.BlockSpec((1, tq, Dout), lambda b, qi: (b, qi, 0)),
                scratch_shapes=[pltpu.VMEM((S, 2 * Dout), compute_dtype)],
            ),
            compiler_params=pltpu.CompilerParams(
                dimension_semantics=("parallel", "arbitrary"),
                vmem_limit_bytes=vmem_limit_bytes),
        )(*args)

    weight_mode = pl.Buffered(1) if hasattr(pl, "Buffered") else None
    if weight_mode is None:
        return build_and_run(None)
    try:
        return build_and_run(weight_mode)
    except Exception:
        # pipeline_mode=pl.Buffered(1) not lowerable on this jax build: retry once with
        # default weight pipelining. Genuine kernel bugs re-raise from this attempt.
        return build_and_run(None)


def encoder_block_ref(x, params, *, n_heads):
    """Pure-JAX reference mirroring the PyTorch forward (eval mode)."""
    B, S, Din = x.shape
    Dout = params["wq"].shape[1]
    hd = Dout // n_heads
    q = x @ params["wq"]
    k = x @ params["wk"]
    v = x @ params["wv"]

    def heads(t):  # (B,S,D) -> (B,H,S,hd); column block h == head h (matches torch.split)
        return t.reshape(B, S, n_heads, hd).transpose(0, 2, 1, 3)

    qh, kh, vh = heads(q), heads(k), heads(v)
    a = jax.nn.softmax(qh @ jnp.swapaxes(kh, -1, -2) / (hd ** 0.5), axis=-1)
    o = (a @ vh).transpose(0, 2, 1, 3).reshape(B, S, Dout)
    res = x if Din == Dout else x @ params["wres"] + params["bres"][0]

    def ln(z, g, b):
        mu = jnp.mean(z, -1, keepdims=True)
        var = jnp.mean((z - mu) ** 2, -1, keepdims=True)
        return (z - mu) / jnp.sqrt(var + 1e-5) * g[0] + b[0]

    out = ln(o + res, params["ln1_g"], params["ln1_b"])
    ff = jax.nn.relu(out @ params["w1"] + params["b1"][0]) @ params["w2"] + params["b2"][0]
    return ln(ff + out, params["ln2_g"], params["ln2_b"])


def make_params(key, Din, Dout):
    ks = jax.random.split(key, 9)

    def xavier(k, shape):
        fan_in, fan_out = shape
        bound = (6.0 / (fan_in + fan_out)) ** 0.5
        return jax.random.uniform(k, shape, jnp.float32, -bound, bound)

    p = {
        "wq": xavier(ks[0], (Din, Dout)),
        "wk": xavier(ks[1], (Din, Dout)),
        "wv": xavier(ks[2], (Din, Dout)),
        "ln1_g": jnp.ones((1, Dout), jnp.float32),
        "ln1_b": jnp.zeros((1, Dout), jnp.float32),
        "w1": xavier(ks[5], (Dout, 4 * Dout)),
        "b1": jax.random.normal(ks[6], (1, 4 * Dout), jnp.float32) * 0.02,
        "w2": xavier(ks[7], (4 * Dout, Dout)),
        "b2": jax.random.normal(ks[8], (1, Dout), jnp.float32) * 0.02,
        "ln2_g": jnp.ones((1, Dout), jnp.float32),
        "ln2_b": jnp.zeros((1, Dout), jnp.float32),
    }
    if Din != Dout:
        p["wres"] = xavier(ks[3], (Din, Dout))
        p["bres"] = jax.random.normal(ks[4], (1, Dout), jnp.float32) * 0.02
    return p


if __name__ == "__main__":
    root = jax.random.PRNGKey(0)

    # (name, B, S, Din, Dout, H, compute_dtype, seq_tile, max-abs tolerance)
    # Tolerances: f32 paths only differ from the reference by the EUP approximate
    # reciprocal in softmax; the bf16 path additionally runs x and all MXU operands in
    # bf16 (outputs are O(1) after LayerNorm).
    cases = [
        ("proj_residual_f32",           2, 8,  16, 32, 4, jnp.float32,  None, 2e-2),
        ("identity_residual_kv_cached", 2, 16, 32, 32, 4, jnp.float32,  8,    2e-2),
        ("bf16_default_seq_tiled",      2, 16, 16, 32, 4, jnp.bfloat16, 8,    1.5e-1),
    ]

    for idx, (name, B, S, Din, Dout, H, cd, st, tol) in enumerate(cases):
        kx, kp = jax.random.split(jax.random.fold_in(root, idx))
        x = jax.random.normal(kx, (B, S, Din), jnp.float32)
        params = make_params(kp, Din, Dout)

        y = encoder_block(x, params, n_heads=H, compute_dtype=cd, seq_tile=st)
        y = jax.block_until_ready(y)

        y_ref = encoder_block_ref(x, params, n_heads=H)
        assert y.shape == (B, S, Dout), (name, y.shape)
        err = float(jnp.max(jnp.abs(y.astype(jnp.float32) - y_ref)))
        assert err <= tol, (name, err)

    print("KERNEL_OK")
</pallas_src>

<mosaic_0001>
module attributes {stable_mosaic.version = 11 : i64} {
  func.func @encoder_block_kernel(%arg0: i32, %arg1: i32, %arg2: memref<1x8x16xf32, #tpu.memory_space<vmem>>, %arg3: memref<16x64xf32, #tpu.memory_space<vmem>>, %arg4: memref<16x64xf32, #tpu.memory_space<vmem>>, %arg5: memref<1x32xf32, #tpu.memory_space<vmem>>, %arg6: memref<1x32xf32, #tpu.memory_space<vmem>>, %arg7: memref<1x32xf32, #tpu.memory_space<vmem>>, %arg8: memref<32x128xf32, #tpu.memory_space<vmem>>, %arg9: memref<1x128xf32, #tpu.memory_space<vmem>>, %arg10: memref<128x32xf32, #tpu.memory_space<vmem>>, %arg11: memref<1x32xf32, #tpu.memory_space<vmem>>, %arg12: memref<1x32xf32, #tpu.memory_space<vmem>>, %arg13: memref<1x32xf32, #tpu.memory_space<vmem>>, %arg14: memref<1x8x32xf32, #tpu.memory_space<vmem>>, %arg15: memref<8x64xf32, #tpu.memory_space<vmem>>) attributes {dimension_semantics = [#tpu.dimension_semantics<parallel>, #tpu.dimension_semantics<arbitrary>], iteration_bounds = array<i64: 2, 1>, scalar_prefetch = 0 : i64, scratch_operands = 1 : i64, tpu.core_type = #tpu.core_type<tc>, window_params = [{transform_indices = @transform_0, window_bounds = array<i64: 1, 8, 16>}, {pipeline_mode = #tpu.pipeline_mode<synchronous>, transform_indices = @transform_1, window_bounds = array<i64: 16, 64>}, {pipeline_mode = #tpu.pipeline_mode<synchronous>, transform_indices = @transform_2, window_bounds = array<i64: 16, 64>}, {pipeline_mode = #tpu.pipeline_mode<synchronous>, transform_indices = @transform_3, window_bounds = array<i64: 1, 32>}, {pipeline_mode = #tpu.pipeline_mode<synchronous>, transform_indices = @transform_4, window_bounds = array<i64: 1, 32>}, {pipeline_mode = #tpu.pipeline_mode<synchronous>, transform_indices = @transform_5, window_bounds = array<i64: 1, 32>}, {pipeline_mode = #tpu.pipeline_mode<synchronous>, transform_indices = @transform_6, window_bounds = array<i64: 32, 128>}, {pipeline_mode = #tpu.pipeline_mode<synchronous>, transform_indices = @transform_7, window_bounds = array<i64: 1, 128>}, {pipeline_mode = #tpu.pipeline_mode<synchronous>, transform_indices = @transform_8, window_bounds = array<i64: 128, 32>}, {pipeline_mode = #tpu.pipeline_mode<synchronous>, transform_indices = @transform_9, window_bounds = array<i64: 1, 32>}, {pipeline_mode = #tpu.pipeline_mode<synchronous>, transform_indices = @transform_10, window_bounds = array<i64: 1, 32>}, {pipeline_mode = #tpu.pipeline_mode<synchronous>, transform_indices = @transform_11, window_bounds = array<i64: 1, 32>}, {transform_indices = @transform_12, window_bounds = array<i64: 1, 8, 32>}]} {
    %c0_i32 = arith.constant 0 : i32
    %0 = arith.cmpi eq, %arg1, %c0_i32 : i32
    %1 = arith.extui %0 : i1 to i32
    %c0_i32_0 = arith.constant 0 : i32
    %2 = arith.cmpi ne, %1, %c0_i32_0 : i32
    scf.if %2 {
      %c0_56 = arith.constant 0 : index
      %c0_57 = arith.constant 0 : index
      %c0_58 = arith.constant 0 : index
      %142 = vector.load %arg2[%c0_56, %c0_57, %c0_58] : memref<1x8x16xf32, #tpu.memory_space<vmem>>, vector<1x8x16xf32>
      %143 = vector.shape_cast %142 : vector<1x8x16xf32> to vector<8x16xf32>
      %c0_59 = arith.constant 0 : index
      %c0_60 = arith.constant 0 : index
      %144 = vector.load %arg4[%c0_59, %c0_60] : memref<16x64xf32, #tpu.memory_space<vmem>>, vector<16x64xf32>
      %cst_61 = arith.constant dense<0.000000e+00> : vector<8x64xf32>
      %145 = tpu.matmul %143, %144, %cst_61 {dimension_numbers = #tpu.dot_dimension_numbers<[1], [0], [0], [1], [0, 0, 1, 1], [], []>} : vector<8x16xf32>, vector<16x64xf32>, vector<8x64xf32> -> vector<8x64xf32>
      %c0_62 = arith.constant 0 : index
      %c0_63 = arith.constant 0 : index
      %146 = vector.load %arg15[%c0_62, %c0_63] : memref<8x64xf32, #tpu.memory_space<vmem>>, vector<8x64xf32>
      tpu.vector_store %arg15[%c0_62, %c0_63], %145 {strides = array<i32>} : memref<8x64xf32, #tpu.memory_space<vmem>>, vector<8x64xf32>,
    } else {
    }
    %c8_i32 = arith.constant 8 : i32
    %3 = arith.muli %arg1, %c8_i32 : i32
    %4 = tpu.assume_multiple %3, 8 : i32
    %c0 = arith.constant 0 : index
    %5 = arith.index_cast %4 : i32 to index
    %c0_1 = arith.constant 0 : index
    %6 = vector.load %arg2[%c0, %5, %c0_1] : memref<1x8x16xf32, #tpu.memory_space<vmem>>, vector<1x8x16xf32>
    %7 = vector.shape_cast %6 : vector<1x8x16xf32> to vector<8x16xf32>
    %c0_2 = arith.constant 0 : index
    %c0_3 = arith.constant 0 : index
    %8 = vector.load %arg3[%c0_2, %c0_3] : memref<16x64xf32, #tpu.memory_space<vmem>>, vector<16x64xf32>
    %cst = arith.constant dense<0.000000e+00> : vector<8x64xf32>
    %9 = tpu.matmul %7, %8, %cst {dimension_numbers = #tpu.dot_dimension_numbers<[1], [0], [0], [1], [0, 0, 1, 1], [], []>} : vector<8x16xf32>, vector<16x64xf32>, vector<8x64xf32> -> vector<8x64xf32>
    %10 = vector.extract_strided_slice %9 {offsets = [0, 0], sizes = [8, 32], strides = [1, 1]} : vector<8x64xf32> to vector<8x32xf32>
    %11 = vector.extract_strided_slice %9 {offsets = [0, 32], sizes = [8, 32], strides = [1, 1]} : vector<8x64xf32> to vector<8x32xf32>
    %c0_4 = arith.constant 0 : index
    %c0_5 = arith.constant 0 : index
    %12 = vector.load %arg5[%c0_4, %c0_5] : memref<1x32xf32, #tpu.memory_space<vmem>>, vector<1x32xf32>
    %13 = vector.broadcast %12 : vector<1x32xf32> to vector<8x32xf32>
    %14 = arith.addf %11, %13 : vector<8x32xf32>
    %c0_6 = arith.constant 0 : index
    %c0_7 = arith.constant 0 : index
    %15 = vector.load %arg15[%c0_6, %c0_7] : memref<8x64xf32, #tpu.memory_space<vmem>>, vector<8x64xf32>
    %16 = vector.extract_strided_slice %10 {offsets = [0, 0], sizes = [8, 8], strides = [1, 1]} : vector<8x32xf32> to vector<8x8xf32>
    %17 = vector.extract_strided_slice %15 {offsets = [0, 0], sizes = [8, 8], strides = [1, 1]} : vector<8x64xf32> to vector<8x8xf32>
    %18 = vector.extract_strided_slice %15 {offsets = [0, 32], sizes = [8, 8], strides = [1, 1]} : vector<8x64xf32> to vector<8x8xf32>
    %cst_8 = arith.constant dense<0.000000e+00> : vector<8x8xf32>
    %19 = tpu.matmul %16, %17, %cst_8 {dimension_numbers = #tpu.dot_dimension_numbers<[1], [1], [0], [0], [0, 0, 1, 0], [], []>} : vector<8x8xf32>, vector<8x8xf32>, vector<8x8xf32> -> vector<8x8xf32>
    %cst_9 = arith.constant dense<0xFF800000> : vector<8xf32>
    %20 = vector.multi_reduction <maximumf>, %19, %cst_9 [1] : vector<8x8xf32> to vector<8xf32>
    %21 = vector.shape_cast %20 : vector<8xf32> to vector<8x1xf32>
    %22 = vector.broadcast %21 : vector<8x1xf32> to vector<8x8xf32>
    %23 = arith.subf %19, %22 : vector<8x8xf32>
    %24 = math.exp %23 : vector<8x8xf32>
    %cst_10 = arith.constant dense<0.000000e+00> : vector<8xf32>
    %25 = vector.multi_reduction <add>, %24, %cst_10 [1] : vector<8x8xf32> to vector<8xf32>
    %26 = vector.shape_cast %25 : vector<8xf32> to vector<8x1xf32>
    %cst_11 = arith.constant dense<0.000000e+00> : vector<8x8xf32>
    %27 = tpu.matmul %24, %18, %cst_11 {dimension_numbers = #tpu.dot_dimension_numbers<[1], [0], [0], [1], [0, 0, 1, 1], [], []>} : vector<8x8xf32>, vector<8x8xf32>, vector<8x8xf32> -> vector<8x8xf32>
    %28 = tpu.reciprocal %26 {approx = true} : vector<8x1xf32> -> vector<8x1xf32>
    %29 = vector.broadcast %28 : vector<8x1xf32> to vector<8x8xf32>
    %30 = arith.mulf %27, %29 : vector<8x8xf32>
    %31 = vector.extract_strided_slice %10 {offsets = [0, 8], sizes = [8, 8], strides = [1, 1]} : vector<8x32xf32> to vector<8x8xf32>
    %32 = vector.extract_strided_slice %15 {offsets = [0, 8], sizes = [8, 8], strides = [1, 1]} : vector<8x64xf32> to vector<8x8xf32>
    %33 = vector.extract_strided_slice %15 {offsets = [0, 40], sizes = [8, 8], strides = [1, 1]} : vector<8x64xf32> to vector<8x8xf32>
    %cst_12 = arith.constant dense<0.000000e+00> : vector<8x8xf32>
    %34 = tpu.matmul %31, %32, %cst_12 {dimension_numbers = #tpu.dot_dimension_numbers<[1], [1], [0], [0], [0, 0, 1, 0], [], []>} : vector<8x8xf32>, vector<8x8xf32>, vector<8x8xf32> -> vector<8x8xf32>
    %cst_13 = arith.constant dense<0xFF800000> : vector<8xf32>
    %35 = vector.multi_reduction <maximumf>, %34, %cst_13 [1] : vector<8x8xf32> to vector<8xf32>
    %36 = vector.shape_cast %35 : vector<8xf32> to vector<8x1xf32>
    %37 = vector.broadcast %36 : vector<8x1xf32> to vector<8x8xf32>
    %38 = arith.subf %34, %37 : vector<8x8xf32>
    %39 = math.exp %38 : vector<8x8xf32>
    %cst_14 = arith.constant dense<0.000000e+00> : vector<8xf32>
    %40 = vector.multi_reduction <add>, %39, %cst_14 [1] : vector<8x8xf32> to vector<8xf32>
    %41 = vector.shape_cast %40 : vector<8xf32> to vector<8x1xf32>
    %cst_15 = arith.constant dense<0.000000e+00> : vector<8x8xf32>
    %42 = tpu.matmul %39, %33, %cst_15 {dimension_numbers = #tpu.dot_dimension_numbers<[1], [0], [0], [1], [0, 0, 1, 1], [], []>} : vector<8x8xf32>, vector<8x8xf32>, vector<8x8xf32> -> vector<8x8xf32>
    %43 = tpu.reciprocal %41 {approx = true} : vector<8x1xf32> -> vector<8x1xf32>
    %44 = vector.broadcast %43 : vector<8x1xf32> to vector<8x8xf32>
    %45 = arith.mulf %42, %44 : vector<8x8xf32>
    %46 = vector.extract_strided_slice %10 {offsets = [0, 16], sizes = [8, 8], strides = [1, 1]} : vector<8x32xf32> to vector<8x8xf32>
    %47 = vector.extract_strided_slice %15 {offsets = [0, 16], sizes = [8, 8], strides = [1, 1]} : vector<8x64xf32> to vector<8x8xf32>
    %48 = vector.extract_strided_slice %15 {offsets = [0, 48], sizes = [8, 8], strides = [1, 1]} : vector<8x64xf32> to vector<8x8xf32>
    %cst_16 = arith.constant dense<0.000000e+00> : vector<8x8xf32>
    %49 = tpu.matmul %46, %47, %cst_16 {dimension_numbers = #tpu.dot_dimension_numbers<[1], [1], [0], [0], [0, 0, 1, 0], [], []>} : vector<8x8xf32>, vector<8x8xf32>, vector<8x8xf32> -> vector<8x8xf32>
    %cst_17 = arith.constant dense<0xFF800000> : vector<8xf32>
    %50 = vector.multi_reduction <maximumf>, %49, %cst_17 [1] : vector<8x8xf32> to vector<8xf32>
    %51 = vector.shape_cast %50 : vector<8xf32> to vector<8x1xf32>
    %52 = vector.broadcast %51 : vector<8x1xf32> to vector<8x8xf32>
    %53 = arith.subf %49, %52 : vector<8x8xf32>
    %54 = math.exp %53 : vector<8x8xf32>
    %cst_18 = arith.constant dense<0.000000e+00> : vector<8xf32>
    %55 = vector.multi_reduction <add>, %54, %cst_18 [1] : vector<8x8xf32> to vector<8xf32>
    %56 = vector.shape_cast %55 : vector<8xf32> to vector<8x1xf32>
    %cst_19 = arith.constant dense<0.000000e+00> : vector<8x8xf32>
    %57 = tpu.matmul %54, %48, %cst_19 {dimension_numbers = #tpu.dot_dimension_numbers<[1], [0], [0], [1], [0, 0, 1, 1], [], []>} : vector<8x8xf32>, vector<8x8xf32>, vector<8x8xf32> -> vector<8x8xf32>
    %58 = tpu.reciprocal %56 {approx = true} : vector<8x1xf32> -> vector<8x1xf32>
    %59 = vector.broadcast %58 : vector<8x1xf32> to vector<8x8xf32>
    %60 = arith.mulf %57, %59 : vector<8x8xf32>
    %61 = vector.extract_strided_slice %10 {offsets = [0, 24], sizes = [8, 8], strides = [1, 1]} : vector<8x32xf32> to vector<8x8xf32>
    %62 = vector.extract_strided_slice %15 {offsets = [0, 24], sizes = [8, 8], strides = [1, 1]} : vector<8x64xf32> to vector<8x8xf32>
    %63 = vector.extract_strided_slice %15 {offsets = [0, 56], sizes = [8, 8], strides = [1, 1]} : vector<8x64xf32> to vector<8x8xf32>
    %cst_20 = arith.constant dense<0.000000e+00> : vector<8x8xf32>
    %64 = tpu.matmul %61, %62, %cst_20 {dimension_numbers = #tpu.dot_dimension_numbers<[1], [1], [0], [0], [0, 0, 1, 0], [], []>} : vector<8x8xf32>, vector<8x8xf32>, vector<8x8xf32> -> vector<8x8xf32>
    %cst_21 = arith.constant dense<0xFF800000> : vector<8xf32>
    %65 = vector.multi_reduction <maximumf>, %64, %cst_21 [1] : vector<8x8xf32> to vector<8xf32>
    %66 = vector.shape_cast %65 : vector<8xf32> to vector<8x1xf32>
    %67 = vector.broadcast %66 : vector<8x1xf32> to vector<8x8xf32>
    %68 = arith.subf %64, %67 : vector<8x8xf32>
    %69 = math.exp %68 : vector<8x8xf32>
    %cst_22 = arith.constant dense<0.000000e+00> : vector<8xf32>
    %70 = vector.multi_reduction <add>, %69, %cst_22 [1] : vector<8x8xf32> to vector<8xf32>
    %71 = vector.shape_cast %70 : vector<8xf32> to vector<8x1xf32>
    %cst_23 = arith.constant dense<0.000000e+00> : vector<8x8xf32>
    %72 = tpu.matmul %69, %63, %cst_23 {dimension_numbers = #tpu.dot_dimension_numbers<[1], [0], [0], [1], [0, 0, 1, 1], [], []>} : vector<8x8xf32>, vector<8x8xf32>, vector<8x8xf32> -> vector<8x8xf32>
    %73 = tpu.reciprocal %71 {approx = true} : vector<8x1xf32> -> vector<8x1xf32>
    %74 = vector.broadcast %73 : vector<8x1xf32> to vector<8x8xf32>
    %75 = arith.mulf %72, %74 : vector<8x8xf32>
    %76 = tpu.concatenate %30, %45, %60, %75 in 1 : vector<8x8xf32>, vector<8x8xf32>, vector<8x8xf32>, vector<8x8xf32> -> vector<8x32xf32>
    %77 = arith.addf %76, %14 : vector<8x32xf32>
    %c0_24 = arith.constant 0 : index
    %c0_25 = arith.constant 0 : index
    %78 = vector.load %arg6[%c0_24, %c0_25] : memref<1x32xf32, #tpu.memory_space<vmem>>, vector<1x32xf32>
    %c0_26 = arith.constant 0 : index
    %c0_27 = arith.constant 0 : index
    %79 = vector.load %arg7[%c0_26, %c0_27] : memref<1x32xf32, #tpu.memory_space<vmem>>, vector<1x32xf32>
    %cst_28 = arith.constant dense<0.000000e+00> : vector<8xf32>
    %80 = vector.multi_reduction <add>, %77, %cst_28 [1] : vector<8x32xf32> to vector<8xf32>
    %81 = vector.shape_cast %80 : vector<8xf32> to vector<8x1xf32>
    %cst_29 = arith.constant 3.200000e+01 : f32
    %82 = vector.broadcast %cst_29 : f32 to vector<8x1xf32>
    %83 = arith.divf %81, %82 : vector<8x1xf32>
    %84 = vector.broadcast %83 : vector<8x1xf32> to vector<8x32xf32>
    %85 = arith.subf %77, %84 : vector<8x32xf32>
    %86 = arith.mulf %85, %85 : vector<8x32xf32>
    %cst_30 = arith.constant dense<0.000000e+00> : vector<8xf32>
    %87 = vector.multi_reduction <add>, %86, %cst_30 [1] : vector<8x32xf32> to vector<8xf32>
    %88 = vector.shape_cast %87 : vector<8xf32> to vector<8x1xf32>
    %cst_31 = arith.constant 3.200000e+01 : f32
    %89 = vector.broadcast %cst_31 : f32 to vector<8x1xf32>
    %90 = arith.divf %88, %89 : vector<8x1xf32>
    %91 = vector.broadcast %83 : vector<8x1xf32> to vector<8x32xf32>
    %92 = arith.subf %77, %91 : vector<8x32xf32>
    %cst_32 = arith.constant 9.99999974E-6 : f32
    %93 = vector.broadcast %cst_32 : f32 to vector<8x1xf32>
    %94 = arith.addf %90, %93 : vector<8x1xf32>
    %95 = math.rsqrt %94 : vector<8x1xf32>
    %96 = vector.broadcast %95 : vector<8x1xf32> to vector<8x32xf32>
    %97 = arith.mulf %92, %96 : vector<8x32xf32>
    %98 = vector.broadcast %78 : vector<1x32xf32> to vector<8x32xf32>
    %99 = arith.mulf %97, %98 : vector<8x32xf32>
    %100 = vector.broadcast %79 : vector<1x32xf32> to vector<8x32xf32>
    %101 = arith.addf %99, %100 : vector<8x32xf32>
    %c0_33 = arith.constant 0 : index
    %c0_34 = arith.constant 0 : index
    %102 = vector.load %arg8[%c0_33, %c0_34] : memref<32x128xf32, #tpu.memory_space<vmem>>, vector<32x128xf32>
    %cst_35 = arith.constant dense<0.000000e+00> : vector<8x128xf32>
    %103 = tpu.matmul %101, %102, %cst_35 {dimension_numbers = #tpu.dot_dimension_numbers<[1], [0], [0], [1], [0, 0, 1, 1], [], []>} : vector<8x32xf32>, vector<32x128xf32>, vector<8x128xf32> -> vector<8x128xf32>
    %c0_36 = arith.constant 0 : index
    %c0_37 = arith.constant 0 : index
    %104 = vector.load %arg9[%c0_36, %c0_37] : memref<1x128xf32, #tpu.memory_space<vmem>>, vector<1x128xf32>
    %105 = vector.broadcast %104 : vector<1x128xf32> to vector<8x128xf32>
    %106 = arith.addf %103, %105 : vector<8x128xf32>
    %cst_38 = arith.constant 0.000000e+00 : f32
    %107 = vector.broadcast %cst_38 : f32 to vector<8x128xf32>
    %108 = arith.maximumf %106, %107 : vector<8x128xf32>
    %c0_39 = arith.constant 0 : index
    %c0_40 = arith.constant 0 : index
    %109 = vector.load %arg10[%c0_39, %c0_40] : memref<128x32xf32, #tpu.memory_space<vmem>>, vector<128x32xf32>
    %cst_41 = arith.constant dense<0.000000e+00> : vector<8x32xf32>
    %110 = tpu.matmul %108, %109, %cst_41 {dimension_numbers = #tpu.dot_dimension_numbers<[1], [0], [0], [1], [0, 0, 1, 1], [], []>} : vector<8x128xf32>, vector<128x32xf32>, vector<8x32xf32> -> vector<8x32xf32>
    %c0_42 = arith.constant 0 : index
    %c0_43 = arith.constant 0 : index
    %111 = vector.load %arg11[%c0_42, %c0_43] : memref<1x32xf32, #tpu.memory_space<vmem>>, vector<1x32xf32>
    %112 = vector.broadcast %111 : vector<1x32xf32> to vector<8x32xf32>
    %113 = arith.addf %110, %112 : vector<8x32xf32>
    %114 = arith.addf %113, %101 : vector<8x32xf32>
    %c0_44 = arith.constant 0 : index
    %c0_45 = arith.constant 0 : index
    %115 = vector.load %arg12[%c0_44, %c0_45] : memref<1x32xf32, #tpu.memory_space<vmem>>, vector<1x32xf32>
    %c0_46 = arith.constant 0 : index
    %c0_47 = arith.constant 0 : index
    %116 = vector.load %arg13[%c0_46, %c0_47] : memref<1x32xf32, #tpu.memory_space<vmem>>, vector<1x32xf32>
    %cst_48 = arith.constant dense<0.000000e+00> : vector<8xf32>
    %117 = vector.multi_reduction <add>, %114, %cst_48 [1] : vector<8x32xf32> to vector<8xf32>
    %118 = vector.shape_cast %117 : vector<8xf32> to vector<8x1xf32>
    %cst_49 = arith.constant 3.200000e+01 : f32
    %119 = vector.broadcast %cst_49 : f32 to vector<8x1xf32>
    %120 = arith.divf %118, %119 : vector<8x1xf32>
    %121 = vector.broadcast %120 : vector<8x1xf32> to vector<8x32xf32>
    %122 = arith.subf %114, %121 : vector<8x32xf32>
    %123 = arith.mulf %122, %122 : vector<8x32xf32>
    %cst_50 = arith.constant dense<0.000000e+00> : vector<8xf32>
    %124 = vector.multi_reduction <add>, %123, %cst_50 [1] : vector<8x32xf32> to vector<8xf32>
    %125 = vector.shape_cast %124 : vector<8xf32> to vector<8x1xf32>
    %cst_51 = arith.constant 3.200000e+01 : f32
    %126 = vector.broadcast %cst_51 : f32 to vector<8x1xf32>
    %127 = arith.divf %125, %126 : vector<8x1xf32>
    %128 = vector.broadcast %120 : vector<8x1xf32> to vector<8x32xf32>
    %129 = arith.subf %114, %128 : vector<8x32xf32>
    %cst_52 = arith.constant 9.99999974E-6 : f32
    %130 = vector.broadcast %cst_52 : f32 to vector<8x1xf32>
    %131 = arith.addf %127, %130 : vector<8x1xf32>
    %132 = math.rsqrt %131 : vector<8x1xf32>
    %133 = vector.broadcast %132 : vector<8x1xf32> to vector<8x32xf32>
    %134 = arith.mulf %129, %133 : vector<8x32xf32>
    %135 = vector.broadcast %115 : vector<1x32xf32> to vector<8x32xf32>
    %136 = arith.mulf %134, %135 : vector<8x32xf32>
    %137 = vector.broadcast %116 : vector<1x32xf32> to vector<8x32xf32>
    %138 = arith.addf %136, %137 : vector<8x32xf32>
    %c0_53 = arith.constant 0 : index
    %c0_54 = arith.constant 0 : index
    %c0_55 = arith.constant 0 : index
    %139 = vector.load %arg14[%c0_53, %c0_54, %c0_55] : memref<1x8x32xf32, #tpu.memory_space<vmem>>, vector<1x8x32xf32>
    %140 = vector.shape_cast %139 : vector<1x8x32xf32> to vector<8x32xf32>
    %141 = vector.shape_cast %138 : vector<8x32xf32> to vector<1x8x32xf32>
    tpu.vector_store %arg14[%c0_53, %c0_54, %c0_55], %141 {strides = array<i32>} : memref<1x8x32xf32, #tpu.memory_space<vmem>>, vector<1x8x32xf32>,
    return
  }
  func.func @transform_0(%arg0: i32, %arg1: i32) -> (i32, i32, i32) {
    %c0_i32 = arith.constant 0 : i32
    %c0_i32_0 = arith.constant 0 : i32
    %c0_i32_1 = arith.constant 0 : i32
    return %arg0, %c0_i32, %c0_i32_0 : i32, i32, i32
  }
  func.func @transform_1(%arg0: i32, %arg1: i32) -> (i32, i32) {
    %c0_i32 = arith.constant 0 : i32
    %c0_i32_0 = arith.constant 0 : i32
    %c0_i32_1 = arith.constant 0 : i32
    return %c0_i32, %c0_i32_0 : i32, i32
  }
  func.func @transform_2(%arg0: i32, %arg1: i32) -> (i32, i32) {
    %c0_i32 = arith.constant 0 : i32
    %c0_i32_0 = arith.constant 0 : i32
    %c0_i32_1 = arith.constant 0 : i32
    return %c0_i32, %c0_i32_0 : i32, i32
  }
  func.func @transform_3(%arg0: i32, %arg1: i32) -> (i32, i32) {
    %c0_i32 = arith.constant 0 : i32
    %c0_i32_0 = arith.constant 0 : i32
    %c0_i32_1 = arith.constant 0 : i32
    return %c0_i32, %c0_i32_0 : i32, i32
  }
  func.func @transform_4(%arg0: i32, %arg1: i32) -> (i32, i32) {
    %c0_i32 = arith.constant 0 : i32
    %c0_i32_0 = arith.constant 0 : i32
    %c0_i32_1 = arith.constant 0 : i32
    return %c0_i32, %c0_i32_0 : i32, i32
  }
  func.func @transform_5(%arg0: i32, %arg1: i32) -> (i32, i32) {
    %c0_i32 = arith.constant 0 : i32
    %c0_i32_0 = arith.constant 0 : i32
    %c0_i32_1 = arith.constant 0 : i32
    return %c0_i32, %c0_i32_0 : i32, i32
  }
  func.func @transform_6(%arg0: i32, %arg1: i32) -> (i32, i32) {
    %c0_i32 = arith.constant 0 : i32
    %c0_i32_0 = arith.constant 0 : i32
    %c0_i32_1 = arith.constant 0 : i32
    return %c0_i32, %c0_i32_0 : i32, i32
  }
  func.func @transform_7(%arg0: i32, %arg1: i32) -> (i32, i32) {
    %c0_i32 = arith.constant 0 : i32
    %c0_i32_0 = arith.constant 0 : i32
    %c0_i32_1 = arith.constant 0 : i32
    return %c0_i32, %c0_i32_0 : i32, i32
  }
  func.func @transform_8(%arg0: i32, %arg1: i32) -> (i32, i32) {
    %c0_i32 = arith.constant 0 : i32
    %c0_i32_0 = arith.constant 0 : i32
    %c0_i32_1 = arith.constant 0 : i32
    return %c0_i32, %c0_i32_0 : i32, i32
  }
  func.func @transform_9(%arg0: i32, %arg1: i32) -> (i32, i32) {
    %c0_i32 = arith.constant 0 : i32
    %c0_i32_0 = arith.constant 0 : i32
    %c0_i32_1 = arith.constant 0 : i32
    return %c0_i32, %c0_i32_0 : i32, i32
  }
  func.func @transform_10(%arg0: i32, %arg1: i32) -> (i32, i32) {
    %c0_i32 = arith.constant 0 : i32
    %c0_i32_0 = arith.constant 0 : i32
    %c0_i32_1 = arith.constant 0 : i32
    return %c0_i32, %c0_i32_0 : i32, i32
  }
  func.func @transform_11(%arg0: i32, %arg1: i32) -> (i32, i32) {
    %c0_i32 = arith.constant 0 : i32
    %c0_i32_0 = arith.constant 0 : i32
    %c0_i32_1 = arith.constant 0 : i32
    return %c0_i32, %c0_i32_0 : i32, i32
  }
  func.func @transform_12(%arg0: i32, %arg1: i32) -> (i32, i32, i32) {
    %c0_i32 = arith.constant 0 : i32
    %c0_i32_0 = arith.constant 0 : i32
    return %arg0, %arg1, %c0_i32 : i32, i32, i32
  }
}

module attributes {stable_mosaic.version = 11 : i64} {
  func.func @encoder_block_kernel(%arg0: i32, %arg1: i32, %arg2: memref<1x8x16xf32, #tpu.memory_space<vmem>>, %arg3: memref<16x64xf32, #tpu.memory_space<vmem>>, %arg4: memref<16x64xf32, #tpu.memory_space<vmem>>, %arg5: memref<1x32xf32, #tpu.memory_space<vmem>>, %arg6: memref<1x32xf32, #tpu.memory_space<vmem>>, %arg7: memref<1x32xf32, #tpu.memory_space<vmem>>, %arg8: memref<32x128xf32, #tpu.memory_space<vmem>>, %arg9: memref<1x128xf32, #tpu.memory_space<vmem>>, %arg10: memref<128x32xf32, #tpu.memory_space<vmem>>, %arg11: memref<1x32xf32, #tpu.memory_space<vmem>>, %arg12: memref<1x32xf32, #tpu.memory_space<vmem>>, %arg13: memref<1x32xf32, #tpu.memory_space<vmem>>, %arg14: memref<1x8x32xf32, #tpu.memory_space<vmem>>, %arg15: memref<8x64xf32, #tpu.memory_space<vmem>>) attributes {dimension_semantics = [#tpu.dimension_semantics<parallel>, #tpu.dimension_semantics<arbitrary>], iteration_bounds = array<i64: 2, 1>, scalar_prefetch = 0 : i64, scratch_operands = 1 : i64, tpu.core_type = #tpu.core_type<tc>, window_params = [{transform_indices = @transform_0, window_bounds = array<i64: 1, 8, 16>}, {pipeline_mode = #tpu.pipeline_mode<synchronous>, transform_indices = @transform_1, window_bounds = array<i64: 16, 64>}, {pipeline_mode = #tpu.pipeline_mode<synchronous>, transform_indices = @transform_2, window_bounds = array<i64: 16, 64>}, {pipeline_mode = #tpu.pipeline_mode<synchronous>, transform_indices = @transform_3, window_bounds = array<i64: 1, 32>}, {pipeline_mode = #tpu.pipeline_mode<synchronous>, transform_indices = @transform_4, window_bounds = array<i64: 1, 32>}, {pipeline_mode = #tpu.pipeline_mode<synchronous>, transform_indices = @transform_5, window_bounds = array<i64: 1, 32>}, {pipeline_mode = #tpu.pipeline_mode<synchronous>, transform_indices = @transform_6, window_bounds = array<i64: 32, 128>}, {pipeline_mode = #tpu.pipeline_mode<synchronous>, transform_indices = @transform_7, window_bounds = array<i64: 1, 128>}, {pipeline_mode = #tpu.pipeline_mode<synchronous>, transform_indices = @transform_8, window_bounds = array<i64: 128, 32>}, {pipeline_mode = #tpu.pipeline_mode<synchronous>, transform_indices = @transform_9, window_bounds = array<i64: 1, 32>}, {pipeline_mode = #tpu.pipeline_mode<synchronous>, transform_indices = @transform_10, window_bounds = array<i64: 1, 32>}, {pipeline_mode = #tpu.pipeline_mode<synchronous>, transform_indices = @transform_11, window_bounds = array<i64: 1, 32>}, {transform_indices = @transform_12, window_bounds = array<i64: 1, 8, 32>}]} {
    %c0_i32 = arith.constant 0 : i32
    %0 = arith.cmpi eq, %arg1, %c0_i32 : i32
    %1 = arith.extui %0 : i1 to i32
    %c0_i32_0 = arith.constant 0 : i32
    %2 = arith.cmpi ne, %1, %c0_i32_0 : i32
    scf.if %2 {
      %c0_56 = arith.constant 0 : index
      %c0_57 = arith.constant 0 : index
      %c0_58 = arith.constant 0 : index
      %142 = vector.load %arg2[%c0_56, %c0_57, %c0_58] : memref<1x8x16xf32, #tpu.memory_space<vmem>>, vector<1x8x16xf32>
      %143 = vector.shape_cast %142 : vector<1x8x16xf32> to vector<8x16xf32>
      %c0_59 = arith.constant 0 : index
      %c0_60 = arith.constant 0 : index
      %144 = vector.load %arg4[%c0_59, %c0_60] : memref<16x64xf32, #tpu.memory_space<vmem>>, vector<16x64xf32>
      %cst_61 = arith.constant dense<0.000000e+00> : vector<8x64xf32>
      %145 = tpu.matmul %143, %144, %cst_61 {dimension_numbers = #tpu.dot_dimension_numbers<[1], [0], [0], [1], [0, 0, 1, 1], [], []>} : vector<8x16xf32>, vector<16x64xf32>, vector<8x64xf32> -> vector<8x64xf32>
      %c0_62 = arith.constant 0 : index
      %c0_63 = arith.constant 0 : index
      %146 = vector.load %arg15[%c0_62, %c0_63] : memref<8x64xf32, #tpu.memory_space<vmem>>, vector<8x64xf32>
      tpu.vector_store %arg15[%c0_62, %c0_63], %145 {strides = array<i32>} : memref<8x64xf32, #tpu.memory_space<vmem>>, vector<8x64xf32>,
    } else {
    }
    %c8_i32 = arith.constant 8 : i32
    %3 = arith.muli %arg1, %c8_i32 : i32
    %4 = tpu.assume_multiple %3, 8 : i32
    %c0 = arith.constant 0 : index
    %5 = arith.index_cast %4 : i32 to index
    %c0_1 = arith.constant 0 : index
    %6 = vector.load %arg2[%c0, %5, %c0_1] : memref<1x8x16xf32, #tpu.memory_space<vmem>>, vector<1x8x16xf32>
    %7 = vector.shape_cast %6 : vector<1x8x16xf32> to vector<8x16xf32>
    %c0_2 = arith.constant 0 : index
    %c0_3 = arith.constant 0 : index
    %8 = vector.load %arg3[%c0_2, %c0_3] : memref<16x64xf32, #tpu.memory_space<vmem>>, vector<16x64xf32>
    %cst = arith.constant dense<0.000000e+00> : vector<8x64xf32>
    %9 = tpu.matmul %7, %8, %cst {dimension_numbers = #tpu.dot_dimension_numbers<[1], [0], [0], [1], [0, 0, 1, 1], [], []>} : vector<8x16xf32>, vector<16x64xf32>, vector<8x64xf32> -> vector<8x64xf32>
    %10 = vector.extract_strided_slice %9 {offsets = [0, 0], sizes = [8, 32], strides = [1, 1]} : vector<8x64xf32> to vector<8x32xf32>
    %11 = vector.extract_strided_slice %9 {offsets = [0, 32], sizes = [8, 32], strides = [1, 1]} : vector<8x64xf32> to vector<8x32xf32>
    %c0_4 = arith.constant 0 : index
    %c0_5 = arith.constant 0 : index
    %12 = vector.load %arg5[%c0_4, %c0_5] : memref<1x32xf32, #tpu.memory_space<vmem>>, vector<1x32xf32>
    %13 = vector.broadcast %12 : vector<1x32xf32> to vector<8x32xf32>
    %14 = arith.addf %11, %13 : vector<8x32xf32>
    %c0_6 = arith.constant 0 : index
    %c0_7 = arith.constant 0 : index
    %15 = vector.load %arg15[%c0_6, %c0_7] : memref<8x64xf32, #tpu.memory_space<vmem>>, vector<8x64xf32>
    %16 = vector.extract_strided_slice %10 {offsets = [0, 0], sizes = [8, 8], strides = [1, 1]} : vector<8x32xf32> to vector<8x8xf32>
    %17 = vector.extract_strided_slice %15 {offsets = [0, 0], sizes = [8, 8], strides = [1, 1]} : vector<8x64xf32> to vector<8x8xf32>
    %18 = vector.extract_strided_slice %15 {offsets = [0, 32], sizes = [8, 8], strides = [1, 1]} : vector<8x64xf32> to vector<8x8xf32>
    %cst_8 = arith.constant dense<0.000000e+00> : vector<8x8xf32>
    %19 = tpu.matmul %16, %17, %cst_8 {dimension_numbers = #tpu.dot_dimension_numbers<[1], [1], [0], [0], [0, 0, 1, 0], [], []>} : vector<8x8xf32>, vector<8x8xf32>, vector<8x8xf32> -> vector<8x8xf32>
    %cst_9 = arith.constant dense<0xFF800000> : vector<8xf32>
    %20 = vector.multi_reduction <maximumf>, %19, %cst_9 [1] : vector<8x8xf32> to vector<8xf32>
    %21 = vector.shape_cast %20 : vector<8xf32> to vector<8x1xf32>
    %22 = vector.broadcast %21 : vector<8x1xf32> to vector<8x8xf32>
    %23 = arith.subf %19, %22 : vector<8x8xf32>
    %24 = math.exp %23 : vector<8x8xf32>
    %cst_10 = arith.constant dense<0.000000e+00> : vector<8xf32>
    %25 = vector.multi_reduction <add>, %24, %cst_10 [1] : vector<8x8xf32> to vector<8xf32>
    %26 = vector.shape_cast %25 : vector<8xf32> to vector<8x1xf32>
    %cst_11 = arith.constant dense<0.000000e+00> : vector<8x8xf32>
    %27 = tpu.matmul %24, %18, %cst_11 {dimension_numbers = #tpu.dot_dimension_numbers<[1], [0], [0], [1], [0, 0, 1, 1], [], []>} : vector<8x8xf32>, vector<8x8xf32>, vector<8x8xf32> -> vector<8x8xf32>
    %28 = tpu.reciprocal %26 {approx = true} : vector<8x1xf32> -> vector<8x1xf32>
    %29 = vector.broadcast %28 : vector<8x1xf32> to vector<8x8xf32>
    %30 = arith.mulf %27, %29 : vector<8x8xf32>
    %31 = vector.extract_strided_slice %10 {offsets = [0, 8], sizes = [8, 8], strides = [1, 1]} : vector<8x32xf32> to vector<8x8xf32>
    %32 = vector.extract_strided_slice %15 {offsets = [0, 8], sizes = [8, 8], strides = [1, 1]} : vector<8x64xf32> to vector<8x8xf32>
    %33 = vector.extract_strided_slice %15 {offsets = [0, 40], sizes = [8, 8], strides = [1, 1]} : vector<8x64xf32> to vector<8x8xf32>
    %cst_12 = arith.constant dense<0.000000e+00> : vector<8x8xf32>
    %34 = tpu.matmul %31, %32, %cst_12 {dimension_numbers = #tpu.dot_dimension_numbers<[1], [1], [0], [0], [0, 0, 1, 0], [], []>} : vector<8x8xf32>, vector<8x8xf32>, vector<8x8xf32> -> vector<8x8xf32>
    %cst_13 = arith.constant dense<0xFF800000> : vector<8xf32>
    %35 = vector.multi_reduction <maximumf>, %34, %cst_13 [1] : vector<8x8xf32> to vector<8xf32>
    %36 = vector.shape_cast %35 : vector<8xf32> to vector<8x1xf32>
    %37 = vector.broadcast %36 : vector<8x1xf32> to vector<8x8xf32>
    %38 = arith.subf %34, %37 : vector<8x8xf32>
    %39 = math.exp %38 : vector<8x8xf32>
    %cst_14 = arith.constant dense<0.000000e+00> : vector<8xf32>
    %40 = vector.multi_reduction <add>, %39, %cst_14 [1] : vector<8x8xf32> to vector<8xf32>
    %41 = vector.shape_cast %40 : vector<8xf32> to vector<8x1xf32>
    %cst_15 = arith.constant dense<0.000000e+00> : vector<8x8xf32>
    %42 = tpu.matmul %39, %33, %cst_15 {dimension_numbers = #tpu.dot_dimension_numbers<[1], [0], [0], [1], [0, 0, 1, 1], [], []>} : vector<8x8xf32>, vector<8x8xf32>, vector<8x8xf32> -> vector<8x8xf32>
    %43 = tpu.reciprocal %41 {approx = true} : vector<8x1xf32> -> vector<8x1xf32>
    %44 = vector.broadcast %43 : vector<8x1xf32> to vector<8x8xf32>
    %45 = arith.mulf %42, %44 : vector<8x8xf32>
    %46 = vector.extract_strided_slice %10 {offsets = [0, 16], sizes = [8, 8], strides = [1, 1]} : vector<8x32xf32> to vector<8x8xf32>
    %47 = vector.extract_strided_slice %15 {offsets = [0, 16], sizes = [8, 8], strides = [1, 1]} : vector<8x64xf32> to vector<8x8xf32>
    %48 = vector.extract_strided_slice %15 {offsets = [0, 48], sizes = [8, 8], strides = [1, 1]} : vector<8x64xf32> to vector<8x8xf32>
    %cst_16 = arith.constant dense<0.000000e+00> : vector<8x8xf32>
    %49 = tpu.matmul %46, %47, %cst_16 {dimension_numbers = #tpu.dot_dimension_numbers<[1], [1], [0], [0], [0, 0, 1, 0], [], []>} : vector<8x8xf32>, vector<8x8xf32>, vector<8x8xf32> -> vector<8x8xf32>
    %cst_17 = arith.constant dense<0xFF800000> : vector<8xf32>
    %50 = vector.multi_reduction <maximumf>, %49, %cst_17 [1] : vector<8x8xf32> to vector<8xf32>
    %51 = vector.shape_cast %50 : vector<8xf32> to vector<8x1xf32>
    %52 = vector.broadcast %51 : vector<8x1xf32> to vector<8x8xf32>
    %53 = arith.subf %49, %52 : vector<8x8xf32>
    %54 = math.exp %53 : vector<8x8xf32>
    %cst_18 = arith.constant dense<0.000000e+00> : vector<8xf32>
    %55 = vector.multi_reduction <add>, %54, %cst_18 [1] : vector<8x8xf32> to vector<8xf32>
    %56 = vector.shape_cast %55 : vector<8xf32> to vector<8x1xf32>
    %cst_19 = arith.constant dense<0.000000e+00> : vector<8x8xf32>
    %57 = tpu.matmul %54, %48, %cst_19 {dimension_numbers = #tpu.dot_dimension_numbers<[1], [0], [0], [1], [0, 0, 1, 1], [], []>} : vector<8x8xf32>, vector<8x8xf32>, vector<8x8xf32> -> vector<8x8xf32>
    %58 = tpu.reciprocal %56 {approx = true} : vector<8x1xf32> -> vector<8x1xf32>
    %59 = vector.broadcast %58 : vector<8x1xf32> to vector<8x8xf32>
    %60 = arith.mulf %57, %59 : vector<8x8xf32>
    %61 = vector.extract_strided_slice %10 {offsets = [0, 24], sizes = [8, 8], strides = [1, 1]} : vector<8x32xf32> to vector<8x8xf32>
    %62 = vector.extract_strided_slice %15 {offsets = [0, 24], sizes = [8, 8], strides = [1, 1]} : vector<8x64xf32> to vector<8x8xf32>
    %63 = vector.extract_strided_slice %15 {offsets = [0, 56], sizes = [8, 8], strides = [1, 1]} : vector<8x64xf32> to vector<8x8xf32>
    %cst_20 = arith.constant dense<0.000000e+00> : vector<8x8xf32>
    %64 = tpu.matmul %61, %62, %cst_20 {dimension_numbers = #tpu.dot_dimension_numbers<[1], [1], [0], [0], [0, 0, 1, 0], [], []>} : vector<8x8xf32>, vector<8x8xf32>, vector<8x8xf32> -> vector<8x8xf32>
    %cst_21 = arith.constant dense<0xFF800000> : vector<8xf32>
    %65 = vector.multi_reduction <maximumf>, %64, %cst_21 [1] : vector<8x8xf32> to vector<8xf32>
    %66 = vector.shape_cast %65 : vector<8xf32> to vector<8x1xf32>
    %67 = vector.broadcast %66 : vector<8x1xf32> to vector<8x8xf32>
    %68 = arith.subf %64, %67 : vector<8x8xf32>
    %69 = math.exp %68 : vector<8x8xf32>
    %cst_22 = arith.constant dense<0.000000e+00> : vector<8xf32>
    %70 = vector.multi_reduction <add>, %69, %cst_22 [1] : vector<8x8xf32> to vector<8xf32>
    %71 = vector.shape_cast %70 : vector<8xf32> to vector<8x1xf32>
    %cst_23 = arith.constant dense<0.000000e+00> : vector<8x8xf32>
    %72 = tpu.matmul %69, %63, %cst_23 {dimension_numbers = #tpu.dot_dimension_numbers<[1], [0], [0], [1], [0, 0, 1, 1], [], []>} : vector<8x8xf32>, vector<8x8xf32>, vector<8x8xf32> -> vector<8x8xf32>
    %73 = tpu.reciprocal %71 {approx = true} : vector<8x1xf32> -> vector<8x1xf32>
    %74 = vector.broadcast %73 : vector<8x1xf32> to vector<8x8xf32>
    %75 = arith.mulf %72, %74 : vector<8x8xf32>
    %76 = tpu.concatenate %30, %45, %60, %75 in 1 : vector<8x8xf32>, vector<8x8xf32>, vector<8x8xf32>, vector<8x8xf32> -> vector<8x32xf32>
    %77 = arith.addf %76, %14 : vector<8x32xf32>
    %c0_24 = arith.constant 0 : index
    %c0_25 = arith.constant 0 : index
    %78 = vector.load %arg6[%c0_24, %c0_25] : memref<1x32xf32, #tpu.memory_space<vmem>>, vector<1x32xf32>
    %c0_26 = arith.constant 0 : index
    %c0_27 = arith.constant 0 : index
    %79 = vector.load %arg7[%c0_26, %c0_27] : memref<1x32xf32, #tpu.memory_space<vmem>>, vector<1x32xf32>
    %cst_28 = arith.constant dense<0.000000e+00> : vector<8xf32>
    %80 = vector.multi_reduction <add>, %77, %cst_28 [1] : vector<8x32xf32> to vector<8xf32>
    %81 = vector.shape_cast %80 : vector<8xf32> to vector<8x1xf32>
    %cst_29 = arith.constant 3.200000e+01 : f32
    %82 = vector.broadcast %cst_29 : f32 to vector<8x1xf32>
    %83 = arith.divf %81, %82 : vector<8x1xf32>
    %84 = vector.broadcast %83 : vector<8x1xf32> to vector<8x32xf32>
    %85 = arith.subf %77, %84 : vector<8x32xf32>
    %86 = arith.mulf %85, %85 : vector<8x32xf32>
    %cst_30 = arith.constant dense<0.000000e+00> : vector<8xf32>
    %87 = vector.multi_reduction <add>, %86, %cst_30 [1] : vector<8x32xf32> to vector<8xf32>
    %88 = vector.shape_cast %87 : vector<8xf32> to vector<8x1xf32>
    %cst_31 = arith.constant 3.200000e+01 : f32
    %89 = vector.broadcast %cst_31 : f32 to vector<8x1xf32>
    %90 = arith.divf %88, %89 : vector<8x1xf32>
    %91 = vector.broadcast %83 : vector<8x1xf32> to vector<8x32xf32>
    %92 = arith.subf %77, %91 : vector<8x32xf32>
    %cst_32 = arith.constant 9.99999974E-6 : f32
    %93 = vector.broadcast %cst_32 : f32 to vector<8x1xf32>
    %94 = arith.addf %90, %93 : vector<8x1xf32>
    %95 = math.rsqrt %94 : vector<8x1xf32>
    %96 = vector.broadcast %95 : vector<8x1xf32> to vector<8x32xf32>
    %97 = arith.mulf %92, %96 : vector<8x32xf32>
    %98 = vector.broadcast %78 : vector<1x32xf32> to vector<8x32xf32>
    %99 = arith.mulf %97, %98 : vector<8x32xf32>
    %100 = vector.broadcast %79 : vector<1x32xf32> to vector<8x32xf32>
    %101 = arith.addf %99, %100 : vector<8x32xf32>
    %c0_33 = arith.constant 0 : index
    %c0_34 = arith.constant 0 : index
    %102 = vector.load %arg8[%c0_33, %c0_34] : memref<32x128xf32, #tpu.memory_space<vmem>>, vector<32x128xf32>
    %cst_35 = arith.constant dense<0.000000e+00> : vector<8x128xf32>
    %103 = tpu.matmul %101, %102, %cst_35 {dimension_numbers = #tpu.dot_dimension_numbers<[1], [0], [0], [1], [0, 0, 1, 1], [], []>} : vector<8x32xf32>, vector<32x128xf32>, vector<8x128xf32> -> vector<8x128xf32>
    %c0_36 = arith.constant 0 : index
    %c0_37 = arith.constant 0 : index
    %104 = vector.load %arg9[%c0_36, %c0_37] : memref<1x128xf32, #tpu.memory_space<vmem>>, vector<1x128xf32>
    %105 = vector.broadcast %104 : vector<1x128xf32> to vector<8x128xf32>
    %106 = arith.addf %103, %105 : vector<8x128xf32>
    %cst_38 = arith.constant 0.000000e+00 : f32
    %107 = vector.broadcast %cst_38 : f32 to vector<8x128xf32>
    %108 = arith.maximumf %106, %107 : vector<8x128xf32>
    %c0_39 = arith.constant 0 : index
    %c0_40 = arith.constant 0 : index
    %109 = vector.load %arg10[%c0_39, %c0_40] : memref<128x32xf32, #tpu.memory_space<vmem>>, vector<128x32xf32>
    %cst_41 = arith.constant dense<0.000000e+00> : vector<8x32xf32>
    %110 = tpu.matmul %108, %109, %cst_41 {dimension_numbers = #tpu.dot_dimension_numbers<[1], [0], [0], [1], [0, 0, 1, 1], [], []>} : vector<8x128xf32>, vector<128x32xf32>, vector<8x32xf32> -> vector<8x32xf32>
    %c0_42 = arith.constant 0 : index
    %c0_43 = arith.constant 0 : index
    %111 = vector.load %arg11[%c0_42, %c0_43] : memref<1x32xf32, #tpu.memory_space<vmem>>, vector<1x32xf32>
    %112 = vector.broadcast %111 : vector<1x32xf32> to vector<8x32xf32>
    %113 = arith.addf %110, %112 : vector<8x32xf32>
    %114 = arith.addf %113, %101 : vector<8x32xf32>
    %c0_44 = arith.constant 0 : index
    %c0_45 = arith.constant 0 : index
    %115 = vector.load %arg12[%c0_44, %c0_45] : memref<1x32xf32, #tpu.memory_space<vmem>>, vector<1x32xf32>
    %c0_46 = arith.constant 0 : index
    %c0_47 = arith.constant 0 : index
    %116 = vector.load %arg13[%c0_46, %c0_47] : memref<1x32xf32, #tpu.memory_space<vmem>>, vector<1x32xf32>
    %cst_48 = arith.constant dense<0.000000e+00> : vector<8xf32>
    %117 = vector.multi_reduction <add>, %114, %cst_48 [1] : vector<8x32xf32> to vector<8xf32>
    %118 = vector.shape_cast %117 : vector<8xf32> to vector<8x1xf32>
    %cst_49 = arith.constant 3.200000e+01 : f32
    %119 = vector.broadcast %cst_49 : f32 to vector<8x1xf32>
    %120 = arith.divf %118, %119 : vector<8x1xf32>
    %121 = vector.broadcast %120 : vector<8x1xf32> to vector<8x32xf32>
    %122 = arith.subf %114, %121 : vector<8x32xf32>
    %123 = arith.mulf %122, %122 : vector<8x32xf32>
    %cst_50 = arith.constant dense<0.000000e+00> : vector<8xf32>
    %124 = vector.multi_reduction <add>, %123, %cst_50 [1] : vector<8x32xf32> to vector<8xf32>
    %125 = vector.shape_cast %124 : vector<8xf32> to vector<8x1xf32>
    %cst_51 = arith.constant 3.200000e+01 : f32
    %126 = vector.broadcast %cst_51 : f32 to vector<8x1xf32>
    %127 = arith.divf %125, %126 : vector<8x1xf32>
    %128 = vector.broadcast %120 : vector<8x1xf32> to vector<8x32xf32>
    %129 = arith.subf %114, %128 : vector<8x32xf32>
    %cst_52 = arith.constant 9.99999974E-6 : f32
    %130 = vector.broadcast %cst_52 : f32 to vector<8x1xf32>
    %131 = arith.addf %127, %130 : vector<8x1xf32>
    %132 = math.rsqrt %131 : vector<8x1xf32>
    %133 = vector.broadcast %132 : vector<8x1xf32> to vector<8x32xf32>
    %134 = arith.mulf %129, %133 : vector<8x32xf32>
    %135 = vector.broadcast %115 : vector<1x32xf32> to vector<8x32xf32>
    %136 = arith.mulf %134, %135 : vector<8x32xf32>
    %137 = vector.broadcast %116 : vector<1x32xf32> to vector<8x32xf32>
    %138 = arith.addf %136, %137 : vector<8x32xf32>
    %c0_53 = arith.constant 0 : index
    %c0_54 = arith.constant 0 : index
    %c0_55 = arith.constant 0 : index
    %139 = vector.load %arg14[%c0_53, %c0_54, %c0_55] : memref<1x8x32xf32, #tpu.memory_space<vmem>>, vector<1x8x32xf32>
    %140 = vector.shape_cast %139 : vector<1x8x32xf32> to vector<8x32xf32>
    %141 = vector.shape_cast %138 : vector<8x32xf32> to vector<1x8x32xf32>
    tpu.vector_store %arg14[%c0_53, %c0_54, %c0_55], %141 {strides = array<i32>} : memref<1x8x32xf32, #tpu.memory_space<vmem>>, vector<1x8x32xf32>,
    return
  }
  func.func @transform_0(%arg0: i32, %arg1: i32) -> (i32, i32, i32) {
    %c0_i32 = arith.constant 0 : i32
    %c0_i32_0 = arith.constant 0 : i32
    %c0_i32_1 = arith.constant 0 : i32
    return %arg0, %c0_i32, %c0_i32_0 : i32, i32, i32
  }
  func.func @transform_1(%arg0: i32, %arg1: i32) -> (i32, i32) {
    %c0_i32 = arith.constant 0 : i32
    %c0_i32_0 = arith.constant 0 : i32
    %c0_i32_1 = arith.constant 0 : i32
    return %c0_i32, %c0_i32_0 : i32, i32
  }
  func.func @transform_2(%arg0: i32, %arg1: i32) -> (i32, i32) {
    %c0_i32 = arith.constant 0 : i32
    %c0_i32_0 = arith.constant 0 : i32
    %c0_i32_1 = arith.constant 0 : i32
    return %c0_i32, %c0_i32_0 : i32, i32
  }
  func.func @transform_3(%arg0: i32, %arg1: i32) -> (i32, i32) {
    %c0_i32 = arith.constant 0 : i32
    %c0_i32_0 = arith.constant 0 : i32
    %c0_i32_1 = arith.constant 0 : i32
    return %c0_i32, %c0_i32_0 : i32, i32
  }
  func.func @transform_4(%arg0: i32, %arg1: i32) -> (i32, i32) {
    %c0_i32 = arith.constant 0 : i32
    %c0_i32_0 = arith.constant 0 : i32
    %c0_i32_1 = arith.constant 0 : i32
    return %c0_i32, %c0_i32_0 : i32, i32
  }
  func.func @transform_5(%arg0: i32, %arg1: i32) -> (i32, i32) {
    %c0_i32 = arith.constant 0 : i32
    %c0_i32_0 = arith.constant 0 : i32
    %c0_i32_1 = arith.constant 0 : i32
    return %c0_i32, %c0_i32_0 : i32, i32
  }
  func.func @transform_6(%arg0: i32, %arg1: i32) -> (i32, i32) {
    %c0_i32 = arith.constant 0 : i32
    %c0_i32_0 = arith.constant 0 : i32
    %c0_i32_1 = arith.constant 0 : i32
    return %c0_i32, %c0_i32_0 : i32, i32
  }
  func.func @transform_7(%arg0: i32, %arg1: i32) -> (i32, i32) {
    %c0_i32 = arith.constant 0 : i32
    %c0_i32_0 = arith.constant 0 : i32
    %c0_i32_1 = arith.constant 0 : i32
    return %c0_i32, %c0_i32_0 : i32, i32
  }
  func.func @transform_8(%arg0: i32, %arg1: i32) -> (i32, i32) {
    %c0_i32 = arith.constant 0 : i32
    %c0_i32_0 = arith.constant 0 : i32
    %c0_i32_1 = arith.constant 0 : i32
    return %c0_i32, %c0_i32_0 : i32, i32
  }
  func.func @transform_9(%arg0: i32, %arg1: i32) -> (i32, i32) {
    %c0_i32 = arith.constant 0 : i32
    %c0_i32_0 = arith.constant 0 : i32
    %c0_i32_1 = arith.constant 0 : i32
    return %c0_i32, %c0_i32_0 : i32, i32
  }
  func.func @transform_10(%arg0: i32, %arg1: i32) -> (i32, i32) {
    %c0_i32 = arith.constant 0 : i32
    %c0_i32_0 = arith.constant 0 : i32
    %c0_i32_1 = arith.constant 0 : i32
    return %c0_i32, %c0_i32_0 : i32, i32
  }
  func.func @transform_11(%arg0: i32, %arg1: i32) -> (i32, i32) {
    %c0_i32 = arith.constant 0 : i32
    %c0_i32_0 = arith.constant 0 : i32
    %c0_i32_1 = arith.constant 0 : i32
    return %c0_i32, %c0_i32_0 : i32, i32
  }
  func.func @transform_12(%arg0: i32, %arg1: i32) -> (i32, i32, i32) {
    %c0_i32 = arith.constant 0 : i32
    %c0_i32_0 = arith.constant 0 : i32
    return %arg0, %arg1, %c0_i32 : i32, i32, i32
  }
}

</mosaic_0001>

<bundles_post_ra>
// kernel: tpu_custom_call.1
= control target key start
LH: loop header
LB: loop body
LE: loop exit
PB: predicated region body
PF: predicated region fallthrough
CT: control target
= control target key end

     0   :  { %s3419_s0 = inlined_call_operand.hbm [shape: f32[2,8,16], index: 0, kind: input, shape index: {}]   ;;  %s3420_s1 = inlined_call_operand.hbm [shape: f32[16,64], index: 1, kind: input, shape index: {}]   ;;  %s3421_s2 = inlined_call_operand.hbm [shape: f32[16,64], index: 2, kind: input, shape index: {}]   ;;  %s3422_s3 = inlined_call_operand.hbm [shape: f32[1,32], index: 3, kind: input, shape index: {}]   ;;  %s3423_s4 = inlined_call_operand.hbm [shape: f32[1,32], index: 4, kind: input, shape index: {}]   ;;  %s3424_s5 = inlined_call_operand.hbm [shape: f32[1,32], index: 5, kind: input, shape index: {}]   ;;  %s3425_s6 = inlined_call_operand.hbm [shape: f32[32,128], index: 6, kind: input, shape index: {}]   ;;  %s3426_s7 = inlined_call_operand.hbm [shape: f32[1,128], index: 7, kind: input, shape index: {}]   ;;  %s3427_s8 = inlined_call_operand.hbm [shape: f32[128,32], index: 8, kind: input, shape index: {}]   ;;  %s3428_s9 = inlined_call_operand.hbm [shape: f32[1,32], index: 9, kind: input, shape index: {}]   ;;  %s3429_s10 = inlined_call_operand.hbm [shape: f32[1,32], index: 10, kind: input, shape index: {}]   ;;  %s3430_s11 = inlined_call_operand.hbm [shape: f32[1,32], index: 11, kind: input, shape index: {}]   ;;  %s3431_s12 = inlined_call_operand.hbm [shape: f32[2,8,32], index: 12, kind: output, shape index: {}]  }
   0x1   :  { %3446 = sst [smem:[#allocation36_spill]] %s3419_s0 }
   0x2   :  { %3447 = sst [smem:[#allocation37_spill]] %s3420_s1 }
   0x3   :  { %3448 = sst [smem:[#allocation38_spill]] %s3421_s2 }
   0x4   :  { %3449 = sst [smem:[#allocation39_spill]] %s3422_s3 }
   0x5   :  { %3450 = sst [smem:[#allocation40_spill]] %s3431_s12 }
   0x6   :  { %17 = vsyncpa [#allocation4], 0 }
   0x7   :  { %19 = vsyncpa [#allocation4 + $0x1], 0 }
   0x8   :  { %20 = vsyncpa [#allocation7], 0 }
   0x9   :  { %21 = vsyncpa [#allocation10], 0 }
   0xa   :  { %22 = vsyncpa [#allocation13], 0 }
   0xb   :  { %23 = vsyncpa [#allocation16], 0 }
   0xc   :  { %24 = vsyncpa [#allocation19], 0 }
   0xd   :  { %25 = vsyncpa [#allocation22], 0 }
   0xe   :  { %26 = vsyncpa [#allocation5], 0 }
   0xf   :  { %28 = vsyncpa [#allocation5 + $0x1], 0  ;;  %s2869_s21 = smov 0   ;;  %s2871_s22 = smov 0  }
  0x10   :  { %s2873_s23 = smov 0   ;;  %s2875_s24 = smov 0  }
  0x11   :  { %s2877_s25 = smov 0   ;;  %s2879_s26 = smov 0  }
  0x12 LB: > { %3451 = sst [smem:[#allocation32_spill]] %s2753_s21  ;;  %s3432_s27 = sadd.s32 4294967295, %s2773_s26   ;;  %s2773_s26 = sphi %s2879_s26, %s34_s26   ;;  %s2769_s25 = sphi %s2877_s25, %s3490_s25   ;;  %s2765_s24 = sphi %s2875_s24, %s3489_s24   ;;  %s2761_s23 = sphi %s2873_s23, %s3488_s23   ;;  %s2757_s22 = sphi %s2871_s22, %s3487_s22   ;;  %s2753_s21 = sphi %s2869_s21, %s3486_s21  }
  0x13   : > { %3452 = sst [smem:[#allocation33_spill]] %s2765_s24  ;;  %p1885_p0 = scmp.ge.s32.totalorder %s2773_s26, 1 }
  0x14   : > { %p2903_p1 = scmp.eq.s32.totalorder %s3432_s27, 0  ;;  %p336_p2 = scmp.lt.s32.totalorder %s2773_s26, 3 }
  0x15   : > { %s2775_s30 = smov [#allocation6]   ;;  %s2776_s15 = smov [#allocation9]  }
  0x16   : > { %s3453_s28 = scalar_select %p2903_p1, 1, 0 }
  0x17   : > { %p2908_p3 = pnand %p1885_p0, %p336_p2  ;;  %s348_s13 = sshll.u32 %s2775_s30, 4  ;;  %s2912_s13 = int_to_ptr.vmem [resolvable:$true] %s348_s13 }
  0x18   : > { %3454 = sst [smem:[#allocation34_spill]] %s3453_s28  ;;  %s375_s16 = sshll.u32 %s2776_s15, 4  ;;  %s2923_s16 = int_to_ptr.vmem [resolvable:$true] %s375_s16 }
  0x19   : > { %s3455_s29 = scalar_select %p2908_p3, 1, 0 }
  0x1a   : > { %p2168_p4 = pneg %p2908_p3  ;;  %s2777_s17 = smov [#allocation12]  }
  0x1b   : > { %3456 = sst [smem:[#allocation35_spill]] %s3455_s29  ;;  %s2925_s18 = sshll.u32 %s2777_s17, 4  ;;  %s398_s18 = int_to_ptr.vmem [resolvable:$true] %s2925_s18 }
  0x1c   : > { %p2919_p6 = pnand %p2168_p4, %p2903_p1  ;;  %s3458_s1 = sld [smem:[#allocation37_spill]] }
  0x1e   : > { %p2935_p8 = pneg %p2919_p6 }
  0x22   : > { %s2329_s30 = scalar_lea.hbm %s3458_s1, 256 }
  0x23   : > { %p2330_p7 = scmp.ne.s32.totalorder %s3458_s1, %s2329_s30  ;;  %p2336_p11 = scmp.lt.u32.totalorder %s2329_s30, %s3458_s1 }
  0x25   : > { %p2332_p9 = pnand %p2935_p8, %p2330_p7 }
  0x27   : > { %p2333_p10 = pneg %p2332_p9 }
  0x29   : > { %p2338_p12 = pnand %p2336_p11, %p2333_p10 }
  0x2b   : > { %2341 = shalt.err (!%p2338_p12)
}
  0x2c   : > { %s2342_s12 = scalar_lea.vmem %s2912_s13, 256  ;;  %p2350_p4 = scmp.lt.s32.totalorder %s2912_s13, %s2912_s13 }
  0x2d   : > { %p2343_p13 = scmp.ne.s32.totalorder %s2912_s13, %s2342_s12  ;;  %p2351_p5 = scmp.lt.s32.totalorder %s2342_s12, %s2342_s12 }
  0x2f   : > { %p2345_p0 = pnand %p2343_p13, %p2935_p8  ;;  %p2352_p7 = por %p2351_p5, %p2350_p4 }
  0x31   : > { %p2346_p2 = pneg %p2345_p0 }
  0x33   : > { %p2353_p9 = pnand %p2352_p7, %p2346_p2 }
  0x35   : > { %2356 = shalt.err (!%p2353_p9)
}
  0x36   : > { %s3441_s27 = smov 128   ;;  %s3443_s19 = smov 8  }
  0x37   : > { %2171 = dma.hbm_to_vmem [thread:$0]  (!%p2919_p6), %s3458_s1, 256, %s2912_s13, [#allocation7], %s3441_s27, %s3441_s27, %s3443_s19  }
  0x38   : > { %s3460_s3 = sld [smem:[#allocation39_spill]] }
  0x3e   : > { %s2357_s12 = scalar_lea.hbm %s3460_s3, 16 }
  0x3f   : > { %p2358_p5 = scmp.ne.s32.totalorder %s3460_s3, %s2357_s12  ;;  %p2364_p12 = scmp.lt.u32.totalorder %s2357_s12, %s3460_s3 }
  0x41   : > { %p2360_p10 = pnand %p2358_p5, %p2935_p8 }
  0x43   : > { %p2361_p11 = pneg %p2360_p10 }
  0x45   : > { %p2366_p13 = pnand %p2364_p12, %p2361_p11 }
  0x47   : > { %2369 = shalt.err (!%p2366_p13)
}
  0x48   : > { %s2370_s13 = scalar_lea.vmem %s2923_s16, 16  ;;  %s2377_s0 = scalar_lea.vmem %s2923_s16, 32 }
  0x49   : > { %p2371_p0 = scmp.ne.s32.totalorder %s2923_s16, %s2370_s13  ;;  %p2378_p7 = scmp.lt.s32.totalorder %s2923_s16, %s2923_s16 }
  0x4a   : > { %p2379_p9 = scmp.lt.s32.totalorder %s2377_s0, %s2370_s13 }
  0x4b   : > { %p2373_p2 = pnand %p2371_p0, %p2935_p8 }
  0x4c   : > { %p2380_p5 = por %p2379_p9, %p2378_p7 }
  0x4d   : > { %p2374_p4 = pneg %p2373_p2 }
  0x4f   : > { %p2381_p10 = pnand %p2380_p5, %p2374_p4 }
  0x51   : > { %2384 = shalt.err (!%p2381_p10)
}
  0x52   : > { %2177 = dma.hbm_to_vmem [thread:$0]  (!%p2919_p6), %s3460_s3, 16, %s2923_s16, [#allocation10]  }
  0x53   : > { %s2385_s30 = scalar_lea.hbm %s3424_s5, 16 }
  0x54   : > { %p2386_p11 = scmp.ne.s32.totalorder %s3424_s5, %s2385_s30  ;;  %p2392_p0 = scmp.lt.u32.totalorder %s2385_s30, %s3424_s5 }
  0x56   : > { %p2388_p12 = pnand %p2386_p11, %p2935_p8 }
  0x58   : > { %p2389_p13 = pneg %p2388_p12 }
  0x5a   : > { %p2394_p2 = pnand %p2392_p0, %p2389_p13 }
  0x5c   : > { %2397 = shalt.err (!%p2394_p2)
}
  0x5d   : > { %s2398_s0 = scalar_lea.vmem %s398_s18, 16  ;;  %s2405_s16 = scalar_lea.vmem %s398_s18, 32 }
  0x5e   : > { %p2399_p4 = scmp.ne.s32.totalorder %s398_s18, %s2398_s0  ;;  %p2406_p5 = scmp.lt.s32.totalorder %s398_s18, %s398_s18 }
  0x5f   : > { %p2407_p10 = scmp.lt.s32.totalorder %s2405_s16, %s2398_s0 }
  0x60   : > { %p2401_p7 = pnand %p2399_p4, %p2935_p8 }
  0x61   : > { %p2408_p3 = por %p2407_p10, %p2406_p5 }
  0x62   : > { %p2402_p9 = pneg %p2401_p7 }
  0x64   : > { %p2409_p1 = pnand %p2408_p3, %p2402_p9 }
  0x66   : > { %2412 = shalt.err (!%p2409_p1)
}
  0x67   : > { %2183 = dma.hbm_to_vmem [thread:$0]  (!%p2919_p6), %s3424_s5, 16, %s398_s18, [#allocation13]  }
  0x68   : > { %s2780_s29 = smov [#allocation15]   ;;  %s2781_s30 = smov [#allocation18]  }
  0x69   : > { %s421_s20 = sshll.u32 %s2780_s29, 4  ;;  %s445_s15 = sshll.u32 %s2781_s30, 4  ;;  %s422_s20 = int_to_ptr.vmem [resolvable:$true] %s421_s20  ;;  %s446_s15 = int_to_ptr.vmem [resolvable:$true] %s445_s15 }
  0x6a   : > { %s2413_s13 = scalar_lea.hbm %s3426_s7, 16 }
  0x6b   : > { %p2414_p1 = scmp.ne.s32.totalorder %s3426_s7, %s2413_s13  ;;  %p2420_p12 = scmp.lt.u32.totalorder %s2413_s13, %s3426_s7 }
  0x6d   : > { %p2416_p3 = pnand %p2414_p1, %p2935_p8 }
  0x6f   : > { %p2417_p11 = pneg %p2416_p3 }
  0x71   : > { %p2422_p13 = pnand %p2420_p12, %p2417_p11 }
  0x73   : > { %2425 = shalt.err (!%p2422_p13)
}
  0x74   : > { %s2426_s18 = scalar_lea.vmem %s422_s20, 16  ;;  %s2433_s28 = scalar_lea.vmem %s422_s20, 32 }
  0x75   : > { %p2427_p0 = scmp.ne.s32.totalorder %s422_s20, %s2426_s18  ;;  %p2434_p7 = scmp.lt.s32.totalorder %s422_s20, %s422_s20 }
  0x76   : > { %p2435_p9 = scmp.lt.s32.totalorder %s2433_s28, %s2426_s18 }
  0x77   : > { %p2429_p2 = pnand %p2427_p0, %p2935_p8 }
  0x78   : > { %p2436_p5 = por %p2435_p9, %p2434_p7 }
  0x79   : > { %p2430_p4 = pneg %p2429_p2 }
  0x7b   : > { %p2437_p10 = pnand %p2436_p5, %p2430_p4 }
  0x7d   : > { %2440 = shalt.err (!%p2437_p10)
}
  0x7e   : > { %2189 = dma.hbm_to_vmem [thread:$0]  (!%p2919_p6), %s3426_s7, 16, %s422_s20, [#allocation16]  }
  0x7f   : > { %s2441_s12 = scalar_lea.hbm %s3428_s9, 16 }
  0x80   : > { %p2442_p1 = scmp.ne.s32.totalorder %s3428_s9, %s2441_s12  ;;  %p2448_p12 = scmp.lt.u32.totalorder %s2441_s12, %s3428_s9 }
  0x82   : > { %p2444_p3 = pnand %p2442_p1, %p2935_p8 }
  0x84   : > { %p2445_p11 = pneg %p2444_p3 }
  0x86   : > { %p2450_p13 = pnand %p2448_p12, %p2445_p11 }
  0x88   : > { %2453 = shalt.err (!%p2450_p13)
}
  0x89   : > { %s2454_s18 = scalar_lea.vmem %s446_s15, 16  ;;  %s2461_s20 = scalar_lea.vmem %s446_s15, 32 }
  0x8a   : > { %p2455_p0 = scmp.ne.s32.totalorder %s446_s15, %s2454_s18  ;;  %p2462_p7 = scmp.lt.s32.totalorder %s446_s15, %s446_s15 }
  0x8b   : > { %p2463_p9 = scmp.lt.s32.totalorder %s2461_s20, %s2454_s18 }
  0x8c   : > { %p2457_p2 = pnand %p2455_p0, %p2935_p8 }
  0x8d   : > { %p2464_p5 = por %p2463_p9, %p2462_p7 }
  0x8e   : > { %p2458_p4 = pneg %p2457_p2 }
  0x90   : > { %p2465_p10 = pnand %p2464_p5, %p2458_p4 }
  0x92   : > { %2468 = shalt.err (!%p2465_p10)
}
  0x93   : > { %2195 = dma.hbm_to_vmem [thread:$0]  (!%p2919_p6), %s3428_s9, 16, %s446_s15, [#allocation19]  }
  0x94   : > { %s2782_s30 = smov [#allocation8]   ;;  %s2783_s17 = smov [#allocation11]  }
  0x95   : > { %s361_s27 = sshll.u32 %s2782_s30, 4  ;;  %s386_s12 = sshll.u32 %s2783_s17, 4  ;;  %s362_s27 = int_to_ptr.vmem [resolvable:$true] %s361_s27  ;;  %s387_s12 = int_to_ptr.vmem [resolvable:$true] %s386_s12 }
  0x96   : > { %s3461_s2 = sld [smem:[#allocation38_spill]] }
  0x9c   : > { %s2469_s16 = scalar_lea.hbm %s3461_s2, 256 }
  0x9d   : > { %p2470_p1 = scmp.ne.s32.totalorder %s3461_s2, %s2469_s16  ;;  %p2476_p12 = scmp.lt.u32.totalorder %s2469_s16, %s3461_s2 }
  0x9f   : > { %p2472_p3 = pnand %p2470_p1, %p2935_p8 }
  0xa1   : > { %p2473_p11 = pneg %p2472_p3 }
  0xa3   : > { %p2478_p13 = pnand %p2476_p12, %p2473_p11 }
  0xa5   : > { %2481 = shalt.err (!%p2478_p13)
}
  0xa6   : > { %s2482_s15 = scalar_lea.vmem %s362_s27, 256  ;;  %p2490_p7 = scmp.lt.s32.totalorder %s362_s27, %s362_s27 }
  0xa7   : > { %p2483_p0 = scmp.ne.s32.totalorder %s362_s27, %s2482_s15  ;;  %p2491_p9 = scmp.lt.s32.totalorder %s2482_s15, %s2482_s15 }
  0xa9   : > { %p2485_p2 = pnand %p2483_p0, %p2935_p8  ;;  %p2492_p5 = por %p2491_p9, %p2490_p7 }
  0xab   : > { %p2486_p4 = pneg %p2485_p2 }
  0xad   : > { %p2493_p10 = pnand %p2492_p5, %p2486_p4 }
  0xaf   : > { %2496 = shalt.err (!%p2493_p10)
}
  0xb0   : > { %s3462_s29 = smov 128   ;;  %s2497_s16 = scalar_lea.hbm %s3423_s4, 16 }
  0xb1   : > { %2174 = dma.hbm_to_vmem [thread:$0]  (!%p2919_p6), %s3461_s2, 256, %s362_s27, [#allocation7], %s3462_s29, %s3462_s29, %s3443_s19  }
  0xb2   : > { %p2498_p1 = scmp.ne.s32.totalorder %s3423_s4, %s2497_s16  ;;  %p2504_p12 = scmp.lt.u32.totalorder %s2497_s16, %s3423_s4 }
  0xb4   : > { %p2500_p3 = pnand %p2498_p1, %p2935_p8 }
  0xb6   : > { %p2501_p11 = pneg %p2500_p3 }
  0xb8   : > { %p2506_p13 = pnand %p2504_p12, %p2501_p11 }
  0xba   : > { %2509 = shalt.err (!%p2506_p13)
}
  0xbb   : > { %s2510_s15 = scalar_lea.vmem %s387_s12, 16  ;;  %s2517_s27 = scalar_lea.vmem %s387_s12, 32 }
  0xbc   : > { %p2511_p0 = scmp.ne.s32.totalorder %s387_s12, %s2510_s15  ;;  %p2518_p7 = scmp.lt.s32.totalorder %s387_s12, %s387_s12 }
  0xbd   : > { %p2519_p9 = scmp.lt.s32.totalorder %s2517_s27, %s2510_s15 }
  0xbe   : > { %p2513_p2 = pnand %p2511_p0, %p2935_p8 }
  0xbf   : > { %p2520_p5 = por %p2519_p9, %p2518_p7 }
  0xc0   : > { %p2514_p4 = pneg %p2513_p2 }
  0xc2   : > { %p2521_p10 = pnand %p2520_p5, %p2514_p4 }
  0xc4   : > { %2524 = shalt.err (!%p2521_p10)
}
  0xc5   : > { %2180 = dma.hbm_to_vmem [thread:$0]  (!%p2919_p6), %s3423_s4, 16, %s387_s12, [#allocation10]  }
  0xc6   : > { %s2784_s13 = smov [#allocation14]   ;;  %s2785_s16 = smov [#allocation17]  }
  0xc7   : > { %s407_s0 = sshll.u32 %s2784_s13, 4  ;;  %s431_s21 = sshll.u32 %s2785_s16, 4  ;;  %s408_s0 = int_to_ptr.vmem [resolvable:$true] %s407_s0  ;;  %s432_s21 = int_to_ptr.vmem [resolvable:$true] %s431_s21 }
  0xc8   : > { %s2525_s28 = scalar_lea.hbm %s3425_s6, 512 }
  0xc9   : > { %p2526_p1 = scmp.ne.s32.totalorder %s3425_s6, %s2525_s28  ;;  %p2532_p12 = scmp.lt.u32.totalorder %s2525_s28, %s3425_s6 }
  0xcb   : > { %p2528_p3 = pnand %p2526_p1, %p2935_p8 }
  0xcd   : > { %p2529_p11 = pneg %p2528_p3 }
  0xcf   : > { %p2534_p13 = pnand %p2532_p12, %p2529_p11 }
  0xd1   : > { %2537 = shalt.err (!%p2534_p13)
}
  0xd2   : > { %s2538_s12 = scalar_lea.vmem %s408_s0, 512  ;;  %p2546_p7 = scmp.lt.s32.totalorder %s408_s0, %s408_s0 }
  0xd3   : > { %p2539_p0 = scmp.ne.s32.totalorder %s408_s0, %s2538_s12  ;;  %p2547_p9 = scmp.lt.s32.totalorder %s2538_s12, %s2538_s12 }
  0xd5   : > { %p2541_p2 = pnand %p2539_p0, %p2935_p8  ;;  %p2548_p5 = por %p2547_p9, %p2546_p7 }
  0xd7   : > { %p2542_p4 = pneg %p2541_p2 }
  0xd9   : > { %p2549_p10 = pnand %p2548_p5, %p2542_p4 }
  0xdb   : > { %2552 = shalt.err (!%p2549_p10)
}
  0xdc   : > { %s3463_s17 = smov 8   ;;  %s2553_s20 = scalar_lea.hbm %s3427_s8, 2048 }
  0xdd   : > { %2186 = dma.hbm_to_vmem [thread:$0]  (!%p2919_p6), %s3425_s6, 512, %s408_s0, [#allocation13], %s3462_s29, %s3462_s29, %s3463_s17  }
  0xde   : > { %p2554_p1 = scmp.ne.s32.totalorder %s3427_s8, %s2553_s20  ;;  %p2560_p12 = scmp.lt.u32.totalorder %s2553_s20, %s3427_s8 }
  0xe0   : > { %p2556_p3 = pnand %p2554_p1, %p2935_p8 }
  0xe2   : > { %p2557_p11 = pneg %p2556_p3 }
  0xe4   : > { %p2562_p13 = pnand %p2560_p12, %p2557_p11 }
  0xe6   : > { %2565 = shalt.err (!%p2562_p13)
}
  0xe7   : > { %s2566_s12 = scalar_lea.vmem %s432_s21, 2048  ;;  %p2574_p7 = scmp.lt.s32.totalorder %s432_s21, %s432_s21 }
  0xe8   : > { %p2567_p0 = scmp.ne.s32.totalorder %s432_s21, %s2566_s12  ;;  %p2575_p9 = scmp.lt.s32.totalorder %s2566_s12, %s2566_s12 }
  0xea   : > { %p2569_p2 = pnand %p2567_p0, %p2935_p8  ;;  %p2576_p5 = por %p2575_p9, %p2574_p7 }
  0xec   : > { %p2570_p4 = pneg %p2569_p2 }
  0xee   : > { %p2577_p10 = pnand %p2576_p5, %p2570_p4 }
  0xf0   : > { %2580 = shalt.err (!%p2577_p10)
}
  0xf1   : > { %2192 = dma.hbm_to_vmem [thread:$0]  (!%p2919_p6), %s3427_s8, 2048, %s432_s21, [#allocation16], %s3462_s29, %s3462_s29, %s3463_s17  }
  0xf2   : > { %s2786_s13 = smov [#allocation20]   ;;  %s2787_s18 = smov [#allocation21]  }
  0xf3   : > { %s456_s16 = sshll.u32 %s2786_s13, 4  ;;  %s467_s20 = sshll.u32 %s2787_s18, 4  ;;  %s457_s16 = int_to_ptr.vmem [resolvable:$true] %s456_s16  ;;  %s468_s20 = int_to_ptr.vmem [resolvable:$true] %s467_s20 }
  0xf4   : > { %s2581_s27 = scalar_lea.hbm %s3429_s10, 16 }
  0xf5   : > { %p2582_p1 = scmp.ne.s32.totalorder %s3429_s10, %s2581_s27  ;;  %p2588_p12 = scmp.lt.u32.totalorder %s2581_s27, %s3429_s10 }
  0xf7   : > { %p2584_p3 = pnand %p2582_p1, %p2935_p8 }
  0xf9   : > { %p2585_p11 = pneg %p2584_p3 }
  0xfb   : > { %p2590_p13 = pnand %p2588_p12, %p2585_p11 }
  0xfd   : > { %2593 = shalt.err (!%p2590_p13)
}
  0xfe   : > { %s2594_s29 = scalar_lea.vmem %s457_s16, 16  ;;  %s2601_s21 = scalar_lea.vmem %s457_s16, 32 }
  0xff   : > { %p2595_p0 = scmp.ne.s32.totalorder %s457_s16, %s2594_s29  ;;  %p2602_p7 = scmp.lt.s32.totalorder %s457_s16, %s457_s16 }
 0x100   : > { %p2603_p9 = scmp.lt.s32.totalorder %s2601_s21, %s2594_s29 }
 0x101   : > { %p2597_p2 = pnand %p2595_p0, %p2935_p8 }
 0x102   : > { %p2604_p5 = por %p2603_p9, %p2602_p7 }
 0x103   : > { %p2598_p4 = pneg %p2597_p2 }
 0x105   : > { %p2605_p10 = pnand %p2604_p5, %p2598_p4 }
 0x107   : > { %2608 = shalt.err (!%p2605_p10)
}
 0x108   : > { %2198 = dma.hbm_to_vmem [thread:$0]  (!%p2919_p6), %s3429_s10, 16, %s457_s16, [#allocation19]  }
 0x109   : > { %s2609_s18 = scalar_lea.hbm %s3430_s11, 16 }
 0x10a   : > { %p2610_p1 = scmp.ne.s32.totalorder %s3430_s11, %s2609_s18  ;;  %p2616_p12 = scmp.lt.u32.totalorder %s2609_s18, %s3430_s11 }
 0x10c   : > { %p2612_p3 = pnand %p2610_p1, %p2935_p8 }
 0x10e   : > { %p2613_p11 = pneg %p2612_p3 }
 0x110   : > { %p2618_p13 = pnand %p2616_p12, %p2613_p11 }
 0x112   : > { %2621 = shalt.err (!%p2618_p13)
}
 0x113   : > { %s2622_s12 = scalar_lea.vmem %s468_s20, 16  ;;  %s2629_s16 = scalar_lea.vmem %s468_s20, 32 }
 0x114   : > { %p2623_p0 = scmp.ne.s32.totalorder %s468_s20, %s2622_s12  ;;  %p2630_p7 = scmp.lt.s32.totalorder %s468_s20, %s468_s20 }
 0x115   : > { %p2631_p9 = scmp.lt.s32.totalorder %s2629_s16, %s2622_s12 }
 0x116   : > { %p2625_p2 = pnand %p2623_p0, %p2935_p8 }
 0x117   : > { %p2632_p5 = por %p2631_p9, %p2630_p7 }
 0x118   : > { %p2626_p4 = pneg %p2625_p2 }
 0x11a   : > { %p2633_p10 = pnand %p2632_p5, %p2626_p4 }
 0x11c   : > { %2636 = shalt.err (!%p2633_p10)
}
 0x11d   : > { %s3464_s24 = sld [smem:[#allocation32_spill]]  ;;  %s3465_s21 = sld [smem:[#allocation34_spill]] }
 0x11e   : > { %2201 = dma.hbm_to_vmem [thread:$0]  (!%p2919_p6), %s3430_s11, 16, %s468_s20, [#allocation22]  }
 0x11f   : > { %s1884_s17 = sadd.s32 4294967294, %s2773_s26   ;;  %s46_s19 = sadd.s32 1, %s2769_s25 }
 0x120   : > { %s53_s14 = sadd.s32 1, %s2761_s23  ;;  %p48_p8 = scmp.ge.s32.totalorder %s46_s19, 2 }
 0x121   : > { %p60_p1 = scmp.ne.s32.totalorder %s2761_s23, %s2757_s22  ;;  %p61_p3 = scmp.eq.s32.totalorder %s2773_s26, 0 }
 0x122   : > { %s3492_s19 = smov (%p48_p8, %s46_s19), 0  ;;  %s3469_s18 = sadd.s32 4294967295, %s2773_s26  }
 0x123   : > { %p66_p11 = scmp.ne.s32.totalorder %s2757_s22, %s3464_s24  ;;  %p3165_p12 = por %p61_p3, %p60_p1 }
 0x124   : > { %p3467_p13 = scmp.ne.s32.totalorder %s3465_s21, 0  ;;  %s50_s13 = ssub.s32 %s2769_s25, %s3492_s19 }
 0x125   : > { %p323_p0 = scmp.eq.s32.totalorder %s3469_s18, 1  ;;  %p51_p2 = scmp.eq.s32.totalorder %s50_s13, 0 }
 0x126   : > { %p3171_p6 = por %p3467_p13, %p66_p11  ;;  %p329_p4 = scmp.eq.s32.totalorder %s1884_s17, 1 }
 0x127   : > { %p3179_p7 = por %p323_p0, %p60_p1  ;;  %p2221_p9 = scmp.lt.s32.totalorder %s2773_s26, 2 }
 0x128   : > { %s3185_s15 = scalar_select %p51_p2, %s2761_s23, %s53_s14  }
 0x129   : > { %s3470_s28 = scalar_select %p3179_p7, 1, 0 }
 0x12a   : > { %p3187_p5 = por %p329_p4, %p66_p11  ;;  %s478_s30 = sand.u32 1, %s2761_s23  }
 0x12b   : > { %s1898_s12 = sshll.u32 %s478_s30, 3  ;;  %s1899_s16 = sshll.u32 %s2769_s25, 7 }
 0x12c   : > { %s3471_s27 = scalar_select %p3187_p5, 1, 0 }
 0x12d   : > { %s3472_s24 = sld [smem:[#allocation36_spill]]  ;;  %s482_s17 = scalar_lea.vmem [#allocation3], %s1898_s12 }
 0x12e   : > { %s489_s13 = sshll.u32 %s482_s17, 4  ;;  %p3202_p10 = pnand %p2221_p9, %p3165_p12  ;;  %s3198_s13 = int_to_ptr.vmem [resolvable:$true] %s489_s13 }
 0x12f   : > { %s479_s18 = scalar_lea.sflag [#allocation4], %s478_s30 }
 0x130   : > { %p2639_p1 = pneg %p3202_p10 }
 0x133   : > { %s3473_s2 = smov %s3472_s24  ;;  %s3196_s21 = scalar_lea.hbm %s3472_s24, %s1899_s16 }
 0x134   : > { %s2637_s3 = scalar_lea.hbm %s3196_s21, 128  ;;  %s2642_s0 = scalar_lea.hbm %s3473_s2, 256 }
 0x135   : > { %p2638_p8 = scmp.ne.s32.totalorder %s3196_s21, %s2637_s3  ;;  %p2643_p12 = scmp.lt.u32.totalorder %s3196_s21, %s3473_s2 }
 0x136   : > { %p2644_p13 = scmp.lt.u32.totalorder %s2642_s0, %s2637_s3  ;;  %p2646_p2 = scmp.lt.u32.totalorder %s2637_s3, %s3196_s21 }
 0x137   : > { %p2640_p3 = pnand %p2639_p1, %p2638_p8 }
 0x138   : > { %p2645_p0 = por %p2644_p13, %p2643_p12 }
 0x139   : > { %p2641_p11 = pneg %p2640_p3 }
 0x13a   : > { %p2647_p4 = por %p2646_p2, %p2645_p0 }
 0x13c   : > { %p2648_p9 = pnand %p2647_p4, %p2641_p11 }
 0x13e   : > { %2651 = shalt.err (!%p2648_p9)
}
 0x13f   : > { %s2652_s30 = scalar_lea.vmem %s3198_s13, 128  ;;  %s2788_s24 = smov [#allocation3]  }
 0x140   : > { %p2653_p8 = scmp.ne.s32.totalorder %s3198_s13, %s2652_s30  ;;  %s2657_s17 = sshll.u32 %s2788_s24, 4  ;;  %s2658_s17 = int_to_ptr.vmem [resolvable:$false] %s2657_s17 }
 0x141   : > { %s2659_s12 = scalar_lea.vmem %s2658_s17, 256  ;;  %p2660_p7 = scmp.lt.s32.totalorder %s3198_s13, %s2658_s17 }
 0x142   : > { %p2655_p3 = pnand %p2653_p8, %p2639_p1  ;;  %p2661_p12 = scmp.lt.s32.totalorder %s2659_s12, %s2652_s30 }
 0x144   : > { %p2656_p5 = pneg %p2655_p3  ;;  %p2662_p13 = por %p2661_p12, %p2660_p7 }
 0x146   : > { %p2663_p0 = pnand %p2662_p13, %p2656_p5 }
 0x148   : > { %2666 = shalt.err (!%p2663_p0)
}
 0x149   : > { %2205 = dma.hbm_to_vmem [thread:$0]  (!%p3202_p10), %s3196_s21, 128, %s3198_s13, %s479_s18  }
 0x14a   : > { %s3475_s3 = sld [smem:[#allocation35_spill]] }
 0x150   : > { %p3476_p11 = scmp.ne.s32.totalorder %s3475_s3, 0 }
 0x151   : > { %s3234_s16 = sand.u32 (!%p3476_p11), 1, %s2757_s22  }
 0x152   : > { %498 = sbr.rel (%p3476_p11) target bundleno = 3124 (0xc34), region = 68  ;;  %s1901_s0 = sshll.u32 (!%p3476_p11), %s3234_s16, 3 }
 0x153   : > { %s501_s1 = scalar_lea.sflag (!%p3476_p11), [#allocation4], %s3234_s16  ;;  %s504_s29 = scalar_lea.vmem (!%p3476_p11), [#allocation3], %s1901_s0 }
 0x159   : > { %2720 = dma.done.wait (%p3171_p6), %s501_s1, 128  }
 0x15a   : > { %2722 = vsyncadd (%p3171_p6), %s501_s1, 4294967168  ;;  %s3477_s21 = sld [smem:[#allocation34_spill]] }
 0x160   : > { %p3478_p7 = scmp.ne.s32.totalorder %s3477_s21, 0 }
 0x162   : > { %2724 = dma.done.wait (%p3478_p7), [#allocation7], 512  }
 0x163   : > { %2726 = vsyncadd (%p3478_p7), [#allocation7], 4294966784 }
 0x164   : > { %2728 = dma.done.wait (%p3478_p7), [#allocation10], 32  }
 0x165   : > { %2730 = vsyncadd (%p3478_p7), [#allocation10], 4294967264 }
 0x166   : > { %2732 = dma.done.wait (%p3478_p7), [#allocation13], 528  }
 0x167   : > { %2734 = vsyncadd (%p3478_p7), [#allocation13], 4294966768 }
 0x168   : > { %2736 = dma.done.wait (%p3478_p7), [#allocation16], 2064  }
 0x169   : > { %2738 = vsyncadd (%p3478_p7), [#allocation16], 4294965232 }
 0x16a   : > { %2740 = dma.done.wait (%p3478_p7), [#allocation19], 32  }
 0x16b   : > { %2742 = vsyncadd (%p3478_p7), [#allocation19], 4294967264 }
 0x16c   : > { %2744 = dma.done.wait (%p3478_p7), [#allocation22], 16  }
 0x16d   : > { %2746 = vsyncadd (%p3478_p7), [#allocation22], 4294967280  ;;  %v2789_v0 = vmov 0.0|0.0   ;;  %vm2790_vm0 = vmmov 0   ;;  %v2791_v1 = vmov 0.0   ;;  %v594_v2 = vld [vmem:[#allocation8] sm:$0xff] }
 0x16e   : > { %2084 = vmatprep.subr.bf16.mxu0 %v2789_v0  ;;  %1988 = vmatprep.mubr.msk.f32.mxu0 %vm2790_vm0, %v2791_v1  ;;  %v595_v3 = vld [vmem:[#allocation8 + $0x8] sm:$0xff]  ;;  %v675_v5 = vld [vmem:[#allocation6] sm:$0xff]  ;;  %v676_v6 = vld [vmem:[#allocation6 + $0x8] sm:$0xff]  ;;  %vm596_vm1 = vcmask 130048   ;;  %vm670_vm2 = vcmask 523264   ;;  %vm762_vm3 = vcmask 64512  }
 0x16f   : > { %2023 = vmatprep.subr.mxu1 %v2791_v1  ;;  %2025 = vmatprep.mubr.msk.f32.mxu1 %vm2790_vm0, %v2791_v1  ;;  %v2085_v4 = vpack.c.bf16 %v595_v3, %v594_v2  ;;  %v593_v7 = vld [vmem:[%s504_s29] sm:$0xff]  ;;  %v2088_v8 = vpack.c.bf16 %v676_v6, %v675_v5  ;;  %s2792_s20 = smov 120   ;;  %s2793_s13 = smov 96   ;;  %v1916_v60 = vld [vmem:[#allocation9] ss:$0 sm:$0xff]  ;;  %vm1435_vm4 = vcmask 195584  }
 0x170   : > { %s2794_s14 = smov 88   ;;  %s2795_s18 = smov 112   ;;  %vm1444_vm5 = vcmask 261120  }
 0x171   : > { %2086 = vmatpush3.bf16.msra.mxu0 %v2085_v4  ;;  %s2796_s30 = smov 104   ;;  %s2797_s24 = smov 80  }
 0x172   : > { %2087 = vmatprep.subr.bf16.mxu0 %v2789_v0  ;;  %s2798_s17 = smov 72   ;;  %s2799_s12 = smov 32  }
 0x173   : > { %s2800_s3 = smov 8   ;;  %s2801_s1 = smov 16  }
 0x174   : > { %1989 = vmatmul.mubr.msk.f32.vlgmr.msra.gmra.mrb[0].mxu0 %vm596_vm1, %v593_v7  ;;  %s2802_s29 = smov 24   ;;  %s3479_s21 = sld [smem:[#allocation33_spill]] }
 0x175   : > { %2089 = vmatpush3.bf16.msra.mxu0 %v2088_v8  ;;  %1995 = vmatprep.mubr.msk.f32.mxu0 %vm2790_vm0, %v2791_v1  ;;  %p3482_p5 = scmp.ne.s32.totalorder %s3470_s28, 0 }
 0x176   : > { %1998 = vmatprep.subr.mxu0 %v2791_v1 }
 0x178   : > { %1996 = vmatmul.mubr.msk.f32.vlgmr.msra.gmra.mrb[2].mxu0 %vm596_vm1, %v593_v7 }
 0x179   : > { %2000 = vmatprep.mubr.msk.f32.mxu0 %vm2790_vm0, %v2791_v1 }
 0x247   : > { %v666_v9 = vpop.f32.mrb[0].mxu0 }
 0x248   : > { %671 = vst.msk [vmem:[#allocation2] sm:$0xff] %vm670_vm2, %v666_v9  ;;  %v1990_v10 = vpop.f32.mrb[1].mxu0 }
 0x24b   : > { %v3282_v11 = vpop.f32.mrb[2].mxu0 }
 0x24c   : > { %v1997_v12 = vpop.f32.mrb[3].mxu0 }
 0x24f   : > { %v3284_v13 = vld [vmem:[#allocation2] sm:$0xff] }
 0x250   : > { %928 = vrot.lane.b32.xlu1 %v3284_v13, %s2792_s20  ;;  %1999 = vmatpush3.xpose.msk.msra.mxu0 %vm762_vm3, %v3284_v13 }
 0x251   : > { %2003 = vmatprep.subr.mxu0 %v2791_v1 }
 0x253   : > { %2001 = vmatmul.mubr.msk.f32.vlgmr.msra.gmra.mrb[4].mxu0 %vm762_vm3, %v3282_v11 }
 0x254   : > { %926 = vrot.lane.b32.xlu1 %v3282_v11, %s2792_s20  ;;  %2005 = vmatprep.mubr.msk.f32.mxu0 %vm2790_vm0, %v2791_v1  ;;  %s1937_s20 = sshll.u32 %s3479_s21, 7 }
 0x2c2   : > { %v929_v21 = vpop.permute.xlu1 %928 }
 0x2c6   : > { %v927_v23 = vpop.permute.xlu1 %926 }
 0x326   : > { %v835_v14 = vpop.f32.mrb[4].mxu0 }
 0x327   : > { %v2002_v15 = vpop.f32.mrb[5].mxu0  ;;  %v839_v16 = vsel %vm762_vm3, %v835_v14, -inf }
 0x328   : > { %840 = vmax.xlane.f32.xlu0 %v839_v16 }
 0x33e   : > { %848 = vrot.lane.b32.xlu0 %v3284_v13, %s2793_s13 }
 0x342   : > { %1013 = vrot.lane.b32.xlu0 %v3284_v13, %s2794_s14 }
 0x346   : > { %1093 = vrot.lane.b32.xlu0 %v3284_v13, %s2795_s18 }
 0x34a   : > { %1091 = vrot.lane.b32.xlu0 %v3282_v11, %s2795_s18 }
 0x34e   : > { %1258 = vrot.lane.b32.xlu0 %v3284_v13, %s2796_s30 }
 0x352   : > { %1256 = vrot.lane.b32.xlu0 %v3282_v11, %s2796_s30 }
 0x3b5   : > { %v841_v17 = vpop.xlane.xlu0 %840 }
 0x3b6   : > { %v842_v18 = vsub.f32 %v835_v14, %v841_v17 }
 0x3b8   : > { %v843_v19 = vmul.f32 1.442695, %v842_v18 }
 0x3b9   : > { %v849_v20 = vpop.permute.xlu0 %848 }
 0x3ba   : > { %2309 = vpow2.f32 %v843_v19  ;;  %2004 = vmatpush3.msra.mxu0 %v849_v20 }
 0x3bb   : > { %2008 = vmatprep.subr.mxu0 %v2791_v1 }
 0x3bd   : > { %v1014_v24 = vpop.permute.xlu0 %1013 }
 0x3c1   : > { %v1094_v33 = vpop.permute.xlu0 %1093 }
 0x3c4   : > { %v2310_v22 = vpop.eup %2309 }
 0x3c5   : > { %2006 = vmatmul.mubr.msk.f32.vlgmr.msra.gmra.mrb[6].mxu0 %vm762_vm3, %v2310_v22  ;;  %v1092_v34 = vpop.permute.xlu0 %1091  ;;  %v845_v47 = vsel %vm762_vm3, %v2310_v22, 0.0 }
 0x3c6   : > { %2009 = vmatpush3.xpose.msk.msra.mxu0 %vm762_vm3, %v929_v21  ;;  %2010 = vmatprep.mubr.msk.f32.mxu0 %vm2790_vm0, %v2791_v1 }
 0x3c7   : > { %2013 = vmatprep.subr.mxu0 %v2791_v1 }
 0x3c9   : > { %2011 = vmatmul.mubr.msk.f32.vlgmr.msra.gmra.mrb[8].mxu0 %vm762_vm3, %v927_v23  ;;  %v1259_v36 = vpop.permute.xlu0 %1258 }
 0x3ca   : > { %2014 = vmatpush3.msra.mxu0 %v1014_v24  ;;  %2015 = vmatprep.mubr.msk.f32.mxu0 %vm2790_vm0, %v2791_v1 }
 0x3cb   : > { %2018 = vmatprep.subr.mxu0 %v2791_v1 }
 0x3cd   : > { %v1257_v37 = vpop.permute.xlu0 %1256 }
 0x498   : > { %v3313_v25 = vpop.f32.mrb[6].mxu0 }
 0x499   : > { %v2007_v26 = vpop.f32.mrb[7].mxu0 }
 0x49c   : > { %v1000_v27 = vpop.f32.mrb[8].mxu0 }
 0x49d   : > { %v2012_v28 = vpop.f32.mrb[9].mxu0  ;;  %v1004_v29 = vsel %vm762_vm3, %v1000_v27, -inf }
 0x49e   : > { %1005 = vmax.xlane.f32.xlu1 %v1004_v29 }
 0x52b   : > { %v1006_v30 = vpop.xlane.xlu1 %1005 }
 0x52c   : > { %v1007_v31 = vsub.f32 %v1000_v27, %v1006_v30  ;;  %v1473_v30 = vld [vmem:[#allocation14] sm:$0xff] }
 0x52e   : > { %v1008_v32 = vmul.f32 1.442695, %v1007_v31  ;;  %v1474_v31 = vld [vmem:[#allocation14 + $0x8] sm:$0xff] }
 0x530   : > { %2311 = vpow2.f32 %v1008_v32  ;;  %v2091_v32 = vpack.c.bf16 %v1474_v31, %v1473_v30 }
 0x53a   : > { %v2312_v35 = vpop.eup %2311 }
 0x53b   : > { %2016 = vmatmul.mubr.msk.f32.vlgmr.msra.gmra.mrb[10].mxu0 %vm762_vm3, %v2312_v35  ;;  %v1010_v46 = vsel %vm762_vm3, %v2312_v35, 0.0 }
 0x53c   : > { %2019 = vmatpush3.xpose.msk.msra.mxu0 %vm762_vm3, %v1094_v33  ;;  %2020 = vmatprep.mubr.msk.f32.mxu0 %vm2790_vm0, %v2791_v1  ;;  %v1475_v33 = vld [vmem:[#allocation14 + $0x10] sm:$0xff] }
 0x53d   : > { %2028 = vmatprep.subr.mxu0 %v2791_v1 }
 0x53f   : > { %2021 = vmatmul.mubr.msk.f32.vlgmr.msra.gmra.mrb[12].mxu0 %vm762_vm3, %v1092_v34  ;;  %v1476_v34 = vld [vmem:[#allocation14 + $0x18] sm:$0xff] }
 0x540   : > { %2029 = vmatpush3.xpose.msk.msra.mxu0 %vm762_vm3, %v1259_v36  ;;  %2030 = vmatprep.mubr.msk.f32.mxu0 %vm2790_vm0, %v2791_v1  ;;  %v2094_v35 = vpack.c.bf16 %v1476_v34, %v1475_v33  ;;  %v1558_v36 = vld [vmem:[#allocation17] sm:$0xff] }
 0x541   : > { %2090 = vmatprep.subr.bf16.mxu0 %v2789_v0 }
 0x543   : > { %2031 = vmatmul.mubr.msk.f32.vlgmr.msra.gmra.mrb[14].mxu0 %vm762_vm3, %v1257_v37  ;;  %v1559_v37 = vld [vmem:[#allocation17 + $0x8] sm:$0xff] }
 0x544   : > { %2046 = vmatprep.mubr.msk.f32.mxu0 %vm2790_vm0, %v2791_v1  ;;  %2092 = vmatpush3.bf16.msra.mxu0 %v2091_v32 }
 0x545   : > { %2093 = vmatprep.subr.bf16.mxu0 %v2789_v0 }
 0x548   : > { %2095 = vmatpush3.bf16.msra.mxu0 %v2094_v35 }
 0x60e   : > { %v1085_v38 = vpop.f32.mrb[10].mxu0 }
 0x60f   : > { %v2017_v39 = vpop.f32.mrb[11].mxu0 }
 0x610   : > { %v2097_v39 = vpack.c.bf16 %v1559_v37, %v1558_v36 }
 0x612   : > { %v1165_v40 = vpop.f32.mrb[12].mxu0 }
 0x613   : > { %v2022_v41 = vpop.f32.mrb[13].mxu0  ;;  %v1169_v42 = vsel %vm762_vm3, %v1165_v40, -inf }
 0x614   : > { %1170 = vmax.xlane.f32.xlu1 %v1169_v42  ;;  %v1562_v42 = vld [vmem:[#allocation17 + $0x20] sm:$0xff] }
 0x616   : > { %v1330_v43 = vpop.f32.mrb[14].mxu0 }
 0x617   : > { %v2032_v44 = vpop.f32.mrb[15].mxu0  ;;  %v1334_v45 = vsel %vm762_vm3, %v1330_v43, -inf }
 0x618   : > { %1335 = vmax.xlane.f32.xlu0 %v1334_v45  ;;  %v1564_v45 = vld [vmem:[#allocation17 + $0x30] sm:$0xff] }
 0x625   : > { %1178 = vrot.lane.b32.xlu1 %v3284_v13, %s2797_s24  ;;  %s3480_s24 = sld [smem:[#allocation40_spill]] }
 0x629   : > { %1343 = vrot.lane.b32.xlu1 %v3284_v13, %s2798_s17 }
 0x62b   : > { %s3481_s17 = smov %s3480_s24 }
 0x64d   : > { %1011 = vadd.xlane.f32.xlu1 %v1010_v46  ;;  %v1565_v46 = vld [vmem:[#allocation17 + $0x38] sm:$0xff] }
 0x651   : > { %846 = vadd.xlane.f32.xlu1 %v845_v47  ;;  %v2106_v47 = vpack.c.bf16 %v1565_v46, %v1564_v45 }
 0x6a1   : > { %v1171_v48 = vpop.xlane.xlu1 %1170 }
 0x6a2   : > { %v1172_v49 = vsub.f32 %v1165_v40, %v1171_v48  ;;  %v1561_v40 = vld [vmem:[#allocation17 + $0x18] sm:$0xff]  ;;  %v1566_v48 = vld [vmem:[#allocation17 + $0x40] sm:$0xff] }
 0x6a4   : > { %v1173_v50 = vmul.f32 1.442695, %v1172_v49  ;;  %v1567_v49 = vld [vmem:[#allocation17 + $0x48] sm:$0xff] }
 0x6a5   : > { %v1179_v51 = vpop.permute.xlu1 %1178  ;;  %v1336_v52 = vpop.xlane.xlu0 %1335 }
 0x6a6   : > { %2313 = vpow2.f32 %v1173_v50  ;;  %v1337_v53 = vsub.f32 %v1330_v43, %v1336_v52  ;;  %2024 = vmatpush3.msra.mxu1 %v1179_v51  ;;  %v1563_v43 = vld [vmem:[#allocation17 + $0x28] sm:$0xff]  ;;  %v2109_v50 = vpack.c.bf16 %v1567_v49, %v1566_v48  ;;  %v1568_v51 = vld [vmem:[#allocation17 + $0x50] sm:$0xff]  ;;  %v1569_v52 = vld [vmem:[#allocation17 + $0x58] sm:$0xff] }
 0x6a7   : > { %2033 = vmatprep.subr.mxu1 %v2791_v1  ;;  %v2103_v44 = vpack.c.bf16 %v1563_v43, %v1562_v42 }
 0x6a8   : > { %v1338_v54 = vmul.f32 1.442695, %v1337_v53  ;;  %v2112_v53 = vpack.c.bf16 %v1569_v52, %v1568_v51 }
 0x6a9   : > { %v1344_v56 = vpop.permute.xlu1 %1343 }
 0x6aa   : > { %2315 = vpow2.f32 %v1338_v54  ;;  %v1570_v54 = vld [vmem:[#allocation17 + $0x60] sm:$0xff] }
 0x6b0   : > { %v2314_v55 = vpop.eup %2313 }
 0x6b1   : > { %2026 = vmatmul.mubr.msk.f32.vlgmr.msra.gmra.mrb[0].mxu1 %vm762_vm3, %v2314_v55  ;;  %v1175_v57 = vsel %vm762_vm3, %v2314_v55, 0.0  ;;  %v1571_v55 = vld [vmem:[#allocation17 + $0x68] sm:$0xff] }
 0x6b2   : > { %2034 = vmatpush3.msra.mxu1 %v1344_v56  ;;  %1176 = vadd.xlane.f32.xlu0 %v1175_v57  ;;  %v2115_v56 = vpack.c.bf16 %v1571_v55, %v1570_v54 }
 0x6b3   : > { %2035 = vmatprep.mubr.msk.f32.mxu1 %vm2790_vm0, %v2791_v1  ;;  %2096 = vmatprep.subr.bf16.mxu1 %v2789_v0 }
 0x6b4   : > { %v2316_v58 = vpop.eup %2315 }
 0x6b5   : > { %2036 = vmatmul.mubr.msk.f32.vlgmr.msra.gmra.mrb[2].mxu1 %vm762_vm3, %v2316_v58  ;;  %v1340_v59 = vsel %vm762_vm3, %v2316_v58, 0.0 }
 0x6b6   : > { %1341 = vadd.xlane.f32.xlu0 %v1340_v59  ;;  %2081 = vmatprep.mubr.msk.f32.mxu1 %vm2790_vm0, %v2791_v1 }
 0x6b7   : > { %2098 = vmatpush3.bf16.msra.mxu1 %v2097_v39 }
 0x6b8   : > { %2099 = vmatprep.subr.bf16.mxu1 %v2789_v0 }
 0x6cc   : > { %757 = vrot.lane.b32.xlu0 %v1916_v60, %s2799_s12  ;;  %s3369_s12 = scalar_lea.hbm %s3480_s24, %s1937_s20 }
 0x6da   : > { %v1012_v61 = vpop.xlane.xlu1 %1011 }
 0x6db   : > { %2317 = vrcp.f32 %v1012_v61  ;;  %v1929_v61 = vld [vmem:[#allocation11] ss:$0 sm:$0xff] }
 0x6de   : > { %v847_v14 = vpop.xlane.xlu1 %846 }
 0x6e5   : > { %v2318_v62 = vpop.eup %2317 }
 0x6e6   : > { %v1090_v63 = vmul.f32 %v2318_v62, %v1085_v38  ;;  %v1560_v38 = vld [vmem:[#allocation17 + $0x10] sm:$0xff] }
 0x6e7   : > { %v2100_v41 = vpack.c.bf16 %v1561_v40, %v1560_v38 }
 0x6e8   : > { %1422 = vrot.lane.b32.xlu0 %v1090_v63, %s2800_s3  ;;  %v1930_v63 = vld [vmem:[#allocation12] ss:$0 sm:$0xff]  ;;  %s1683_s3 = scalar_lea.sflag [#allocation5], %s3234_s16 }
 0x6e9   : > { %2101 = vmatpush3.bf16.msra.mxu1 %v2100_v41 }
 0x6ea   : > { %2102 = vmatprep.subr.bf16.mxu1 %v2789_v0 }
 0x6ed   : > { %2104 = vmatpush3.bf16.msra.mxu1 %v2103_v44 }
 0x6ee   : > { %2105 = vmatprep.subr.bf16.mxu1 %v2789_v0 }
 0x6f1   : > { %2107 = vmatpush3.bf16.msra.mxu1 %v2106_v47 }
 0x6f2   : > { %2108 = vmatprep.subr.bf16.mxu1 %v2789_v0 }
 0x6f5   : > { %2110 = vmatpush3.bf16.msra.mxu1 %v2109_v50 }
 0x6f6   : > { %2111 = vmatprep.subr.bf16.mxu1 %v2789_v0 }
 0x6f9   : > { %2113 = vmatpush3.bf16.msra.mxu1 %v2112_v53 }
 0x6fa   : > { %2114 = vmatprep.subr.bf16.mxu1 %v2789_v0 }
 0x6fd   : > { %2116 = vmatpush3.bf16.msra.mxu1 %v2115_v56 }
 0x6fe   : > { %2117 = vmatprep.subr.bf16.mxu1 %v2789_v0 }
 0x73f   : > { %v1177_v2 = vpop.xlane.xlu0 %1176 }
 0x740   : > { %2319 = vrcp.f32 %v1177_v2 }
 0x743   : > { %v1342_v3 = vpop.xlane.xlu0 %1341 }
 0x744   : > { %2321 = vrcp.f32 %v1342_v3 }
 0x745   : > { %2323 = vrcp.f32 %v847_v14 }
 0x747   : > { %v758_v12 = vpop.permute.xlu0 %757 }
 0x748   : > { %v760_v13 = vadd.f32 %v758_v12, %v3282_v11 }
 0x74a   : > { %v2320_v4 = vpop.eup %2319 }
 0x74e   : > { %v2322_v1 = vpop.eup %2321 }
 0x74f   : > { %v2324_v16 = vpop.eup %2323 }
 0x750   : > { %v925_v17 = vmul.f32 %v2324_v16, %v3313_v25 }
 0x75a   : > { %v1423_v15 = vpop.permute.xlu0 %1422 }
 0x75b   : > { %v1433_v20 = vsel %vm762_vm3, %v925_v17, %v1423_v15 }
 0x784   : > { %v1250_v5 = vpop.f32.mrb[0].mxu1 }
 0x785   : > { %v1255_v6 = vmul.f32 %v2320_v4, %v1250_v5  ;;  %v2027_v7 = vpop.f32.mrb[1].mxu1  ;;  %v1572_v4 = vld [vmem:[#allocation17 + $0x70] sm:$0xff]  ;;  %v1573_v5 = vld [vmem:[#allocation17 + $0x78] sm:$0xff] }
 0x786   : > { %v1931_v7 = vld [vmem:[#allocation15] ss:$0 sm:$0xff] }
 0x787   : > { %1426 = vrot.lane.b32.xlu1 %v1255_v6, %s2801_s1  ;;  %v2118_v6 = vpack.c.bf16 %v1573_v5, %v1572_v4 }
 0x788   : > { %v1415_v8 = vpop.f32.mrb[2].mxu1 }
 0x789   : > { %v1420_v9 = vmul.f32 %v2322_v1, %v1415_v8  ;;  %v2037_v10 = vpop.f32.mrb[3].mxu1  ;;  %2119 = vmatpush3.bf16.msra.mxu1 %v2118_v6 }
 0x78a   : > { %v1933_v10 = vld [vmem:[#allocation18] ss:$0 sm:$0xff] }
 0x78b   : > { %1430 = vrot.lane.b32.xlu0 %v1420_v9, %s2802_s29 }
 0x78f   : > { %1438 = vrot.lane.b32.xlu0 %v760_v13, %s2793_s13  ;;  %s588_s13 = scalar_lea.vmem [#allocation23], %s1901_s0  ;;  %s2803_s0 = smov [#allocation23]  }
 0x790   : > { %s1697_s14 = sshll.u32 %s588_s13, 4  ;;  %s2671_s29 = sshll.u32 %s2803_s0, 4  ;;  %s3371_s14 = int_to_ptr.vmem [resolvable:$true] %s1697_s14  ;;  %s2672_s29 = int_to_ptr.vmem [resolvable:$false] %s2671_s29 }
 0x791   : > { %s2667_s1 = scalar_lea.vmem %s3371_s14, 128  ;;  %s2673_s21 = scalar_lea.vmem %s2672_s29, 256 }
 0x792   : > { %p2668_p6 = scmp.ne.s32.totalorder %s3371_s14, %s2667_s1  ;;  %p2674_p2 = scmp.lt.s32.totalorder %s3371_s14, %s2672_s29 }
 0x793   : > { %p2675_p4 = scmp.lt.s32.totalorder %s2673_s21, %s2667_s1 }
 0x794   : > { %p2669_p10 = pnand %p2668_p6, %p3482_p5 }
 0x795   : > { %p2676_p9 = por %p2675_p4, %p2674_p2 }
 0x796   : > { %p2670_p1 = pneg %p2669_p10 }
 0x798   : > { %p2677_p8 = pnand %p2676_p9, %p2670_p1 }
 0x7f9   : > { %v1427_v18 = vpop.permute.xlu1 %1426 }
 0x7fa   : > { %v1434_v21 = vsel %vm596_vm1, %v1433_v20, %v1427_v18 }
 0x7fd   : > { %v1431_v19 = vpop.permute.xlu0 %1430 }
 0x7fe   : > { %v1436_v22 = vsel %vm1435_vm4, %v1434_v21, %v1431_v19 }
 0x801   : > { %v1439_v23 = vpop.permute.xlu0 %1438 }
 0x802   : > { %v1441_v24 = vadd.f32 %v1439_v23, %v1436_v22 }
 0x804   : > { %v1445_v11 = vsel %vm1444_vm5, %v1441_v24, 0.0 }
 0x805   : > { %1446 = vadd.xlane.f32.xlu0 %v1445_v11 }
 0x892   : > { %v1447_v26 = vpop.xlane.xlu0 %1446 }
 0x893   : > { %v1449_v27 = vmul.f32 0.03125, %v1447_v26  ;;  %v1934_v26 = vld [vmem:[#allocation20] ss:$0 sm:$0xff] }
 0x895   : > { %v1450_v28 = vsub.f32 %v1441_v24, %v1449_v27 }
 0x897   : > { %v1451_v29 = vmul.f32 %v1450_v28, %v1450_v28 }
 0x899   : > { %v1452_v25 = vsel %vm1444_vm5, %v1451_v29, 0.0 }
 0x89a   : > { %1453 = vadd.xlane.f32.xlu1 %v1452_v25 }
 0x927   : > { %v1454_v57 = vpop.xlane.xlu1 %1453 }
 0x928   : > { %v1455_v58 = vmul.f32 0.03125, %v1454_v57 }
 0x92a   : > { %v1456_v59 = vadd.f32 1e-05, %v1455_v58 }
 0x92c   : > { %2325 = vrsqrt.f32 %v1456_v59 }
 0x936   : > { %v2326_v60 = vpop.eup %2325 }
 0x937   : > { %v1458_v62 = vmul.f32 %v2326_v60, %v1450_v28  ;;  %v1935_v28 = vld [vmem:[#allocation21] ss:$0 sm:$0xff] }
 0x939   : > { %v1465_v2 = vmul.f32 %v1929_v61, %v1458_v62 }
 0x93b   : > { %v1472_v3 = vadd.f32 %v1930_v63, %v1465_v2 }
 0x93d   : > { %2047 = vmatmul.mubr.msk.f32.vlgmr.msra.gmra.mrb[16].mxu0 %vm1444_vm5, %v1472_v3 }
 0xa10   : > { %v1553_v1 = vpop.f32.mrb[16].mxu0 }
 0xa11   : > { %v1554_v8 = vadd.f32 %v1931_v7, %v1553_v1  ;;  %v2048_v0 = vpop.f32.mrb[17].mxu0 }
 0xa13   : > { %v1557_v9 = vmax.f32 %v1554_v8, 0.0 }
 0xa15   : > { %2082 = vmatmul.mubr.f32.vlgmr.msra.gmra.mrb[4].mxu1 %v1557_v9 }
 0xae8   : > { %v1647_v12 = vpop.f32.mrb[4].mxu1 }
 0xae9   : > { %v1648_v13 = vadd.f32 %v1933_v10, %v1647_v12  ;;  %v2083_v14 = vpop.f32.mrb[5].mxu1 }
 0xaeb   : > { %v1651_v15 = vadd.f32 %v1648_v13, %v1472_v3 }
 0xaed   : > { %v1654_v16 = vsel %vm1444_vm5, %v1651_v15, 0.0 }
 0xaee   : > { %1655 = vadd.xlane.f32.xlu0 %v1654_v16 }
 0xb7b   : > { %v1656_v17 = vpop.xlane.xlu0 %1655 }
 0xb7c   : > { %v1657_v18 = vmul.f32 0.03125, %v1656_v17 }
 0xb7e   : > { %v1658_v19 = vsub.f32 %v1651_v15, %v1657_v18 }
 0xb80   : > { %v1659_v20 = vmul.f32 %v1658_v19, %v1658_v19 }
 0xb82   : > { %v1660_v21 = vsel %vm1444_vm5, %v1659_v20, 0.0 }
 0xb83   : > { %1661 = vadd.xlane.f32.xlu0 %v1660_v21 }
 0xc10   : > { %v1662_v22 = vpop.xlane.xlu0 %1661 }
 0xc11   : > { %v1663_v23 = vmul.f32 0.03125, %v1662_v22 }
 0xc13   : > { %v1664_v24 = vadd.f32 1e-05, %v1663_v23 }
 0xc15   : > { %2327 = vrsqrt.f32 %v1664_v24 }
 0xc1f   : > { %v2328_v11 = vpop.eup %2327 }
 0xc20   : > { %v1666_v27 = vmul.f32 %v2328_v11, %v1658_v19 }
 0xc22   : > { %v1673_v29 = vmul.f32 %v1934_v26, %v1666_v27 }
 0xc24   : > { %v1680_v25 = vadd.f32 %v1935_v28, %v1673_v29 }
 0xc26   : > { %1681 = vst.msk [vmem:[%s588_s13] sm:$0xff] %vm1444_vm5, %v1680_v25 }
 0xc27   : > { %2680 = shalt.err (!%p2677_p8)
}
 0xc28   : > { %s2681_s16 = scalar_lea.hbm %s3369_s12, 128  ;;  %s2685_s18 = scalar_lea.hbm %s3481_s17, 256 }
 0xc29   : > { %p2682_p3 = scmp.ne.s32.totalorder %s3369_s12, %s2681_s16  ;;  %p2686_p0 = scmp.lt.u32.totalorder %s3369_s12, %s3481_s17 }
 0xc2a   : > { %p2687_p11 = scmp.lt.u32.totalorder %s2685_s18, %s2681_s16  ;;  %p2689_p6 = scmp.lt.u32.totalorder %s2681_s16, %s3369_s12 }
 0xc2b   : > { %p2683_p12 = pnand %p2682_p3, %p3482_p5 }
 0xc2c   : > { %p2688_p7 = por %p2687_p11, %p2686_p0 }
 0xc2d   : > { %p2684_p13 = pneg %p2683_p12 }
 0xc2e   : > { %p2690_p10 = por %p2689_p6, %p2688_p7 }
 0xc30   : > { %p2691_p1 = pnand %p2690_p10, %p2684_p13 }
 0xc32   : > { %2694 = shalt.err (!%p2691_p1)
}
 0xc33   : > { %2166 = dma.vmem_to_hbm [thread:$0]  (%p3482_p5), %s3371_s14, 128, %s3369_s12, %s1683_s3  }
 0xc34 PF: > { %s3483_s1 = sld [smem:[#allocation32_spill]]  ;;  %p3484_p2 = scmp.ne.s32.totalorder %s3471_s27, 0 }
 0xc35   : > { %p3485_p4 = scmp.ge.s32.totalorder %s2773_s26, 2 }
 0xc37   : > { %p2207_p9 = pnand %p3485_p4, %p3484_p2 }
 0xc3a   : > { %s1709_s0 = sand.u32 1, %s3483_s1  }
 0xc3b   : > { %s1710_s29 = scalar_lea.sflag [#allocation5], %s1709_s0 }
 0xc3c   : > { %2748 = dma.done.wait (!%p2207_p9), %s1710_s29, 128  }
 0xc3d   : > { %2750 = vsyncadd (!%p2207_p9), %s1710_s29, 4294967168  ;;  %s34_s26 = sadd.s32 1, %s2773_s26   ;;  %s3486_s21 = smov %s2757_s22 }
 0xc3e   : > { %p31_p8 = scmp.ge.s32.totalorder %s34_s26, 4   ;;  %s3487_s22 = smov %s2761_s23 }
 0xc3f   : > { %s3488_s23 = smov %s3185_s15  ;;  %s3489_s24 = smov %s2769_s25 }
 0xc40   : > { %s3490_s25 = smov %s3492_s19  ;;  %33 = sbr.rel (!%p31_p8) target bundleno = 18 (0x12), region = 162 }
 0xc47   :  { %1715 = vsyncpa [#allocation4], 1 }
 0xc48   :  { %1717 = vsyncpa [#allocation4 + $0x1], 1 }
 0xc49   :  { %1718 = vsyncpa [#allocation7], 1 }
 0xc4a   :  { %1719 = vsyncpa [#allocation10], 1 }
 0xc4b   :  { %1720 = vsyncpa [#allocation13], 1 }
 0xc4c   :  { %1721 = vsyncpa [#allocation16], 1 }
 0xc4d   :  { %1722 = vsyncpa [#allocation19], 1 }
 0xc4e   :  { %1723 = vsyncpa [#allocation22], 1 }
 0xc4f   :  { %1724 = vsyncpa [#allocation5], 1 }
 0xc50   :  { %1726 = vsyncpa [#allocation5 + $0x1], 1 }

// kernel: tpu_custom_call.1
= control target key start
LH: loop header
LB: loop body
LE: loop exit
PB: predicated region body
PF: predicated region fallthrough
CT: control target
= control target key end

     0   :  { %s3419_s0 = inlined_call_operand.hbm [shape: f32[2,8,16], index: 0, kind: input, shape index: {}]   ;;  %s3420_s1 = inlined_call_operand.hbm [shape: f32[16,64], index: 1, kind: input, shape index: {}]   ;;  %s3421_s2 = inlined_call_operand.hbm [shape: f32[16,64], index: 2, kind: input, shape index: {}]   ;;  %s3422_s3 = inlined_call_operand.hbm [shape: f32[1,32], index: 3, kind: input, shape index: {}]   ;;  %s3423_s4 = inlined_call_operand.hbm [shape: f32[1,32], index: 4, kind: input, shape index: {}]   ;;  %s3424_s5 = inlined_call_operand.hbm [shape: f32[1,32], index: 5, kind: input, shape index: {}]   ;;  %s3425_s6 = inlined_call_operand.hbm [shape: f32[32,128], index: 6, kind: input, shape index: {}]   ;;  %s3426_s7 = inlined_call_operand.hbm [shape: f32[1,128], index: 7, kind: input, shape index: {}]   ;;  %s3427_s8 = inlined_call_operand.hbm [shape: f32[128,32], index: 8, kind: input, shape index: {}]   ;;  %s3428_s9 = inlined_call_operand.hbm [shape: f32[1,32], index: 9, kind: input, shape index: {}]   ;;  %s3429_s10 = inlined_call_operand.hbm [shape: f32[1,32], index: 10, kind: input, shape index: {}]   ;;  %s3430_s11 = inlined_call_operand.hbm [shape: f32[1,32], index: 11, kind: input, shape index: {}]   ;;  %s3431_s12 = inlined_call_operand.hbm [shape: f32[2,8,32], index: 12, kind: output, shape index: {}]  }
   0x1   :  { %3446 = sst [smem:[#allocation36_spill]] %s3419_s0 }
   0x2   :  { %3447 = sst [smem:[#allocation37_spill]] %s3420_s1 }
   0x3   :  { %3448 = sst [smem:[#allocation38_spill]] %s3421_s2 }
   0x4   :  { %3449 = sst [smem:[#allocation39_spill]] %s3422_s3 }
   0x5   :  { %3450 = sst [smem:[#allocation40_spill]] %s3431_s12 }
   0x6   :  { %17 = vsyncpa [#allocation4], 0 }
   0x7   :  { %19 = vsyncpa [#allocation4 + $0x1], 0 }
   0x8   :  { %20 = vsyncpa [#allocation7], 0 }
   0x9   :  { %21 = vsyncpa [#allocation10], 0 }
   0xa   :  { %22 = vsyncpa [#allocation13], 0 }
   0xb   :  { %23 = vsyncpa [#allocation16], 0 }
   0xc   :  { %24 = vsyncpa [#allocation19], 0 }
   0xd   :  { %25 = vsyncpa [#allocation22], 0 }
   0xe   :  { %26 = vsyncpa [#allocation5], 0 }
   0xf   :  { %28 = vsyncpa [#allocation5 + $0x1], 0  ;;  %s2869_s21 = smov 0   ;;  %s2871_s22 = smov 0  }
  0x10   :  { %s2873_s23 = smov 0   ;;  %s2875_s24 = smov 0  }
  0x11   :  { %s2877_s25 = smov 0   ;;  %s2879_s26 = smov 0  }
  0x12 LB: > { %3451 = sst [smem:[#allocation32_spill]] %s2753_s21  ;;  %s3432_s27 = sadd.s32 4294967295, %s2773_s26   ;;  %s2773_s26 = sphi %s2879_s26, %s34_s26   ;;  %s2769_s25 = sphi %s2877_s25, %s3490_s25   ;;  %s2765_s24 = sphi %s2875_s24, %s3489_s24   ;;  %s2761_s23 = sphi %s2873_s23, %s3488_s23   ;;  %s2757_s22 = sphi %s2871_s22, %s3487_s22   ;;  %s2753_s21 = sphi %s2869_s21, %s3486_s21  }
  0x13   : > { %3452 = sst [smem:[#allocation33_spill]] %s2765_s24  ;;  %p1885_p0 = scmp.ge.s32.totalorder %s2773_s26, 1 }
  0x14   : > { %p2903_p1 = scmp.eq.s32.totalorder %s3432_s27, 0  ;;  %p336_p2 = scmp.lt.s32.totalorder %s2773_s26, 3 }
  0x15   : > { %s2775_s30 = smov [#allocation6]   ;;  %s2776_s15 = smov [#allocation9]  }
  0x16   : > { %s3453_s28 = scalar_select %p2903_p1, 1, 0 }
  0x17   : > { %p2908_p3 = pnand %p1885_p0, %p336_p2  ;;  %s348_s13 = sshll.u32 %s2775_s30, 4  ;;  %s2912_s13 = int_to_ptr.vmem [resolvable:$true] %s348_s13 }
  0x18   : > { %3454 = sst [smem:[#allocation34_spill]] %s3453_s28  ;;  %s375_s16 = sshll.u32 %s2776_s15, 4  ;;  %s2923_s16 = int_to_ptr.vmem [resolvable:$true] %s375_s16 }
  0x19   : > { %s3455_s29 = scalar_select %p2908_p3, 1, 0 }
  0x1a   : > { %p2168_p4 = pneg %p2908_p3  ;;  %s2777_s17 = smov [#allocation12]  }
  0x1b   : > { %3456 = sst [smem:[#allocation35_spill]] %s3455_s29  ;;  %s2925_s18 = sshll.u32 %s2777_s17, 4  ;;  %s398_s18 = int_to_ptr.vmem [resolvable:$true] %s2925_s18 }
  0x1c   : > { %p2919_p6 = pnand %p2168_p4, %p2903_p1  ;;  %s3458_s1 = sld [smem:[#allocation37_spill]] }
  0x1e   : > { %p2935_p8 = pneg %p2919_p6 }
  0x22   : > { %s2329_s30 = scalar_lea.hbm %s3458_s1, 256 }
  0x23   : > { %p2330_p7 = scmp.ne.s32.totalorder %s3458_s1, %s2329_s30  ;;  %p2336_p11 = scmp.lt.u32.totalorder %s2329_s30, %s3458_s1 }
  0x25   : > { %p2332_p9 = pnand %p2935_p8, %p2330_p7 }
  0x27   : > { %p2333_p10 = pneg %p2332_p9 }
  0x29   : > { %p2338_p12 = pnand %p2336_p11, %p2333_p10 }
  0x2b   : > { %2341 = shalt.err (!%p2338_p12)
}
  0x2c   : > { %s2342_s12 = scalar_lea.vmem %s2912_s13, 256  ;;  %p2350_p4 = scmp.lt.s32.totalorder %s2912_s13, %s2912_s13 }
  0x2d   : > { %p2343_p13 = scmp.ne.s32.totalorder %s2912_s13, %s2342_s12  ;;  %p2351_p5 = scmp.lt.s32.totalorder %s2342_s12, %s2342_s12 }
  0x2f   : > { %p2345_p0 = pnand %p2343_p13, %p2935_p8  ;;  %p2352_p7 = por %p2351_p5, %p2350_p4 }
  0x31   : > { %p2346_p2 = pneg %p2345_p0 }
  0x33   : > { %p2353_p9 = pnand %p2352_p7, %p2346_p2 }
  0x35   : > { %2356 = shalt.err (!%p2353_p9)
}
  0x36   : > { %s3441_s27 = smov 128   ;;  %s3443_s19 = smov 8  }
  0x37   : > { %2171 = dma.hbm_to_vmem [thread:$0]  (!%p2919_p6), %s3458_s1, 256, %s2912_s13, [#allocation7], %s3441_s27, %s3441_s27, %s3443_s19  }
  0x38   : > { %s3460_s3 = sld [smem:[#allocation39_spill]] }
  0x3e   : > { %s2357_s12 = scalar_lea.hbm %s3460_s3, 16 }
  0x3f   : > { %p2358_p5 = scmp.ne.s32.totalorder %s3460_s3, %s2357_s12  ;;  %p2364_p12 = scmp.lt.u32.totalorder %s2357_s12, %s3460_s3 }
  0x41   : > { %p2360_p10 = pnand %p2358_p5, %p2935_p8 }
  0x43   : > { %p2361_p11 = pneg %p2360_p10 }
  0x45   : > { %p2366_p13 = pnand %p2364_p12, %p2361_p11 }
  0x47   : > { %2369 = shalt.err (!%p2366_p13)
}
  0x48   : > { %s2370_s13 = scalar_lea.vmem %s2923_s16, 16  ;;  %s2377_s0 = scalar_lea.vmem %s2923_s16, 32 }
  0x49   : > { %p2371_p0 = scmp.ne.s32.totalorder %s2923_s16, %s2370_s13  ;;  %p2378_p7 = scmp.lt.s32.totalorder %s2923_s16, %s2923_s16 }
  0x4a   : > { %p2379_p9 = scmp.lt.s32.totalorder %s2377_s0, %s2370_s13 }
  0x4b   : > { %p2373_p2 = pnand %p2371_p0, %p2935_p8 }
  0x4c   : > { %p2380_p5 = por %p2379_p9, %p2378_p7 }
  0x4d   : > { %p2374_p4 = pneg %p2373_p2 }
  0x4f   : > { %p2381_p10 = pnand %p2380_p5, %p2374_p4 }
  0x51   : > { %2384 = shalt.err (!%p2381_p10)
}
  0x52   : > { %2177 = dma.hbm_to_vmem [thread:$0]  (!%p2919_p6), %s3460_s3, 16, %s2923_s16, [#allocation10]  }
  0x53   : > { %s2385_s30 = scalar_lea.hbm %s3424_s5, 16 }
  0x54   : > { %p2386_p11 = scmp.ne.s32.totalorder %s3424_s5, %s2385_s30  ;;  %p2392_p0 = scmp.lt.u32.totalorder %s2385_s30, %s3424_s5 }
  0x56   : > { %p2388_p12 = pnand %p2386_p11, %p2935_p8 }
  0x58   : > { %p2389_p13 = pneg %p2388_p12 }
  0x5a   : > { %p2394_p2 = pnand %p2392_p0, %p2389_p13 }
  0x5c   : > { %2397 = shalt.err (!%p2394_p2)
}
  0x5d   : > { %s2398_s0 = scalar_lea.vmem %s398_s18, 16  ;;  %s2405_s16 = scalar_lea.vmem %s398_s18, 32 }
  0x5e   : > { %p2399_p4 = scmp.ne.s32.totalorder %s398_s18, %s2398_s0  ;;  %p2406_p5 = scmp.lt.s32.totalorder %s398_s18, %s398_s18 }
  0x5f   : > { %p2407_p10 = scmp.lt.s32.totalorder %s2405_s16, %s2398_s0 }
  0x60   : > { %p2401_p7 = pnand %p2399_p4, %p2935_p8 }
  0x61   : > { %p2408_p3 = por %p2407_p10, %p2406_p5 }
  0x62   : > { %p2402_p9 = pneg %p2401_p7 }
  0x64   : > { %p2409_p1 = pnand %p2408_p3, %p2402_p9 }
  0x66   : > { %2412 = shalt.err (!%p2409_p1)
}
  0x67   : > { %2183 = dma.hbm_to_vmem [thread:$0]  (!%p2919_p6), %s3424_s5, 16, %s398_s18, [#allocation13]  }
  0x68   : > { %s2780_s29 = smov [#allocation15]   ;;  %s2781_s30 = smov [#allocation18]  }
  0x69   : > { %s421_s20 = sshll.u32 %s2780_s29, 4  ;;  %s445_s15 = sshll.u32 %s2781_s30, 4  ;;  %s422_s20 = int_to_ptr.vmem [resolvable:$true] %s421_s20  ;;  %s446_s15 = int_to_ptr.vmem [resolvable:$true] %s445_s15 }
  0x6a   : > { %s2413_s13 = scalar_lea.hbm %s3426_s7, 16 }
  0x6b   : > { %p2414_p1 = scmp.ne.s32.totalorder %s3426_s7, %s2413_s13  ;;  %p2420_p12 = scmp.lt.u32.totalorder %s2413_s13, %s3426_s7 }
  0x6d   : > { %p2416_p3 = pnand %p2414_p1, %p2935_p8 }
  0x6f   : > { %p2417_p11 = pneg %p2416_p3 }
  0x71   : > { %p2422_p13 = pnand %p2420_p12, %p2417_p11 }
  0x73   : > { %2425 = shalt.err (!%p2422_p13)
}
  0x74   : > { %s2426_s18 = scalar_lea.vmem %s422_s20, 16  ;;  %s2433_s28 = scalar_lea.vmem %s422_s20, 32 }
  0x75   : > { %p2427_p0 = scmp.ne.s32.totalorder %s422_s20, %s2426_s18  ;;  %p2434_p7 = scmp.lt.s32.totalorder %s422_s20, %s422_s20 }
  0x76   : > { %p2435_p9 = scmp.lt.s32.totalorder %s2433_s28, %s2426_s18 }
  0x77   : > { %p2429_p2 = pnand %p2427_p0, %p2935_p8 }
  0x78   : > { %p2436_p5 = por %p2435_p9, %p2434_p7 }
  0x79   : > { %p2430_p4 = pneg %p2429_p2 }
  0x7b   : > { %p2437_p10 = pnand %p2436_p5, %p2430_p4 }
  0x7d   : > { %2440 = shalt.err (!%p2437_p10)
}
  0x7e   : > { %2189 = dma.hbm_to_vmem [thread:$0]  (!%p2919_p6), %s3426_s7, 16, %s422_s20, [#allocation16]  }
  0x7f   : > { %s2441_s12 = scalar_lea.hbm %s3428_s9, 16 }
  0x80   : > { %p2442_p1 = scmp.ne.s32.totalorder %s3428_s9, %s2441_s12  ;;  %p2448_p12 = scmp.lt.u32.totalorder %s2441_s12, %s3428_s9 }
  0x82   : > { %p2444_p3 = pnand %p2442_p1, %p2935_p8 }
  0x84   : > { %p2445_p11 = pneg %p2444_p3 }
  0x86   : > { %p2450_p13 = pnand %p2448_p12, %p2445_p11 }
  0x88   : > { %2453 = shalt.err (!%p2450_p13)
}
  0x89   : > { %s2454_s18 = scalar_lea.vmem %s446_s15, 16  ;;  %s2461_s20 = scalar_lea.vmem %s446_s15, 32 }
  0x8a   : > { %p2455_p0 = scmp.ne.s32.totalorder %s446_s15, %s2454_s18  ;;  %p2462_p7 = scmp.lt.s32.totalorder %s446_s15, %s446_s15 }
  0x8b   : > { %p2463_p9 = scmp.lt.s32.totalorder %s2461_s20, %s2454_s18 }
  0x8c   : > { %p2457_p2 = pnand %p2455_p0, %p2935_p8 }
  0x8d   : > { %p2464_p5 = por %p2463_p9, %p2462_p7 }
  0x8e   : > { %p2458_p4 = pneg %p2457_p2 }
  0x90   : > { %p2465_p10 = pnand %p2464_p5, %p2458_p4 }
  0x92   : > { %2468 = shalt.err (!%p2465_p10)
}
  0x93   : > { %2195 = dma.hbm_to_vmem [thread:$0]  (!%p2919_p6), %s3428_s9, 16, %s446_s15, [#allocation19]  }
  0x94   : > { %s2782_s30 = smov [#allocation8]   ;;  %s2783_s17 = smov [#allocation11]  }
  0x95   : > { %s361_s27 = sshll.u32 %s2782_s30, 4  ;;  %s386_s12 = sshll.u32 %s2783_s17, 4  ;;  %s362_s27 = int_to_ptr.vmem [resolvable:$true] %s361_s27  ;;  %s387_s12 = int_to_ptr.vmem [resolvable:$true] %s386_s12 }
  0x96   : > { %s3461_s2 = sld [smem:[#allocation38_spill]] }
  0x9c   : > { %s2469_s16 = scalar_lea.hbm %s3461_s2, 256 }
  0x9d   : > { %p2470_p1 = scmp.ne.s32.totalorder %s3461_s2, %s2469_s16  ;;  %p2476_p12 = scmp.lt.u32.totalorder %s2469_s16, %s3461_s2 }
  0x9f   : > { %p2472_p3 = pnand %p2470_p1, %p2935_p8 }
  0xa1   : > { %p2473_p11 = pneg %p2472_p3 }
  0xa3   : > { %p2478_p13 = pnand %p2476_p12, %p2473_p11 }
  0xa5   : > { %2481 = shalt.err (!%p2478_p13)
}
  0xa6   : > { %s2482_s15 = scalar_lea.vmem %s362_s27, 256  ;;  %p2490_p7 = scmp.lt.s32.totalorder %s362_s27, %s362_s27 }
  0xa7   : > { %p2483_p0 = scmp.ne.s32.totalorder %s362_s27, %s2482_s15  ;;  %p2491_p9 = scmp.lt.s32.totalorder %s2482_s15, %s2482_s15 }
  0xa9   : > { %p2485_p2 = pnand %p2483_p0, %p2935_p8  ;;  %p2492_p5 = por %p2491_p9, %p2490_p7 }
  0xab   : > { %p2486_p4 = pneg %p2485_p2 }
  0xad   : > { %p2493_p10 = pnand %p2492_p5, %p2486_p4 }
  0xaf   : > { %2496 = shalt.err (!%p2493_p10)
}
  0xb0   : > { %s3462_s29 = smov 128   ;;  %s2497_s16 = scalar_lea.hbm %s3423_s4, 16 }
  0xb1   : > { %2174 = dma.hbm_to_vmem [thread:$0]  (!%p2919_p6), %s3461_s2, 256, %s362_s27, [#allocation7], %s3462_s29, %s3462_s29, %s3443_s19  }
  0xb2   : > { %p2498_p1 = scmp.ne.s32.totalorder %s3423_s4, %s2497_s16  ;;  %p2504_p12 = scmp.lt.u32.totalorder %s2497_s16, %s3423_s4 }
  0xb4   : > { %p2500_p3 = pnand %p2498_p1, %p2935_p8 }
  0xb6   : > { %p2501_p11 = pneg %p2500_p3 }
  0xb8   : > { %p2506_p13 = pnand %p2504_p12, %p2501_p11 }
  0xba   : > { %2509 = shalt.err (!%p2506_p13)
}
  0xbb   : > { %s2510_s15 = scalar_lea.vmem %s387_s12, 16  ;;  %s2517_s27 = scalar_lea.vmem %s387_s12, 32 }
  0xbc   : > { %p2511_p0 = scmp.ne.s32.totalorder %s387_s12, %s2510_s15  ;;  %p2518_p7 = scmp.lt.s32.totalorder %s387_s12, %s387_s12 }
  0xbd   : > { %p2519_p9 = scmp.lt.s32.totalorder %s2517_s27, %s2510_s15 }
  0xbe   : > { %p2513_p2 = pnand %p2511_p0, %p2935_p8 }
  0xbf   : > { %p2520_p5 = por %p2519_p9, %p2518_p7 }
  0xc0   : > { %p2514_p4 = pneg %p2513_p2 }
  0xc2   : > { %p2521_p10 = pnand %p2520_p5, %p2514_p4 }
  0xc4   : > { %2524 = shalt.err (!%p2521_p10)
}
  0xc5   : > { %2180 = dma.hbm_to_vmem [thread:$0]  (!%p2919_p6), %s3423_s4, 16, %s387_s12, [#allocation10]  }
  0xc6   : > { %s2784_s13 = smov [#allocation14]   ;;  %s2785_s16 = smov [#allocation17]  }
  0xc7   : > { %s407_s0 = sshll.u32 %s2784_s13, 4  ;;  %s431_s21 = sshll.u32 %s2785_s16, 4  ;;  %s408_s0 = int_to_ptr.vmem [resolvable:$true] %s407_s0  ;;  %s432_s21 = int_to_ptr.vmem [resolvable:$true] %s431_s21 }
  0xc8   : > { %s2525_s28 = scalar_lea.hbm %s3425_s6, 512 }
  0xc9   : > { %p2526_p1 = scmp.ne.s32.totalorder %s3425_s6, %s2525_s28  ;;  %p2532_p12 = scmp.lt.u32.totalorder %s2525_s28, %s3425_s6 }
  0xcb   : > { %p2528_p3 = pnand %p2526_p1, %p2935_p8 }
  0xcd   : > { %p2529_p11 = pneg %p2528_p3 }
  0xcf   : > { %p2534_p13 = pnand %p2532_p12, %p2529_p11 }
  0xd1   : > { %2537 = shalt.err (!%p2534_p13)
}
  0xd2   : > { %s2538_s12 = scalar_lea.vmem %s408_s0, 512  ;;  %p2546_p7 = scmp.lt.s32.totalorder %s408_s0, %s408_s0 }
  0xd3   : > { %p2539_p0 = scmp.ne.s32.totalorder %s408_s0, %s2538_s12  ;;  %p2547_p9 = scmp.lt.s32.totalorder %s2538_s12, %s2538_s12 }
  0xd5   : > { %p2541_p2 = pnand %p2539_p0, %p2935_p8  ;;  %p2548_p5 = por %p2547_p9, %p2546_p7 }
  0xd7   : > { %p2542_p4 = pneg %p2541_p2 }
  0xd9   : > { %p2549_p10 = pnand %p2548_p5, %p2542_p4 }
  0xdb   : > { %2552 = shalt.err (!%p2549_p10)
}
  0xdc   : > { %s3463_s17 = smov 8   ;;  %s2553_s20 = scalar_lea.hbm %s3427_s8, 2048 }
  0xdd   : > { %2186 = dma.hbm_to_vmem [thread:$0]  (!%p2919_p6), %s3425_s6, 512, %s408_s0, [#allocation13], %s3462_s29, %s3462_s29, %s3463_s17  }
  0xde   : > { %p2554_p1 = scmp.ne.s32.totalorder %s3427_s8, %s2553_s20  ;;  %p2560_p12 = scmp.lt.u32.totalorder %s2553_s20, %s3427_s8 }
  0xe0   : > { %p2556_p3 = pnand %p2554_p1, %p2935_p8 }
  0xe2   : > { %p2557_p11 = pneg %p2556_p3 }
  0xe4   : > { %p2562_p13 = pnand %p2560_p12, %p2557_p11 }
  0xe6   : > { %2565 = shalt.err (!%p2562_p13)
}
  0xe7   : > { %s2566_s12 = scalar_lea.vmem %s432_s21, 2048  ;;  %p2574_p7 = scmp.lt.s32.totalorder %s432_s21, %s432_s21 }
  0xe8   : > { %p2567_p0 = scmp.ne.s32.totalorder %s432_s21, %s2566_s12  ;;  %p2575_p9 = scmp.lt.s32.totalorder %s2566_s12, %s2566_s12 }
  0xea   : > { %p2569_p2 = pnand %p2567_p0, %p2935_p8  ;;  %p2576_p5 = por %p2575_p9, %p2574_p7 }
  0xec   : > { %p2570_p4 = pneg %p2569_p2 }
  0xee   : > { %p2577_p10 = pnand %p2576_p5, %p2570_p4 }
  0xf0   : > { %2580 = shalt.err (!%p2577_p10)
}
  0xf1   : > { %2192 = dma.hbm_to_vmem [thread:$0]  (!%p2919_p6), %s3427_s8, 2048, %s432_s21, [#allocation16], %s3462_s29, %s3462_s29, %s3463_s17  }
  0xf2   : > { %s2786_s13 = smov [#allocation20]   ;;  %s2787_s18 = smov [#allocation21]  }
  0xf3   : > { %s456_s16 = sshll.u32 %s2786_s13, 4  ;;  %s467_s20 = sshll.u32 %s2787_s18, 4  ;;  %s457_s16 = int_to_ptr.vmem [resolvable:$true] %s456_s16  ;;  %s468_s20 = int_to_ptr.vmem [resolvable:$true] %s467_s20 }
  0xf4   : > { %s2581_s27 = scalar_lea.hbm %s3429_s10, 16 }
  0xf5   : > { %p2582_p1 = scmp.ne.s32.totalorder %s3429_s10, %s2581_s27  ;;  %p2588_p12 = scmp.lt.u32.totalorder %s2581_s27, %s3429_s10 }
  0xf7   : > { %p2584_p3 = pnand %p2582_p1, %p2935_p8 }
  0xf9   : > { %p2585_p11 = pneg %p2584_p3 }
  0xfb   : > { %p2590_p13 = pnand %p2588_p12, %p2585_p11 }
  0xfd   : > { %2593 = shalt.err (!%p2590_p13)
}
  0xfe   : > { %s2594_s29 = scalar_lea.vmem %s457_s16, 16  ;;  %s2601_s21 = scalar_lea.vmem %s457_s16, 32 }
  0xff   : > { %p2595_p0 = scmp.ne.s32.totalorder %s457_s16, %s2594_s29  ;;  %p2602_p7 = scmp.lt.s32.totalorder %s457_s16, %s457_s16 }
 0x100   : > { %p2603_p9 = scmp.lt.s32.totalorder %s2601_s21, %s2594_s29 }
 0x101   : > { %p2597_p2 = pnand %p2595_p0, %p2935_p8 }
 0x102   : > { %p2604_p5 = por %p2603_p9, %p2602_p7 }
 0x103   : > { %p2598_p4 = pneg %p2597_p2 }
 0x105   : > { %p2605_p10 = pnand %p2604_p5, %p2598_p4 }
 0x107   : > { %2608 = shalt.err (!%p2605_p10)
}
 0x108   : > { %2198 = dma.hbm_to_vmem [thread:$0]  (!%p2919_p6), %s3429_s10, 16, %s457_s16, [#allocation19]  }
 0x109   : > { %s2609_s18 = scalar_lea.hbm %s3430_s11, 16 }
 0x10a   : > { %p2610_p1 = scmp.ne.s32.totalorder %s3430_s11, %s2609_s18  ;;  %p2616_p12 = scmp.lt.u32.totalorder %s2609_s18, %s3430_s11 }
 0x10c   : > { %p2612_p3 = pnand %p2610_p1, %p2935_p8 }
 0x10e   : > { %p2613_p11 = pneg %p2612_p3 }
 0x110   : > { %p2618_p13 = pnand %p2616_p12, %p2613_p11 }
 0x112   : > { %2621 = shalt.err (!%p2618_p13)
}
 0x113   : > { %s2622_s12 = scalar_lea.vmem %s468_s20, 16  ;;  %s2629_s16 = scalar_lea.vmem %s468_s20, 32 }
 0x114   : > { %p2623_p0 = scmp.ne.s32.totalorder %s468_s20, %s2622_s12  ;;  %p2630_p7 = scmp.lt.s32.totalorder %s468_s20, %s468_s20 }
 0x115   : > { %p2631_p9 = scmp.lt.s32.totalorder %s2629_s16, %s2622_s12 }
 0x116   : > { %p2625_p2 = pnand %p2623_p0, %p2935_p8 }
 0x117   : > { %p2632_p5 = por %p2631_p9, %p2630_p7 }
 0x118   : > { %p2626_p4 = pneg %p2625_p2 }
 0x11a   : > { %p2633_p10 = pnand %p2632_p5, %p2626_p4 }
 0x11c   : > { %2636 = shalt.err (!%p2633_p10)
}
 0x11d   : > { %s3464_s24 = sld [smem:[#allocation32_spill]]  ;;  %s3465_s21 = sld [smem:[#allocation34_spill]] }
 0x11e   : > { %2201 = dma.hbm_to_vmem [thread:$0]  (!%p2919_p6), %s3430_s11, 16, %s468_s20, [#allocation22]  }
 0x11f   : > { %s1884_s17 = sadd.s32 4294967294, %s2773_s26   ;;  %s46_s19 = sadd.s32 1, %s2769_s25 }
 0x120   : > { %s53_s14 = sadd.s32 1, %s2761_s23  ;;  %p48_p8 = scmp.ge.s32.totalorder %s46_s19, 2 }
 0x121   : > { %p60_p1 = scmp.ne.s32.totalorder %s2761_s23, %s2757_s22  ;;  %p61_p3 = scmp.eq.s32.totalorder %s2773_s26, 0 }
 0x122   : > { %s3492_s19 = smov (%p48_p8, %s46_s19), 0  ;;  %s3469_s18 = sadd.s32 4294967295, %s2773_s26  }
 0x123   : > { %p66_p11 = scmp.ne.s32.totalorder %s2757_s22, %s3464_s24  ;;  %p3165_p12 = por %p61_p3, %p60_p1 }
 0x124   : > { %p3467_p13 = scmp.ne.s32.totalorder %s3465_s21, 0  ;;  %s50_s13 = ssub.s32 %s2769_s25, %s3492_s19 }
 0x125   : > { %p323_p0 = scmp.eq.s32.totalorder %s3469_s18, 1  ;;  %p51_p2 = scmp.eq.s32.totalorder %s50_s13, 0 }
 0x126   : > { %p3171_p6 = por %p3467_p13, %p66_p11  ;;  %p329_p4 = scmp.eq.s32.totalorder %s1884_s17, 1 }
 0x127   : > { %p3179_p7 = por %p323_p0, %p60_p1  ;;  %p2221_p9 = scmp.lt.s32.totalorder %s2773_s26, 2 }
 0x128   : > { %s3185_s15 = scalar_select %p51_p2, %s2761_s23, %s53_s14  }
 0x129   : > { %s3470_s28 = scalar_select %p3179_p7, 1, 0 }
 0x12a   : > { %p3187_p5 = por %p329_p4, %p66_p11  ;;  %s478_s30 = sand.u32 1, %s2761_s23  }
 0x12b   : > { %s1898_s12 = sshll.u32 %s478_s30, 3  ;;  %s1899_s16 = sshll.u32 %s2769_s25, 7 }
 0x12c   : > { %s3471_s27 = scalar_select %p3187_p5, 1, 0 }
 0x12d   : > { %s3472_s24 = sld [smem:[#allocation36_spill]]  ;;  %s482_s17 = scalar_lea.vmem [#allocation3], %s1898_s12 }
 0x12e   : > { %s489_s13 = sshll.u32 %s482_s17, 4  ;;  %p3202_p10 = pnand %p2221_p9, %p3165_p12  ;;  %s3198_s13 = int_to_ptr.vmem [resolvable:$true] %s489_s13 }
 0x12f   : > { %s479_s18 = scalar_lea.sflag [#allocation4], %s478_s30 }
 0x130   : > { %p2639_p1 = pneg %p3202_p10 }
 0x133   : > { %s3473_s2 = smov %s3472_s24  ;;  %s3196_s21 = scalar_lea.hbm %s3472_s24, %s1899_s16 }
 0x134   : > { %s2637_s3 = scalar_lea.hbm %s3196_s21, 128  ;;  %s2642_s0 = scalar_lea.hbm %s3473_s2, 256 }
 0x135   : > { %p2638_p8 = scmp.ne.s32.totalorder %s3196_s21, %s2637_s3  ;;  %p2643_p12 = scmp.lt.u32.totalorder %s3196_s21, %s3473_s2 }
 0x136   : > { %p2644_p13 = scmp.lt.u32.totalorder %s2642_s0, %s2637_s3  ;;  %p2646_p2 = scmp.lt.u32.totalorder %s2637_s3, %s3196_s21 }
 0x137   : > { %p2640_p3 = pnand %p2639_p1, %p2638_p8 }
 0x138   : > { %p2645_p0 = por %p2644_p13, %p2643_p12 }
 0x139   : > { %p2641_p11 = pneg %p2640_p3 }
 0x13a   : > { %p2647_p4 = por %p2646_p2, %p2645_p0 }
 0x13c   : > { %p2648_p9 = pnand %p2647_p4, %p2641_p11 }
 0x13e   : > { %2651 = shalt.err (!%p2648_p9)
}
 0x13f   : > { %s2652_s30 = scalar_lea.vmem %s3198_s13, 128  ;;  %s2788_s24 = smov [#allocation3]  }
 0x140   : > { %p2653_p8 = scmp.ne.s32.totalorder %s3198_s13, %s2652_s30  ;;  %s2657_s17 = sshll.u32 %s2788_s24, 4  ;;  %s2658_s17 = int_to_ptr.vmem [resolvable:$false] %s2657_s17 }
 0x141   : > { %s2659_s12 = scalar_lea.vmem %s2658_s17, 256  ;;  %p2660_p7 = scmp.lt.s32.totalorder %s3198_s13, %s2658_s17 }
 0x142   : > { %p2655_p3 = pnand %p2653_p8, %p2639_p1  ;;  %p2661_p12 = scmp.lt.s32.totalorder %s2659_s12, %s2652_s30 }
 0x144   : > { %p2656_p5 = pneg %p2655_p3  ;;  %p2662_p13 = por %p2661_p12, %p2660_p7 }
 0x146   : > { %p2663_p0 = pnand %p2662_p13, %p2656_p5 }
 0x148   : > { %2666 = shalt.err (!%p2663_p0)
}
 0x149   : > { %2205 = dma.hbm_to_vmem [thread:$0]  (!%p3202_p10), %s3196_s21, 128, %s3198_s13, %s479_s18  }
 0x14a   : > { %s3475_s3 = sld [smem:[#allocation35_spill]] }
 0x150   : > { %p3476_p11 = scmp.ne.s32.totalorder %s3475_s3, 0 }
 0x151   : > { %s3234_s16 = sand.u32 (!%p3476_p11), 1, %s2757_s22  }
 0x152   : > { %498 = sbr.rel (%p3476_p11) target bundleno = 3124 (0xc34), region = 68  ;;  %s1901_s0 = sshll.u32 (!%p3476_p11), %s3234_s16, 3 }
 0x153   : > { %s501_s1 = scalar_lea.sflag (!%p3476_p11), [#allocation4], %s3234_s16  ;;  %s504_s29 = scalar_lea.vmem (!%p3476_p11), [#allocation3], %s1901_s0 }
 0x159   : > { %2720 = dma.done.wait (%p3171_p6), %s501_s1, 128  }
 0x15a   : > { %2722 = vsyncadd (%p3171_p6), %s501_s1, 4294967168  ;;  %s3477_s21 = sld [smem:[#allocation34_spill]] }
 0x160   : > { %p3478_p7 = scmp.ne.s32.totalorder %s3477_s21, 0 }
 0x162   : > { %2724 = dma.done.wait (%p3478_p7), [#allocation7], 512  }
 0x163   : > { %2726 = vsyncadd (%p3478_p7), [#allocation7], 4294966784 }
 0x164   : > { %2728 = dma.done.wait (%p3478_p7), [#allocation10], 32  }
 0x165   : > { %2730 = vsyncadd (%p3478_p7), [#allocation10], 4294967264 }
 0x166   : > { %2732 = dma.done.wait (%p3478_p7), [#allocation13], 528  }
 0x167   : > { %2734 = vsyncadd (%p3478_p7), [#allocation13], 4294966768 }
 0x168   : > { %2736 = dma.done.wait (%p3478_p7), [#allocation16], 2064  }
 0x169   : > { %2738 = vsyncadd (%p3478_p7), [#allocation16], 4294965232 }
 0x16a   : > { %2740 = dma.done.wait (%p3478_p7), [#allocation19], 32  }
 0x16b   : > { %2742 = vsyncadd (%p3478_p7), [#allocation19], 4294967264 }
 0x16c   : > { %2744 = dma.done.wait (%p3478_p7), [#allocation22], 16  }
 0x16d   : > { %2746 = vsyncadd (%p3478_p7), [#allocation22], 4294967280  ;;  %v2789_v0 = vmov 0.0|0.0   ;;  %vm2790_vm0 = vmmov 0   ;;  %v2791_v1 = vmov 0.0   ;;  %v594_v2 = vld [vmem:[#allocation8] sm:$0xff] }
 0x16e   : > { %2084 = vmatprep.subr.bf16.mxu0 %v2789_v0  ;;  %1988 = vmatprep.mubr.msk.f32.mxu0 %vm2790_vm0, %v2791_v1  ;;  %v595_v3 = vld [vmem:[#allocation8 + $0x8] sm:$0xff]  ;;  %v675_v5 = vld [vmem:[#allocation6] sm:$0xff]  ;;  %v676_v6 = vld [vmem:[#allocation6 + $0x8] sm:$0xff]  ;;  %vm596_vm1 = vcmask 130048   ;;  %vm670_vm2 = vcmask 523264   ;;  %vm762_vm3 = vcmask 64512  }
 0x16f   : > { %2023 = vmatprep.subr.mxu1 %v2791_v1  ;;  %2025 = vmatprep.mubr.msk.f32.mxu1 %vm2790_vm0, %v2791_v1  ;;  %v2085_v4 = vpack.c.bf16 %v595_v3, %v594_v2  ;;  %v593_v7 = vld [vmem:[%s504_s29] sm:$0xff]  ;;  %v2088_v8 = vpack.c.bf16 %v676_v6, %v675_v5  ;;  %s2792_s20 = smov 120   ;;  %s2793_s13 = smov 96   ;;  %v1916_v60 = vld [vmem:[#allocation9] ss:$0 sm:$0xff]  ;;  %vm1435_vm4 = vcmask 195584  }
 0x170   : > { %s2794_s14 = smov 88   ;;  %s2795_s18 = smov 112   ;;  %vm1444_vm5 = vcmask 261120  }
 0x171   : > { %2086 = vmatpush3.bf16.msra.mxu0 %v2085_v4  ;;  %s2796_s30 = smov 104   ;;  %s2797_s24 = smov 80  }
 0x172   : > { %2087 = vmatprep.subr.bf16.mxu0 %v2789_v0  ;;  %s2798_s17 = smov 72   ;;  %s2799_s12 = smov 32  }
 0x173   : > { %s2800_s3 = smov 8   ;;  %s2801_s1 = smov 16  }
 0x174   : > { %1989 = vmatmul.mubr.msk.f32.vlgmr.msra.gmra.mrb[0].mxu0 %vm596_vm1, %v593_v7  ;;  %s2802_s29 = smov 24   ;;  %s3479_s21 = sld [smem:[#allocation33_spill]] }
 0x175   : > { %2089 = vmatpush3.bf16.msra.mxu0 %v2088_v8  ;;  %1995 = vmatprep.mubr.msk.f32.mxu0 %vm2790_vm0, %v2791_v1  ;;  %p3482_p5 = scmp.ne.s32.totalorder %s3470_s28, 0 }
 0x176   : > { %1998 = vmatprep.subr.mxu0 %v2791_v1 }
 0x178   : > { %1996 = vmatmul.mubr.msk.f32.vlgmr.msra.gmra.mrb[2].mxu0 %vm596_vm1, %v593_v7 }
 0x179   : > { %2000 = vmatprep.mubr.msk.f32.mxu0 %vm2790_vm0, %v2791_v1 }
 0x247   : > { %v666_v9 = vpop.f32.mrb[0].mxu0 }
 0x248   : > { %671 = vst.msk [vmem:[#allocation2] sm:$0xff] %vm670_vm2, %v666_v9  ;;  %v1990_v10 = vpop.f32.mrb[1].mxu0 }
 0x24b   : > { %v3282_v11 = vpop.f32.mrb[2].mxu0 }
 0x24c   : > { %v1997_v12 = vpop.f32.mrb[3].mxu0 }
 0x24f   : > { %v3284_v13 = vld [vmem:[#allocation2] sm:$0xff] }
 0x250   : > { %928 = vrot.lane.b32.xlu1 %v3284_v13, %s2792_s20  ;;  %1999 = vmatpush3.xpose.msk.msra.mxu0 %vm762_vm3, %v3284_v13 }
 0x251   : > { %2003 = vmatprep.subr.mxu0 %v2791_v1 }
 0x253   : > { %2001 = vmatmul.mubr.msk.f32.vlgmr.msra.gmra.mrb[4].mxu0 %vm762_vm3, %v3282_v11 }
 0x254   : > { %926 = vrot.lane.b32.xlu1 %v3282_v11, %s2792_s20  ;;  %2005 = vmatprep.mubr.msk.f32.mxu0 %vm2790_vm0, %v2791_v1  ;;  %s1937_s20 = sshll.u32 %s3479_s21, 7 }
 0x2c2   : > { %v929_v21 = vpop.permute.xlu1 %928 }
 0x2c6   : > { %v927_v23 = vpop.permute.xlu1 %926 }
 0x326   : > { %v835_v14 = vpop.f32.mrb[4].mxu0 }
 0x327   : > { %v2002_v15 = vpop.f32.mrb[5].mxu0  ;;  %v839_v16 = vsel %vm762_vm3, %v835_v14, -inf }
 0x328   : > { %840 = vmax.xlane.f32.xlu0 %v839_v16 }
 0x33e   : > { %848 = vrot.lane.b32.xlu0 %v3284_v13, %s2793_s13 }
 0x342   : > { %1013 = vrot.lane.b32.xlu0 %v3284_v13, %s2794_s14 }
 0x346   : > { %1093 = vrot.lane.b32.xlu0 %v3284_v13, %s2795_s18 }
 0x34a   : > { %1091 = vrot.lane.b32.xlu0 %v3282_v11, %s2795_s18 }
 0x34e   : > { %1258 = vrot.lane.b32.xlu0 %v3284_v13, %s2796_s30 }
 0x352   : > { %1256 = vrot.lane.b32.xlu0 %v3282_v11, %s2796_s30 }
 0x3b5   : > { %v841_v17 = vpop.xlane.xlu0 %840 }
 0x3b6   : > { %v842_v18 = vsub.f32 %v835_v14, %v841_v17 }
 0x3b8   : > { %v843_v19 = vmul.f32 1.442695, %v842_v18 }
 0x3b9   : > { %v849_v20 = vpop.permute.xlu0 %848 }
 0x3ba   : > { %2309 = vpow2.f32 %v843_v19  ;;  %2004 = vmatpush3.msra.mxu0 %v849_v20 }
 0x3bb   : > { %2008 = vmatprep.subr.mxu0 %v2791_v1 }
 0x3bd   : > { %v1014_v24 = vpop.permute.xlu0 %1013 }
 0x3c1   : > { %v1094_v33 = vpop.permute.xlu0 %1093 }
 0x3c4   : > { %v2310_v22 = vpop.eup %2309 }
 0x3c5   : > { %2006 = vmatmul.mubr.msk.f32.vlgmr.msra.gmra.mrb[6].mxu0 %vm762_vm3, %v2310_v22  ;;  %v1092_v34 = vpop.permute.xlu0 %1091  ;;  %v845_v47 = vsel %vm762_vm3, %v2310_v22, 0.0 }
 0x3c6   : > { %2009 = vmatpush3.xpose.msk.msra.mxu0 %vm762_vm3, %v929_v21  ;;  %2010 = vmatprep.mubr.msk.f32.mxu0 %vm2790_vm0, %v2791_v1 }
 0x3c7   : > { %2013 = vmatprep.subr.mxu0 %v2791_v1 }
 0x3c9   : > { %2011 = vmatmul.mubr.msk.f32.vlgmr.msra.gmra.mrb[8].mxu0 %vm762_vm3, %v927_v23  ;;  %v1259_v36 = vpop.permute.xlu0 %1258 }
 0x3ca   : > { %2014 = vmatpush3.msra.mxu0 %v1014_v24  ;;  %2015 = vmatprep.mubr.msk.f32.mxu0 %vm2790_vm0, %v2791_v1 }
 0x3cb   : > { %2018 = vmatprep.subr.mxu0 %v2791_v1 }
 0x3cd   : > { %v1257_v37 = vpop.permute.xlu0 %1256 }
 0x498   : > { %v3313_v25 = vpop.f32.mrb[6].mxu0 }
 0x499   : > { %v2007_v26 = vpop.f32.mrb[7].mxu0 }
 0x49c   : > { %v1000_v27 = vpop.f32.mrb[8].mxu0 }
 0x49d   : > { %v2012_v28 = vpop.f32.mrb[9].mxu0  ;;  %v1004_v29 = vsel %vm762_vm3, %v1000_v27, -inf }
 0x49e   : > { %1005 = vmax.xlane.f32.xlu1 %v1004_v29 }
 0x52b   : > { %v1006_v30 = vpop.xlane.xlu1 %1005 }
 0x52c   : > { %v1007_v31 = vsub.f32 %v1000_v27, %v1006_v30  ;;  %v1473_v30 = vld [vmem:[#allocation14] sm:$0xff] }
 0x52e   : > { %v1008_v32 = vmul.f32 1.442695, %v1007_v31  ;;  %v1474_v31 = vld [vmem:[#allocation14 + $0x8] sm:$0xff] }
 0x530   : > { %2311 = vpow2.f32 %v1008_v32  ;;  %v2091_v32 = vpack.c.bf16 %v1474_v31, %v1473_v30 }
 0x53a   : > { %v2312_v35 = vpop.eup %2311 }
 0x53b   : > { %2016 = vmatmul.mubr.msk.f32.vlgmr.msra.gmra.mrb[10].mxu0 %vm762_vm3, %v2312_v35  ;;  %v1010_v46 = vsel %vm762_vm3, %v2312_v35, 0.0 }
 0x53c   : > { %2019 = vmatpush3.xpose.msk.msra.mxu0 %vm762_vm3, %v1094_v33  ;;  %2020 = vmatprep.mubr.msk.f32.mxu0 %vm2790_vm0, %v2791_v1  ;;  %v1475_v33 = vld [vmem:[#allocation14 + $0x10] sm:$0xff] }
 0x53d   : > { %2028 = vmatprep.subr.mxu0 %v2791_v1 }
 0x53f   : > { %2021 = vmatmul.mubr.msk.f32.vlgmr.msra.gmra.mrb[12].mxu0 %vm762_vm3, %v1092_v34  ;;  %v1476_v34 = vld [vmem:[#allocation14 + $0x18] sm:$0xff] }
 0x540   : > { %2029 = vmatpush3.xpose.msk.msra.mxu0 %vm762_vm3, %v1259_v36  ;;  %2030 = vmatprep.mubr.msk.f32.mxu0 %vm2790_vm0, %v2791_v1  ;;  %v2094_v35 = vpack.c.bf16 %v1476_v34, %v1475_v33  ;;  %v1558_v36 = vld [vmem:[#allocation17] sm:$0xff] }
 0x541   : > { %2090 = vmatprep.subr.bf16.mxu0 %v2789_v0 }
 0x543   : > { %2031 = vmatmul.mubr.msk.f32.vlgmr.msra.gmra.mrb[14].mxu0 %vm762_vm3, %v1257_v37  ;;  %v1559_v37 = vld [vmem:[#allocation17 + $0x8] sm:$0xff] }
 0x544   : > { %2046 = vmatprep.mubr.msk.f32.mxu0 %vm2790_vm0, %v2791_v1  ;;  %2092 = vmatpush3.bf16.msra.mxu0 %v2091_v32 }
 0x545   : > { %2093 = vmatprep.subr.bf16.mxu0 %v2789_v0 }
 0x548   : > { %2095 = vmatpush3.bf16.msra.mxu0 %v2094_v35 }
 0x60e   : > { %v1085_v38 = vpop.f32.mrb[10].mxu0 }
 0x60f   : > { %v2017_v39 = vpop.f32.mrb[11].mxu0 }
 0x610   : > { %v2097_v39 = vpack.c.bf16 %v1559_v37, %v1558_v36 }
 0x612   : > { %v1165_v40 = vpop.f32.mrb[12].mxu0 }
 0x613   : > { %v2022_v41 = vpop.f32.mrb[13].mxu0  ;;  %v1169_v42 = vsel %vm762_vm3, %v1165_v40, -inf }
 0x614   : > { %1170 = vmax.xlane.f32.xlu1 %v1169_v42  ;;  %v1562_v42 = vld [vmem:[#allocation17 + $0x20] sm:$0xff] }
 0x616   : > { %v1330_v43 = vpop.f32.mrb[14].mxu0 }
 0x617   : > { %v2032_v44 = vpop.f32.mrb[15].mxu0  ;;  %v1334_v45 = vsel %vm762_vm3, %v1330_v43, -inf }
 0x618   : > { %1335 = vmax.xlane.f32.xlu0 %v1334_v45  ;;  %v1564_v45 = vld [vmem:[#allocation17 + $0x30] sm:$0xff] }
 0x625   : > { %1178 = vrot.lane.b32.xlu1 %v3284_v13, %s2797_s24  ;;  %s3480_s24 = sld [smem:[#allocation40_spill]] }
 0x629   : > { %1343 = vrot.lane.b32.xlu1 %v3284_v13, %s2798_s17 }
 0x62b   : > { %s3481_s17 = smov %s3480_s24 }
 0x64d   : > { %1011 = vadd.xlane.f32.xlu1 %v1010_v46  ;;  %v1565_v46 = vld [vmem:[#allocation17 + $0x38] sm:$0xff] }
 0x651   : > { %846 = vadd.xlane.f32.xlu1 %v845_v47  ;;  %v2106_v47 = vpack.c.bf16 %v1565_v46, %v1564_v45 }
 0x6a1   : > { %v1171_v48 = vpop.xlane.xlu1 %1170 }
 0x6a2   : > { %v1172_v49 = vsub.f32 %v1165_v40, %v1171_v48  ;;  %v1561_v40 = vld [vmem:[#allocation17 + $0x18] sm:$0xff]  ;;  %v1566_v48 = vld [vmem:[#allocation17 + $0x40] sm:$0xff] }
 0x6a4   : > { %v1173_v50 = vmul.f32 1.442695, %v1172_v49  ;;  %v1567_v49 = vld [vmem:[#allocation17 + $0x48] sm:$0xff] }
 0x6a5   : > { %v1179_v51 = vpop.permute.xlu1 %1178  ;;  %v1336_v52 = vpop.xlane.xlu0 %1335 }
 0x6a6   : > { %2313 = vpow2.f32 %v1173_v50  ;;  %v1337_v53 = vsub.f32 %v1330_v43, %v1336_v52  ;;  %2024 = vmatpush3.msra.mxu1 %v1179_v51  ;;  %v1563_v43 = vld [vmem:[#allocation17 + $0x28] sm:$0xff]  ;;  %v2109_v50 = vpack.c.bf16 %v1567_v49, %v1566_v48  ;;  %v1568_v51 = vld [vmem:[#allocation17 + $0x50] sm:$0xff]  ;;  %v1569_v52 = vld [vmem:[#allocation17 + $0x58] sm:$0xff] }
 0x6a7   : > { %2033 = vmatprep.subr.mxu1 %v2791_v1  ;;  %v2103_v44 = vpack.c.bf16 %v1563_v43, %v1562_v42 }
 0x6a8   : > { %v1338_v54 = vmul.f32 1.442695, %v1337_v53  ;;  %v2112_v53 = vpack.c.bf16 %v1569_v52, %v1568_v51 }
 0x6a9   : > { %v1344_v56 = vpop.permute.xlu1 %1343 }
 0x6aa   : > { %2315 = vpow2.f32 %v1338_v54  ;;  %v1570_v54 = vld [vmem:[#allocation17 + $0x60] sm:$0xff] }
 0x6b0   : > { %v2314_v55 = vpop.eup %2313 }
 0x6b1   : > { %2026 = vmatmul.mubr.msk.f32.vlgmr.msra.gmra.mrb[0].mxu1 %vm762_vm3, %v2314_v55  ;;  %v1175_v57 = vsel %vm762_vm3, %v2314_v55, 0.0  ;;  %v1571_v55 = vld [vmem:[#allocation17 + $0x68] sm:$0xff] }
 0x6b2   : > { %2034 = vmatpush3.msra.mxu1 %v1344_v56  ;;  %1176 = vadd.xlane.f32.xlu0 %v1175_v57  ;;  %v2115_v56 = vpack.c.bf16 %v1571_v55, %v1570_v54 }
 0x6b3   : > { %2035 = vmatprep.mubr.msk.f32.mxu1 %vm2790_vm0, %v2791_v1  ;;  %2096 = vmatprep.subr.bf16.mxu1 %v2789_v0 }
 0x6b4   : > { %v2316_v58 = vpop.eup %2315 }
 0x6b5   : > { %2036 = vmatmul.mubr.msk.f32.vlgmr.msra.gmra.mrb[2].mxu1 %vm762_vm3, %v2316_v58  ;;  %v1340_v59 = vsel %vm762_vm3, %v2316_v58, 0.0 }
 0x6b6   : > { %1341 = vadd.xlane.f32.xlu0 %v1340_v59  ;;  %2081 = vmatprep.mubr.msk.f32.mxu1 %vm2790_vm0, %v2791_v1 }
 0x6b7   : > { %2098 = vmatpush3.bf16.msra.mxu1 %v2097_v39 }
 0x6b8   : > { %2099 = vmatprep.subr.bf16.mxu1 %v2789_v0 }
 0x6cc   : > { %757 = vrot.lane.b32.xlu0 %v1916_v60, %s2799_s12  ;;  %s3369_s12 = scalar_lea.hbm %s3480_s24, %s1937_s20 }
 0x6da   : > { %v1012_v61 = vpop.xlane.xlu1 %1011 }
 0x6db   : > { %2317 = vrcp.f32 %v1012_v61  ;;  %v1929_v61 = vld [vmem:[#allocation11] ss:$0 sm:$0xff] }
 0x6de   : > { %v847_v14 = vpop.xlane.xlu1 %846 }
 0x6e5   : > { %v2318_v62 = vpop.eup %2317 }
 0x6e6   : > { %v1090_v63 = vmul.f32 %v2318_v62, %v1085_v38  ;;  %v1560_v38 = vld [vmem:[#allocation17 + $0x10] sm:$0xff] }
 0x6e7   : > { %v2100_v41 = vpack.c.bf16 %v1561_v40, %v1560_v38 }
 0x6e8   : > { %1422 = vrot.lane.b32.xlu0 %v1090_v63, %s2800_s3  ;;  %v1930_v63 = vld [vmem:[#allocation12] ss:$0 sm:$0xff]  ;;  %s1683_s3 = scalar_lea.sflag [#allocation5], %s3234_s16 }
 0x6e9   : > { %2101 = vmatpush3.bf16.msra.mxu1 %v2100_v41 }
 0x6ea   : > { %2102 = vmatprep.subr.bf16.mxu1 %v2789_v0 }
 0x6ed   : > { %2104 = vmatpush3.bf16.msra.mxu1 %v2103_v44 }
 0x6ee   : > { %2105 = vmatprep.subr.bf16.mxu1 %v2789_v0 }
 0x6f1   : > { %2107 = vmatpush3.bf16.msra.mxu1 %v2106_v47 }
 0x6f2   : > { %2108 = vmatprep.subr.bf16.mxu1 %v2789_v0 }
 0x6f5   : > { %2110 = vmatpush3.bf16.msra.mxu1 %v2109_v50 }
 0x6f6   : > { %2111 = vmatprep.subr.bf16.mxu1 %v2789_v0 }
 0x6f9   : > { %2113 = vmatpush3.bf16.msra.mxu1 %v2112_v53 }
 0x6fa   : > { %2114 = vmatprep.subr.bf16.mxu1 %v2789_v0 }
 0x6fd   : > { %2116 = vmatpush3.bf16.msra.mxu1 %v2115_v56 }
 0x6fe   : > { %2117 = vmatprep.subr.bf16.mxu1 %v2789_v0 }
 0x73f   : > { %v1177_v2 = vpop.xlane.xlu0 %1176 }
 0x740   : > { %2319 = vrcp.f32 %v1177_v2 }
 0x743   : > { %v1342_v3 = vpop.xlane.xlu0 %1341 }
 0x744   : > { %2321 = vrcp.f32 %v1342_v3 }
 0x745   : > { %2323 = vrcp.f32 %v847_v14 }
 0x747   : > { %v758_v12 = vpop.permute.xlu0 %757 }
 0x748   : > { %v760_v13 = vadd.f32 %v758_v12, %v3282_v11 }
 0x74a   : > { %v2320_v4 = vpop.eup %2319 }
 0x74e   : > { %v2322_v1 = vpop.eup %2321 }
 0x74f   : > { %v2324_v16 = vpop.eup %2323 }
 0x750   : > { %v925_v17 = vmul.f32 %v2324_v16, %v3313_v25 }
 0x75a   : > { %v1423_v15 = vpop.permute.xlu0 %1422 }
 0x75b   : > { %v1433_v20 = vsel %vm762_vm3, %v925_v17, %v1423_v15 }
 0x784   : > { %v1250_v5 = vpop.f32.mrb[0].mxu1 }
 0x785   : > { %v1255_v6 = vmul.f32 %v2320_v4, %v1250_v5  ;;  %v2027_v7 = vpop.f32.mrb[1].mxu1  ;;  %v1572_v4 = vld [vmem:[#allocation17 + $0x70] sm:$0xff]  ;;  %v1573_v5 = vld [vmem:[#allocation17 + $0x78] sm:$0xff] }
 0x786   : > { %v1931_v7 = vld [vmem:[#allocation15] ss:$0 sm:$0xff] }
 0x787   : > { %1426 = vrot.lane.b32.xlu1 %v1255_v6, %s2801_s1  ;;  %v2118_v6 = vpack.c.bf16 %v1573_v5, %v1572_v4 }
 0x788   : > { %v1415_v8 = vpop.f32.mrb[2].mxu1 }
 0x789   : > { %v1420_v9 = vmul.f32 %v2322_v1, %v1415_v8  ;;  %v2037_v10 = vpop.f32.mrb[3].mxu1  ;;  %2119 = vmatpush3.bf16.msra.mxu1 %v2118_v6 }
 0x78a   : > { %v1933_v10 = vld [vmem:[#allocation18] ss:$0 sm:$0xff] }
 0x78b   : > { %1430 = vrot.lane.b32.xlu0 %v1420_v9, %s2802_s29 }
 0x78f   : > { %1438 = vrot.lane.b32.xlu0 %v760_v13, %s2793_s13  ;;  %s588_s13 = scalar_lea.vmem [#allocation23], %s1901_s0  ;;  %s2803_s0 = smov [#allocation23]  }
 0x790   : > { %s1697_s14 = sshll.u32 %s588_s13, 4  ;;  %s2671_s29 = sshll.u32 %s2803_s0, 4  ;;  %s3371_s14 = int_to_ptr.vmem [resolvable:$true] %s1697_s14  ;;  %s2672_s29 = int_to_ptr.vmem [resolvable:$false] %s2671_s29 }
 0x791   : > { %s2667_s1 = scalar_lea.vmem %s3371_s14, 128  ;;  %s2673_s21 = scalar_lea.vmem %s2672_s29, 256 }
 0x792   : > { %p2668_p6 = scmp.ne.s32.totalorder %s3371_s14, %s2667_s1  ;;  %p2674_p2 = scmp.lt.s32.totalorder %s3371_s14, %s2672_s29 }
 0x793   : > { %p2675_p4 = scmp.lt.s32.totalorder %s2673_s21, %s2667_s1 }
 0x794   : > { %p2669_p10 = pnand %p2668_p6, %p3482_p5 }
 0x795   : > { %p2676_p9 = por %p2675_p4, %p2674_p2 }
 0x796   : > { %p2670_p1 = pneg %p2669_p10 }
 0x798   : > { %p2677_p8 = pnand %p2676_p9, %p2670_p1 }
 0x7f9   : > { %v1427_v18 = vpop.permute.xlu1 %1426 }
 0x7fa   : > { %v1434_v21 = vsel %vm596_vm1, %v1433_v20, %v1427_v18 }
 0x7fd   : > { %v1431_v19 = vpop.permute.xlu0 %1430 }
 0x7fe   : > { %v1436_v22 = vsel %vm1435_vm4, %v1434_v21, %v1431_v19 }
 0x801   : > { %v1439_v23 = vpop.permute.xlu0 %1438 }
 0x802   : > { %v1441_v24 = vadd.f32 %v1439_v23, %v1436_v22 }
 0x804   : > { %v1445_v11 = vsel %vm1444_vm5, %v1441_v24, 0.0 }
 0x805   : > { %1446 = vadd.xlane.f32.xlu0 %v1445_v11 }
 0x892   : > { %v1447_v26 = vpop.xlane.xlu0 %1446 }
 0x893   : > { %v1449_v27 = vmul.f32 0.03125, %v1447_v26  ;;  %v1934_v26 = vld [vmem:[#allocation20] ss:$0 sm:$0xff] }
 0x895   : > { %v1450_v28 = vsub.f32 %v1441_v24, %v1449_v27 }
 0x897   : > { %v1451_v29 = vmul.f32 %v1450_v28, %v1450_v28 }
 0x899   : > { %v1452_v25 = vsel %vm1444_vm5, %v1451_v29, 0.0 }
 0x89a   : > { %1453 = vadd.xlane.f32.xlu1 %v1452_v25 }
 0x927   : > { %v1454_v57 = vpop.xlane.xlu1 %1453 }
 0x928   : > { %v1455_v58 = vmul.f32 0.03125, %v1454_v57 }
 0x92a   : > { %v1456_v59 = vadd.f32 1e-05, %v1455_v58 }
 0x92c   : > { %2325 = vrsqrt.f32 %v1456_v59 }
 0x936   : > { %v2326_v60 = vpop.eup %2325 }
 0x937   : > { %v1458_v62 = vmul.f32 %v2326_v60, %v1450_v28  ;;  %v1935_v28 = vld [vmem:[#allocation21] ss:$0 sm:$0xff] }
 0x939   : > { %v1465_v2 = vmul.f32 %v1929_v61, %v1458_v62 }
 0x93b   : > { %v1472_v3 = vadd.f32 %v1930_v63, %v1465_v2 }
 0x93d   : > { %2047 = vmatmul.mubr.msk.f32.vlgmr.msra.gmra.mrb[16].mxu0 %vm1444_vm5, %v1472_v3 }
 0xa10   : > { %v1553_v1 = vpop.f32.mrb[16].mxu0 }
 0xa11   : > { %v1554_v8 = vadd.f32 %v1931_v7, %v1553_v1  ;;  %v2048_v0 = vpop.f32.mrb[17].mxu0 }
 0xa13   : > { %v1557_v9 = vmax.f32 %v1554_v8, 0.0 }
 0xa15   : > { %2082 = vmatmul.mubr.f32.vlgmr.msra.gmra.mrb[4].mxu1 %v1557_v9 }
 0xae8   : > { %v1647_v12 = vpop.f32.mrb[4].mxu1 }
 0xae9   : > { %v1648_v13 = vadd.f32 %v1933_v10, %v1647_v12  ;;  %v2083_v14 = vpop.f32.mrb[5].mxu1 }
 0xaeb   : > { %v1651_v15 = vadd.f32 %v1648_v13, %v1472_v3 }
 0xaed   : > { %v1654_v16 = vsel %vm1444_vm5, %v1651_v15, 0.0 }
 0xaee   : > { %1655 = vadd.xlane.f32.xlu0 %v1654_v16 }
 0xb7b   : > { %v1656_v17 = vpop.xlane.xlu0 %1655 }
 0xb7c   : > { %v1657_v18 = vmul.f32 0.03125, %v1656_v17 }
 0xb7e   : > { %v1658_v19 = vsub.f32 %v1651_v15, %v1657_v18 }
 0xb80   : > { %v1659_v20 = vmul.f32 %v1658_v19, %v1658_v19 }
 0xb82   : > { %v1660_v21 = vsel %vm1444_vm5, %v1659_v20, 0.0 }
 0xb83   : > { %1661 = vadd.xlane.f32.xlu0 %v1660_v21 }
 0xc10   : > { %v1662_v22 = vpop.xlane.xlu0 %1661 }
 0xc11   : > { %v1663_v23 = vmul.f32 0.03125, %v1662_v22 }
 0xc13   : > { %v1664_v24 = vadd.f32 1e-05, %v1663_v23 }
 0xc15   : > { %2327 = vrsqrt.f32 %v1664_v24 }
 0xc1f   : > { %v2328_v11 = vpop.eup %2327 }
 0xc20   : > { %v1666_v27 = vmul.f32 %v2328_v11, %v1658_v19 }
 0xc22   : > { %v1673_v29 = vmul.f32 %v1934_v26, %v1666_v27 }
 0xc24   : > { %v1680_v25 = vadd.f32 %v1935_v28, %v1673_v29 }
 0xc26   : > { %1681 = vst.msk [vmem:[%s588_s13] sm:$0xff] %vm1444_vm5, %v1680_v25 }
 0xc27   : > { %2680 = shalt.err (!%p2677_p8)
}
 0xc28   : > { %s2681_s16 = scalar_lea.hbm %s3369_s12, 128  ;;  %s2685_s18 = scalar_lea.hbm %s3481_s17, 256 }
 0xc29   : > { %p2682_p3 = scmp.ne.s32.totalorder %s3369_s12, %s2681_s16  ;;  %p2686_p0 = scmp.lt.u32.totalorder %s3369_s12, %s3481_s17 }
 0xc2a   : > { %p2687_p11 = scmp.lt.u32.totalorder %s2685_s18, %s2681_s16  ;;  %p2689_p6 = scmp.lt.u32.totalorder %s2681_s16, %s3369_s12 }
 0xc2b   : > { %p2683_p12 = pnand %p2682_p3, %p3482_p5 }
 0xc2c   : > { %p2688_p7 = por %p2687_p11, %p2686_p0 }
 0xc2d   : > { %p2684_p13 = pneg %p2683_p12 }
 0xc2e   : > { %p2690_p10 = por %p2689_p6, %p2688_p7 }
 0xc30   : > { %p2691_p1 = pnand %p2690_p10, %p2684_p13 }
 0xc32   : > { %2694 = shalt.err (!%p2691_p1)
}
 0xc33   : > { %2166 = dma.vmem_to_hbm [thread:$0]  (%p3482_p5), %s3371_s14, 128, %s3369_s12, %s1683_s3  }
 0xc34 PF: > { %s3483_s1 = sld [smem:[#allocation32_spill]]  ;;  %p3484_p2 = scmp.ne.s32.totalorder %s3471_s27, 0 }
 0xc35   : > { %p3485_p4 = scmp.ge.s32.totalorder %s2773_s26, 2 }
 0xc37   : > { %p2207_p9 = pnand %p3485_p4, %p3484_p2 }
 0xc3a   : > { %s1709_s0 = sand.u32 1, %s3483_s1  }
 0xc3b   : > { %s1710_s29 = scalar_lea.sflag [#allocation5], %s1709_s0 }
 0xc3c   : > { %2748 = dma.done.wait (!%p2207_p9), %s1710_s29, 128  }
 0xc3d   : > { %2750 = vsyncadd (!%p2207_p9), %s1710_s29, 4294967168  ;;  %s34_s26 = sadd.s32 1, %s2773_s26   ;;  %s3486_s21 = smov %s2757_s22 }
 0xc3e   : > { %p31_p8 = scmp.ge.s32.totalorder %s34_s26, 4   ;;  %s3487_s22 = smov %s2761_s23 }
 0xc3f   : > { %s3488_s23 = smov %s3185_s15  ;;  %s3489_s24 = smov %s2769_s25 }
 0xc40   : > { %s3490_s25 = smov %s3492_s19  ;;  %33 = sbr.rel (!%p31_p8) target bundleno = 18 (0x12), region = 162 }
 0xc47   :  { %1715 = vsyncpa [#allocation4], 1 }
 0xc48   :  { %1717 = vsyncpa [#allocation4 + $0x1], 1 }
 0xc49   :  { %1718 = vsyncpa [#allocation7], 1 }
 0xc4a   :  { %1719 = vsyncpa [#allocation10], 1 }
 0xc4b   :  { %1720 = vsyncpa [#allocation13], 1 }
 0xc4c   :  { %1721 = vsyncpa [#allocation16], 1 }
 0xc4d   :  { %1722 = vsyncpa [#allocation19], 1 }
 0xc4e   :  { %1723 = vsyncpa [#allocation22], 1 }
 0xc4f   :  { %1724 = vsyncpa [#allocation5], 1 }
 0xc50   :  { %1726 = vsyncpa [#allocation5 + $0x1], 1 }

</bundles_post_ra>
